<compile_context>
chip_gen: v7x
topology: tpu7x:2x2x1
jax: 0.10.0
libtpu: 0.0.40
codegen_flags: <defaults>
</compile_context>

<pallas_src>
import functools

import jax
import jax.numpy as jnp
import numpy as np
from jax import lax
from jax.experimental import pallas as pl
from jax.experimental.pallas import tpu as pltpu

EPS = 1e-5
LANE = 128
SUBLANE = 8


def _round_up(x, m):
    return ((x + m - 1) // m) * m


def _default_vmem_limit():
    # v5e/v6e have 128 MiB VMEM, v7x has 64 MiB/TC.  Leave compiler headroom.
    try:
        cap = pltpu.get_tpu_info().vmem_capacity_bytes
    except Exception:
        return 64 * 1024 * 1024
    return int(min(100 * 1024 * 1024, max(32 * 1024 * 1024, cap - 16 * 1024 * 1024)))


VMEM_LIMIT = _default_vmem_limit()


# ----------------------------- Pallas kernels ------------------------------

def _conv_bn_stats_kernel(x_ref, w_ref, b_ref, y_ref, s1_ref, s2_ref, *,
                          kh, kw, stride, tr, wo, cr, rows_t, compute_dtype):
    """Direct conv as kh*kw shifted MXU matmuls, fused with BN partial sums.

    x_ref : (1, 1, n_ph*rows_t, wq, Cin_p)  halo row tile, phase-rearranged
    w_ref : (kh*kw, Cin_p, Cout_p)          resident weights (compute dtype)
    b_ref : (1, Cout_p)                     resident bias (f32)
    y_ref : (1, tr*wo, Cout_p)              raw conv output tile (compute dtype)
    s1/s2 : (1, 1, Cout_p)                  per-image sums, accumulated over t
    """
    t = pl.program_id(1)
    cin_p = x_ref.shape[-1]
    cout_p = y_ref.shape[-1]
    nb = min(stride, kw)
    n_chunks = tr // cr
    rows_c = cr * wo
    bias = b_ref[...]

    @pl.when(t == 0)
    def _():
        s1_ref[...] = jnp.zeros_like(s1_ref)
        s2_ref[...] = jnp.zeros_like(s2_ref)

    def taps(row0):
        # kh*kw shifted (rows_c, Cin_p) @ (Cin_p, Cout_p) MXU accumulations.
        # The accumulator covers only `cr` output rows so it stays vreg-hot and
        # is stored to y_ref exactly once per chunk (no 9x VMEM round trips).
        # TODO(synk): for Cin_p < 256 on v6e/v7x, concatenate the kw taps along
        # the contraction dim for fewer, deeper (K = kw*Cin_p) matmuls.
        acc = jnp.zeros((rows_c, cout_p), jnp.float32)
        for i in range(kh):
            for j in range(kw):
                ph = (i % stride) * nb + (j % stride)
                di, dj = i // stride, j // stride
                xt = x_ref[0, 0, pl.ds(ph * rows_t + row0 + di, cr),
                           pl.ds(dj, wo), :]
                xt = xt.reshape(rows_c, cin_p).astype(compute_dtype)
                acc = acc + jnp.dot(xt, w_ref[i * kw + j],
                                    preferred_element_type=jnp.float32)
        return acc

    def emit(row0, start, s1, s2):
        acc = taps(row0)
        y_ref[0, pl.ds(start, rows_c), :] = (acc + bias).astype(y_ref.dtype)
        # BN stats on the *pre-bias* accumulator (shifted sums: the constant
        # per-channel bias cancels out of the variance, so E[y^2]-E[y]^2 is
        # better conditioned).
        s1 = s1 + jnp.sum(acc, axis=0, keepdims=True)
        s2 = s2 + jnp.sum(acc * acc, axis=0, keepdims=True)
        return s1, s2

    s1 = jnp.zeros((1, cout_p), jnp.float32)
    s2 = jnp.zeros((1, cout_p), jnp.float32)
    if n_chunks == 1:
        s1, s2 = emit(0, 0, s1, s2)
    else:
        def body(c, carry):
            row0 = pl.multiple_of(c * cr, cr)
            start = pl.multiple_of(c * rows_c, rows_c)
            return emit(row0, start, *carry)
        s1, s2 = lax.fori_loop(0, n_chunks, body, (s1, s2),
                               unroll=(n_chunks <= 8))

    s1_ref[...] += s1.reshape(s1_ref.shape)
    s2_ref[...] += s2.reshape(s2_ref.shape)


def _bn_finalize_kernel(s1_ref, s2_ref, bias_ref, g_ref, b_ref,
                        scale_ref, shift_ref, *, count):
    """Per-image partial sums -> per-channel (scale, shift); apply is a pure FMA."""
    inv_n = 1.0 / count
    s1 = jnp.sum(s1_ref[...], axis=0, keepdims=True)
    s2 = jnp.sum(s2_ref[...], axis=0, keepdims=True)
    mean0 = s1 * inv_n                                    # mean of pre-bias conv
    var = jnp.maximum(s2 * inv_n - mean0 * mean0, 0.0)    # biased var (train BN)
    inv = lax.rsqrt(var + EPS)
    scale = g_ref[...] * inv
    scale_ref[...] = scale
    shift_ref[...] = b_ref[...] - (mean0 + bias_ref[...]) * scale


def _bn_relu_pad_kernel(y_ref, sc_ref, sh_ref, o_ref, *, ho, wo, pad):
    cp = o_ref.shape[-1]
    o_ref[...] = jnp.zeros_like(o_ref)                    # zero halo
    y = y_ref[0].astype(jnp.float32).reshape(ho, wo, cp)
    a = jnp.maximum(y * sc_ref[...] + sh_ref[...], 0.0)
    o_ref[0, pl.ds(pad, ho), pl.ds(pad, wo), :] = a.astype(o_ref.dtype)


def _bn_add_proj_relu_kernel(y2_ref, sc2_ref, sh2_ref, ys_ref, scs_ref, shs_ref, o_ref):
    a = y2_ref[...].astype(jnp.float32) * sc2_ref[...] + sh2_ref[...]
    b = ys_ref[...].astype(jnp.float32) * scs_ref[...] + shs_ref[...]
    o_ref[...] = jnp.maximum(a + b, 0.0).astype(o_ref.dtype)


def _bn_add_id_relu_kernel(y2_ref, sc2_ref, sh2_ref, xid_ref, o_ref):
    a = y2_ref[...].astype(jnp.float32) * sc2_ref[...] + sh2_ref[...]
    o_ref[...] = jnp.maximum(a + xid_ref[...].astype(jnp.float32), 0.0).astype(o_ref.dtype)


# ----------------------------- tiling helpers --------------------------------

def _pick_row_tile(ho, wo, n_ph, dh, wq, cin_p, cout_p, budget=8 * 1024 * 1024):
    """Largest divisor tr of ho whose double-buffered input+output tiles fit."""
    fallback = ho
    for tr in range(ho, 0, -1):
        if ho % tr:
            continue
        if tr != ho and (tr * wo) % SUBLANE:
            continue                       # keep the flat y tile sublane-aligned
        fallback = tr
        x_bytes = n_ph * (tr + dh) * wq * cin_p * 4
        y_bytes = tr * wo * cout_p * 4
        if 2 * (x_bytes + y_bytes) <= budget:
            return tr
    return fallback


def _pick_chunk_rows(tr, wo, max_rows=128):
    """Largest divisor cr of tr giving a vreg-friendly (<= max_rows) MXU M dim."""
    for cr in range(tr, 0, -1):
        if tr % cr:
            continue
        if cr * wo <= max_rows and (cr * wo) % SUBLANE == 0:
            return cr
    return tr          # single-chunk fallback (larger acc, still correct)


def _pick_m_tile(m):
    tm = min(1024, _round_up(m, SUBLANE))
    return tm, _round_up(m, tm)


# ----------------------------- JAX glue (layout only) ------------------------

def _make_phases(x_nhwc, kh, kw, stride, pad, dtype):
    """Zero-pad + stride-phase rearrange so every tap read in the kernel is a
    plain (unstrided) dynamic slice.  Returns (n, n_phases, hq, wq, c)."""
    n, h, w, c = x_nhwc.shape
    ho = (h + 2 * pad - kh) // stride + 1
    wo = (w + 2 * pad - kw) // stride + 1
    hq = (kh - 1) // stride + ho
    wq = (kw - 1) // stride + wo
    na, nb = min(stride, kh), min(stride, kw)
    hp, wp = h + 2 * pad, w + 2 * pad
    eh = max(0, stride * hq - hp)
    ew = max(0, stride * wq - wp)
    xp = jnp.pad(x_nhwc, ((0, 0), (pad, pad + eh), (pad, pad + ew), (0, 0)))
    phases = jnp.stack(
        [xp[:, a::stride, b::stride, :][:, :hq, :wq, :]
         for a in range(na) for b in range(nb)], axis=1)
    return phases.astype(dtype), (n, ho, wo, hq, wq)


def _prep_conv_params(w_oihw, bias, cin_p, cout_p, dtype):
    cout, cin, kh, kw = w_oihw.shape
    wt = jnp.transpose(w_oihw, (2, 3, 1, 0))                      # (kh, kw, cin, cout)
    wt = jnp.pad(wt, ((0, 0), (0, 0), (0, cin_p - cin), (0, cout_p - cout)))
    wt = wt.reshape(kh * kw, cin_p, cout_p).astype(dtype)
    b = jnp.pad(bias.reshape(-1), (0, cout_p - cout)).reshape(1, cout_p).astype(jnp.float32)
    return wt, b


def _prep_bn_params(gamma, beta, cout_p):
    g = gamma.reshape(1, -1).astype(jnp.float32)
    b = beta.reshape(1, -1).astype(jnp.float32)
    pad = cout_p - g.shape[1]
    return jnp.pad(g, ((0, 0), (0, pad))), jnp.pad(b, ((0, 0), (0, pad)))


# ----------------------------- Pallas wrappers -------------------------------

def conv2d_bn_stats(x_nhwc, w_prepped, bias_prepped, kh, kw, stride, pad,
                    compute_dtype, *, prepadded=False):
    """Fused conv + BN partial stats.  Returns the flat conv output
    (N, Ho*Wo, Cout_p) in compute dtype and per-image f32 sums (N, Cout_p)."""
    cin_p = x_nhwc.shape[-1]
    cout_p = w_prepped.shape[-1]

    if prepadded:
        # stride == 1 and x is already the zero-padded NHWC image; the phase
        # rearrangement is the identity in that case.
        n, hq, wq, _ = x_nhwc.shape
        ho, wo = hq - (kh - 1), wq - (kw - 1)
        phases = x_nhwc.reshape(n, 1, hq, wq, cin_p).astype(compute_dtype)
    else:
        phases, (n, ho, wo, hq, wq) = _make_phases(x_nhwc, kh, kw, stride, pad,
                                                   compute_dtype)
    n_ph = phases.shape[1]
    dh = hq - ho                                     # halo rows per phase

    tr = _pick_row_tile(ho, wo, n_ph, dh, wq, cin_p, cout_p)
    nt = ho // tr
    cr = _pick_chunk_rows(tr, wo)
    rows_t = tr + dh

    if nt == 1:
        tiles = phases.reshape(n, 1, n_ph * rows_t, wq, cin_p)
    else:
        # Duplicate the dh-row halo per row tile so BlockSpec tiles are disjoint
        # and the whole image never has to be VMEM-resident (v7x: 64 MiB/TC).
        tiles = jnp.stack([phases[:, :, t * tr:t * tr + rows_t]
                           for t in range(nt)], axis=1)
        tiles = tiles.reshape(n, nt, n_ph * rows_t, wq, cin_p)

    kernel = functools.partial(
        _conv_bn_stats_kernel, kh=kh, kw=kw, stride=stride, tr=tr, wo=wo,
        cr=cr, rows_t=rows_t, compute_dtype=compute_dtype)

    itemsize = jnp.dtype(compute_dtype).itemsize
    cost = pl.CostEstimate(
        flops=2 * n * ho * wo * kh * kw * cin_p * cout_p,
        transcendentals=0,
        bytes_accessed=int(tiles.size * itemsize
                           + w_prepped.size * itemsize
                           + n * ho * wo * cout_p * itemsize
                           + 2 * n * cout_p * 4))

    y, s1, s2 = pl.pallas_call(
        kernel,
        grid=(n, nt),
        in_specs=[
            pl.BlockSpec((1, 1, n_ph * rows_t, wq, cin_p),
                         lambda i, t: (i, t, 0, 0, 0)),
            pl.BlockSpec((kh * kw, cin_p, cout_p), lambda i, t: (0, 0, 0)),
            pl.BlockSpec((1, cout_p), lambda i, t: (0, 0)),
        ],
        out_specs=[
            pl.BlockSpec((1, tr * wo, cout_p), lambda i, t: (i, t, 0)),
            pl.BlockSpec((1, 1, cout_p), lambda i, t: (i, 0, 0)),
            pl.BlockSpec((1, 1, cout_p), lambda i, t: (i, 0, 0)),
        ],
        out_shape=(
            jax.ShapeDtypeStruct((n, ho * wo, cout_p), compute_dtype),
            jax.ShapeDtypeStruct((n, 1, cout_p), jnp.float32),
            jax.ShapeDtypeStruct((n, 1, cout_p), jnp.float32),
        ),
        cost_estimate=cost,
        compiler_params=pltpu.CompilerParams(
            dimension_semantics=("parallel", "arbitrary"),
            vmem_limit_bytes=VMEM_LIMIT),
    )(tiles, w_prepped, bias_prepped)

    return y, s1.reshape(n, cout_p), s2.reshape(n, cout_p), (n, ho, wo)


def bn_finalize(s1, s2, bias_p, gamma_p, beta_p, count):
    cp = s1.shape[-1]
    return pl.pallas_call(
        functools.partial(_bn_finalize_kernel, count=float(count)),
        out_shape=(jax.ShapeDtypeStruct((1, cp), jnp.float32),
                   jax.ShapeDtypeStruct((1, cp), jnp.float32)),
    )(s1, s2, bias_p, gamma_p, beta_p)


def bn_relu_pad(y_flat, scale, shift, n, ho, wo, pad, out_dtype):
    """bn1 scale/shift + ReLU fused with conv2's zero padding: emits conv2's
    padded NHWC input directly (no separate apply pass, no XLA pad copy)."""
    cp = y_flat.shape[-1]
    hp, wp = ho + 2 * pad, wo + 2 * pad
    # TODO(synk): row-tile this kernel (zero top/bottom rows handled per tile)
    # for very large feature maps instead of one whole padded image per step.
    return pl.pallas_call(
        functools.partial(_bn_relu_pad_kernel, ho=ho, wo=wo, pad=pad),
        grid=(n,),
        in_specs=[
            pl.BlockSpec((1, ho * wo, cp), lambda i: (i, 0, 0)),
            pl.BlockSpec((1, cp), lambda i: (0, 0)),
            pl.BlockSpec((1, cp), lambda i: (0, 0)),
        ],
        out_specs=pl.BlockSpec((1, hp, wp, cp), lambda i: (i, 0, 0, 0)),
        out_shape=jax.ShapeDtypeStruct((n, hp, wp, cp), out_dtype),
        compiler_params=pltpu.CompilerParams(
            dimension_semantics=("parallel",), vmem_limit_bytes=VMEM_LIMIT),
    )(y_flat, scale, shift)


def bn_add_relu(y2_flat, sc2, sh2, short_flat, scs=None, shs=None,
                out_dtype=jnp.float32):
    m, cp = y2_flat.shape
    tm, mp = _pick_m_tile(m)
    if mp != m:
        y2_flat = jnp.pad(y2_flat, ((0, mp - m), (0, 0)))
        short_flat = jnp.pad(short_flat, ((0, mp - m), (0, 0)))
    big = pl.BlockSpec((tm, cp), lambda i: (i, 0))
    small = pl.BlockSpec((1, cp), lambda i: (0, 0))
    if scs is None:
        kernel = _bn_add_id_relu_kernel
        args = (y2_flat, sc2, sh2, short_flat)
        in_specs = [big, small, small, big]
    else:
        kernel = _bn_add_proj_relu_kernel
        args = (y2_flat, sc2, sh2, short_flat, scs, shs)
        in_specs = [big, small, small, big, small, small]
    out = pl.pallas_call(
        kernel,
        grid=(mp // tm,),
        in_specs=in_specs,
        out_specs=pl.BlockSpec((tm, cp), lambda i: (i, 0)),
        out_shape=jax.ShapeDtypeStruct((mp, cp), out_dtype),
        compiler_params=pltpu.CompilerParams(
            dimension_semantics=("parallel",), vmem_limit_bytes=VMEM_LIMIT),
    )(*args)
    return out[:m] if mp != m else out


# ----------------------------- Residual block --------------------------------

@functools.partial(jax.jit, static_argnames=("stride", "compute_dtype"))
def residual_block_forward(x_nchw, params, stride, compute_dtype=jnp.float32):
    """Exact forward of the PyTorch ResidualBlock (train-mode BatchNorm)."""
    n, in_ch, h, w = x_nchw.shape
    out_ch = params["w1"].shape[0]
    has_proj = (stride != 1) or (in_ch != out_ch)
    out_dtype = x_nchw.dtype

    # dtype/lane-aware channel padding: lane-dense contraction dim for realistic
    # channel counts, sublane-pack-aligned for tiny ones (avoids 32x inflation).
    pack = SUBLANE * 4 // jnp.dtype(compute_dtype).itemsize
    cin_p = _round_up(in_ch, LANE) if in_ch > LANE // 2 else _round_up(in_ch, pack)
    cout_p = _round_up(out_ch, LANE)                   # lane-dense output channels

    x = jnp.transpose(x_nchw, (0, 2, 3, 1)).astype(jnp.float32)    # NCHW -> NHWC
    x = jnp.pad(x, ((0, 0), (0, 0), (0, 0), (0, cin_p - in_ch)))

    # conv1 (+stats) -> bn1 (scale, shift)
    w1, b1 = _prep_conv_params(params["w1"], params["b1"], cin_p, cout_p, compute_dtype)
    g1, be1 = _prep_bn_params(params["g1"], params["be1"], cout_p)
    y1, s1a, s1b, (n_, ho, wo) = conv2d_bn_stats(x, w1, b1, 3, 3, stride, 1, compute_dtype)
    m = n_ * ho * wo
    sc1, sh1 = bn_finalize(s1a, s1b, b1, g1, be1, m)

    # bn1-apply + ReLU + conv2 zero-padding fused: a1p is conv2-ready.
    a1p = bn_relu_pad(y1, sc1, sh1, n_, ho, wo, 1, compute_dtype)

    # conv2 (+stats) -> bn2 (scale, shift)
    w2, b2 = _prep_conv_params(params["w2"], params["b2"], cout_p, cout_p, compute_dtype)
    g2, be2 = _prep_bn_params(params["g2"], params["be2"], cout_p)
    y2, s2a, s2b, _ = conv2d_bn_stats(a1p, w2, b2, 3, 3, 1, 1, compute_dtype,
                                      prepadded=True)
    sc2, sh2 = bn_finalize(s2a, s2b, b2, g2, be2, m)

    # shortcut, fused into the final bn2 + add + relu pass
    if has_proj:
        ws, bs = _prep_conv_params(params["ws"], params["bs"], cin_p, cout_p, compute_dtype)
        gs, bes = _prep_bn_params(params["gs"], params["bes"], cout_p)
        ys, ssa, ssb, _ = conv2d_bn_stats(x, ws, bs, 1, 1, stride, 0, compute_dtype)
        scs, shs = bn_finalize(ssa, ssb, bs, gs, bes, m)
        out = bn_add_relu(y2.reshape(m, cout_p), sc2, sh2,
                          ys.reshape(m, cout_p), scs, shs, out_dtype=out_dtype)
    else:
        xid = jnp.pad(x, ((0, 0), (0, 0), (0, 0), (0, cout_p - cin_p)))
        out = bn_add_relu(y2.reshape(m, cout_p), sc2, sh2,
                          xid.reshape(m, cout_p), out_dtype=out_dtype)

    out = out.reshape(n_, ho, wo, cout_p)[..., :out_ch]
    return jnp.transpose(out, (0, 3, 1, 2)).astype(out_dtype)      # back to NCHW


# ----------------------------- Pure-JAX reference ----------------------------

def _ref_bn(y, gamma, beta):
    mu = jnp.mean(y, axis=(0, 2, 3), keepdims=True)
    var = jnp.mean(jnp.square(y - mu), axis=(0, 2, 3), keepdims=True)
    return (y - mu) * lax.rsqrt(var + EPS) * gamma.reshape(1, -1, 1, 1) + beta.reshape(1, -1, 1, 1)


def ref_forward(x, params, stride):
    dn = ("NCHW", "OIHW", "NCHW")
    in_ch, out_ch = x.shape[1], params["w1"].shape[0]
    has_proj = (stride != 1) or (in_ch != out_ch)
    c1 = lax.conv_general_dilated(x, params["w1"], (stride, stride), [(1, 1), (1, 1)],
                                  dimension_numbers=dn) + params["b1"].reshape(1, -1, 1, 1)
    a1 = jnp.maximum(_ref_bn(c1, params["g1"], params["be1"]), 0.0)
    c2 = lax.conv_general_dilated(a1, params["w2"], (1, 1), [(1, 1), (1, 1)],
                                  dimension_numbers=dn) + params["b2"].reshape(1, -1, 1, 1)
    o2 = _ref_bn(c2, params["g2"], params["be2"])
    if has_proj:
        cs = lax.conv_general_dilated(x, params["ws"], (stride, stride), [(0, 0), (0, 0)],
                                      dimension_numbers=dn) + params["bs"].reshape(1, -1, 1, 1)
        short = _ref_bn(cs, params["gs"], params["bes"])
    else:
        short = x
    return jnp.maximum(o2 + short, 0.0)


# --------------------------------- main --------------------------------------

if __name__ == "__main__":
    def make_params(key, in_ch, out_ch):
        ks = jax.random.split(key, 12)

        def nrm(k, shape, scale=0.1):
            return (scale * jax.random.normal(k, shape)).astype(jnp.float32)

        return {
            "w1": nrm(ks[0], (out_ch, in_ch, 3, 3)),
            "b1": nrm(ks[1], (out_ch,)),
            "g1": 1.0 + nrm(ks[2], (out_ch,)),
            "be1": nrm(ks[3], (out_ch,)),
            "w2": nrm(ks[4], (out_ch, out_ch, 3, 3)),
            "b2": nrm(ks[5], (out_ch,)),
            "g2": 1.0 + nrm(ks[6], (out_ch,)),
            "be2": nrm(ks[7], (out_ch,)),
            "ws": nrm(ks[8], (out_ch, in_ch, 1, 1)),
            "bs": nrm(ks[9], (out_ch,)),
            "gs": 1.0 + nrm(ks[10], (out_ch,)),
            "bes": nrm(ks[11], (out_ch,)),
        }

    kp, kx, kp2, kx2 = jax.random.split(jax.random.PRNGKey(0), 4)

    # 1) projection-shortcut config (stride=2, channel change), f32 compute
    in_ch, out_ch, stride = 4, 8, 2
    params = make_params(kp, in_ch, out_ch)
    x = jax.random.normal(kx, (2, in_ch, 16, 16), dtype=jnp.float32)

    out = jax.block_until_ready(residual_block_forward(x, params, stride=stride))
    ref = jax.block_until_ready(ref_forward(x, params, stride))
    np.testing.assert_allclose(np.asarray(out), np.asarray(ref), rtol=2e-4, atol=2e-4)

    # 2) identity-shortcut config (stride=1, in_ch == out_ch), f32 compute
    #    (also exercises the multi-chunk fori_loop accumulation path)
    params_id = make_params(kp2, 8, 8)
    x_id = jax.random.normal(kx2, (2, 8, 16, 16), dtype=jnp.float32)
    out_id = jax.block_until_ready(residual_block_forward(x_id, params_id, stride=1))
    ref_id = jax.block_until_ready(ref_forward(x_id, params_id, 1))
    np.testing.assert_allclose(np.asarray(out_id), np.asarray(ref_id), rtol=2e-4, atol=2e-4)

    # 3) bf16 MXU operands + bf16 intermediates / f32 stats (bandwidth path).
    #    Loose sanity bound: bf16 storage of y1/y2/ys + bf16 operands vs a full
    #    f32 reference; tight checks are done on the f32 paths above.
    out_bf16 = jax.block_until_ready(
        residual_block_forward(x, params, stride=stride, compute_dtype=jnp.bfloat16))
    np.testing.assert_allclose(np.asarray(out_bf16), np.asarray(ref), rtol=1e-1, atol=1e-1)

    print("KERNEL_OK")
</pallas_src>

<mosaic_0001>
module attributes {stable_mosaic.version = 11 : i64} {
  func.func @_bn_finalize_kernel(%arg0: memref<2x128xf32, #tpu.memory_space<vmem>>, %arg1: memref<2x128xf32, #tpu.memory_space<vmem>>, %arg2: memref<1x128xf32, #tpu.memory_space<vmem>>, %arg3: memref<1x128xf32, #tpu.memory_space<vmem>>, %arg4: memref<1x128xf32, #tpu.memory_space<vmem>>, %arg5: memref<1x128xf32, #tpu.memory_space<vmem>>, %arg6: memref<1x128xf32, #tpu.memory_space<vmem>>) attributes {dimension_semantics = [], scalar_prefetch = 0 : i64, scratch_operands = 0 : i64, tpu.core_type = #tpu.core_type<tc>} {
    %c0 = arith.constant 0 : index
    %c0_0 = arith.constant 0 : index
    %0 = vector.load %arg0[%c0, %c0_0] : memref<2x128xf32, #tpu.memory_space<vmem>>, vector<2x128xf32>
    %cst = arith.constant dense<0.000000e+00> : vector<128xf32>
    %1 = vector.multi_reduction <add>, %0, %cst [0] : vector<2x128xf32> to vector<128xf32>
    %2 = vector.shape_cast %1 : vector<128xf32> to vector<1x128xf32>
    %c0_1 = arith.constant 0 : index
    %c0_2 = arith.constant 0 : index
    %3 = vector.load %arg1[%c0_1, %c0_2] : memref<2x128xf32, #tpu.memory_space<vmem>>, vector<2x128xf32>
    %cst_3 = arith.constant dense<0.000000e+00> : vector<128xf32>
    %4 = vector.multi_reduction <add>, %3, %cst_3 [0] : vector<2x128xf32> to vector<128xf32>
    %5 = vector.shape_cast %4 : vector<128xf32> to vector<1x128xf32>
    %cst_4 = arith.constant 7.812500e-03 : f32
    %6 = vector.broadcast %cst_4 : f32 to vector<1x128xf32>
    %7 = arith.mulf %2, %6 : vector<1x128xf32>
    %cst_5 = arith.constant 7.812500e-03 : f32
    %8 = vector.broadcast %cst_5 : f32 to vector<1x128xf32>
    %9 = arith.mulf %5, %8 : vector<1x128xf32>
    %10 = arith.mulf %7, %7 : vector<1x128xf32>
    %11 = arith.subf %9, %10 : vector<1x128xf32>
    %cst_6 = arith.constant 0.000000e+00 : f32
    %12 = vector.broadcast %cst_6 : f32 to vector<1x128xf32>
    %13 = arith.maximumf %11, %12 : vector<1x128xf32>
    %cst_7 = arith.constant 9.99999974E-6 : f32
    %14 = vector.broadcast %cst_7 : f32 to vector<1x128xf32>
    %15 = arith.addf %13, %14 : vector<1x128xf32>
    %16 = math.rsqrt %15 : vector<1x128xf32>
    %c0_8 = arith.constant 0 : index
    %c0_9 = arith.constant 0 : index
    %17 = vector.load %arg3[%c0_8, %c0_9] : memref<1x128xf32, #tpu.memory_space<vmem>>, vector<1x128xf32>
    %18 = arith.mulf %17, %16 : vector<1x128xf32>
    %c0_10 = arith.constant 0 : index
    %c0_11 = arith.constant 0 : index
    %19 = vector.load %arg5[%c0_10, %c0_11] : memref<1x128xf32, #tpu.memory_space<vmem>>, vector<1x128xf32>
    tpu.vector_store %arg5[%c0_10, %c0_11], %18 {strides = array<i32>} : memref<1x128xf32, #tpu.memory_space<vmem>>, vector<1x128xf32>,
    %c0_12 = arith.constant 0 : index
    %c0_13 = arith.constant 0 : index
    %20 = vector.load %arg4[%c0_12, %c0_13] : memref<1x128xf32, #tpu.memory_space<vmem>>, vector<1x128xf32>
    %c0_14 = arith.constant 0 : index
    %c0_15 = arith.constant 0 : index
    %21 = vector.load %arg2[%c0_14, %c0_15] : memref<1x128xf32, #tpu.memory_space<vmem>>, vector<1x128xf32>
    %22 = arith.addf %7, %21 : vector<1x128xf32>
    %23 = arith.mulf %22, %18 : vector<1x128xf32>
    %24 = arith.subf %20, %23 : vector<1x128xf32>
    %c0_16 = arith.constant 0 : index
    %c0_17 = arith.constant 0 : index
    %25 = vector.load %arg6[%c0_16, %c0_17] : memref<1x128xf32, #tpu.memory_space<vmem>>, vector<1x128xf32>
    tpu.vector_store %arg6[%c0_16, %c0_17], %24 {strides = array<i32>} : memref<1x128xf32, #tpu.memory_space<vmem>>, vector<1x128xf32>,
    return
  }
}

module attributes {stable_mosaic.version = 11 : i64} {
  func.func @_conv_bn_stats_kernel(%arg0: i32, %arg1: i32, %arg2: memref<1x1x8x8x8xf32, #tpu.memory_space<vmem>>, %arg3: memref<1x8x128xf32, #tpu.memory_space<vmem>>, %arg4: memref<1x128xf32, #tpu.memory_space<vmem>>, %arg5: memref<1x64x128xf32, #tpu.memory_space<vmem>>, %arg6: memref<1x1x128xf32, #tpu.memory_space<vmem>>, %arg7: memref<1x1x128xf32, #tpu.memory_space<vmem>>) attributes {dimension_semantics = [#tpu.dimension_semantics<parallel>, #tpu.dimension_semantics<arbitrary>], iteration_bounds = array<i64: 2, 1>, scalar_prefetch = 0 : i64, scratch_operands = 0 : i64, tpu.core_type = #tpu.core_type<tc>, window_params = [{transform_indices = @transform_0, window_bounds = array<i64: 1, 1, 8, 8, 8>}, {pipeline_mode = #tpu.pipeline_mode<synchronous>, transform_indices = @transform_1, window_bounds = array<i64: 1, 8, 128>}, {pipeline_mode = #tpu.pipeline_mode<synchronous>, transform_indices = @transform_2, window_bounds = array<i64: 1, 128>}, {transform_indices = @transform_3, window_bounds = array<i64: 1, 64, 128>}, {transform_indices = @transform_4, window_bounds = array<i64: 1, 1, 128>}, {transform_indices = @transform_5, window_bounds = array<i64: 1, 1, 128>}]} {
    %c0 = arith.constant 0 : index
    %c0_0 = arith.constant 0 : index
    %0 = vector.load %arg4[%c0, %c0_0] : memref<1x128xf32, #tpu.memory_space<vmem>>, vector<1x128xf32>
    %c0_i32 = arith.constant 0 : i32
    %1 = arith.cmpi eq, %arg1, %c0_i32 : i32
    %2 = arith.extui %1 : i1 to i32
    %c0_i32_1 = arith.constant 0 : i32
    %3 = arith.cmpi ne, %2, %c0_i32_1 : i32
    scf.if %3 {
      %cst_30 = arith.constant 0.000000e+00 : f32
      %34 = vector.broadcast %cst_30 : f32 to vector<1x1x128xf32>
      %c0_31 = arith.constant 0 : index
      %c0_32 = arith.constant 0 : index
      %c0_33 = arith.constant 0 : index
      %35 = vector.load %arg6[%c0_31, %c0_32, %c0_33] : memref<1x1x128xf32, #tpu.memory_space<vmem>>, vector<1x1x128xf32>
      tpu.vector_store %arg6[%c0_31, %c0_32, %c0_33], %34 {strides = array<i32>} : memref<1x1x128xf32, #tpu.memory_space<vmem>>, vector<1x1x128xf32>,
      %cst_34 = arith.constant 0.000000e+00 : f32
      %36 = vector.broadcast %cst_34 : f32 to vector<1x1x128xf32>
      %c0_35 = arith.constant 0 : index
      %c0_36 = arith.constant 0 : index
      %c0_37 = arith.constant 0 : index
      %37 = vector.load %arg7[%c0_35, %c0_36, %c0_37] : memref<1x1x128xf32, #tpu.memory_space<vmem>>, vector<1x1x128xf32>
      tpu.vector_store %arg7[%c0_35, %c0_36, %c0_37], %36 {strides = array<i32>} : memref<1x1x128xf32, #tpu.memory_space<vmem>>, vector<1x1x128xf32>,
    } else {
    }
    %cst = arith.constant 0.000000e+00 : f32
    %4 = vector.broadcast %cst : f32 to vector<1x128xf32>
    %cst_2 = arith.constant 0.000000e+00 : f32
    %5 = vector.broadcast %cst_2 : f32 to vector<1x128xf32>
    %cst_3 = arith.constant 0.000000e+00 : f32
    %6 = vector.broadcast %cst_3 : f32 to vector<64x128xf32>
    %c0_4 = arith.constant 0 : index
    %c0_5 = arith.constant 0 : index
    %c0_6 = arith.constant 0 : index
    %c0_7 = arith.constant 0 : index
    %c0_8 = arith.constant 0 : index
    %7 = vector.load %arg2[%c0_4, %c0_5, %c0_6, %c0_7, %c0_8] : memref<1x1x8x8x8xf32, #tpu.memory_space<vmem>>, vector<1x1x8x8x8xf32>
    %8 = vector.shape_cast %7 : vector<1x1x8x8x8xf32> to vector<8x8x8xf32>
    %9 = vector.shape_cast %8 : vector<8x8x8xf32> to vector<64x8xf32>
    %c0_9 = arith.constant 0 : index
    %c0_10 = arith.constant 0 : index
    %c0_11 = arith.constant 0 : index
    %10 = vector.load %arg3[%c0_9, %c0_10, %c0_11] : memref<1x8x128xf32, #tpu.memory_space<vmem>>, vector<1x8x128xf32>
    %11 = vector.shape_cast %10 : vector<1x8x128xf32> to vector<8x128xf32>
    %cst_12 = arith.constant dense<0.000000e+00> : vector<64x128xf32>
    %12 = tpu.matmul %9, %11, %cst_12 {dimension_numbers = #tpu.dot_dimension_numbers<[1], [0], [0], [1], [0, 0, 1, 1], [], []>} : vector<64x8xf32>, vector<8x128xf32>, vector<64x128xf32> -> vector<64x128xf32>
    %13 = arith.addf %6, %12 : vector<64x128xf32>
    %14 = vector.broadcast %0 : vector<1x128xf32> to vector<64x128xf32>
    %15 = arith.addf %13, %14 : vector<64x128xf32>
    %c0_13 = arith.constant 0 : index
    %c0_14 = arith.constant 0 : index
    %c0_15 = arith.constant 0 : index
    %16 = vector.load %arg5[%c0_13, %c0_14, %c0_15] : memref<1x64x128xf32, #tpu.memory_space<vmem>>, vector<1x64x128xf32>
    %17 = vector.shape_cast %16 : vector<1x64x128xf32> to vector<64x128xf32>
    %18 = vector.shape_cast %15 : vector<64x128xf32> to vector<1x64x128xf32>
    tpu.vector_store %arg5[%c0_13, %c0_14, %c0_15], %18 {strides = array<i32>} : memref<1x64x128xf32, #tpu.memory_space<vmem>>, vector<1x64x128xf32>,
    %cst_16 = arith.constant dense<0.000000e+00> : vector<128xf32>
    %19 = vector.multi_reduction <add>, %13, %cst_16 [0] : vector<64x128xf32> to vector<128xf32>
    %20 = vector.shape_cast %19 : vector<128xf32> to vector<1x128xf32>
    %21 = arith.addf %4, %20 : vector<1x128xf32>
    %22 = arith.mulf %13, %13 : vector<64x128xf32>
    %cst_17 = arith.constant dense<0.000000e+00> : vector<128xf32>
    %23 = vector.multi_reduction <add>, %22, %cst_17 [0] : vector<64x128xf32> to vector<128xf32>
    %24 = vector.shape_cast %23 : vector<128xf32> to vector<1x128xf32>
    %25 = arith.addf %5, %24 : vector<1x128xf32>
    %c0_18 = arith.constant 0 : index
    %c0_19 = arith.constant 0 : index
    %c0_20 = arith.constant 0 : index
    %26 = vector.load %arg6[%c0_18, %c0_19, %c0_20] : memref<1x1x128xf32, #tpu.memory_space<vmem>>, vector<1x1x128xf32>
    %27 = vector.shape_cast %21 : vector<1x128xf32> to vector<1x1x128xf32>
    %28 = arith.addf %26, %27 : vector<1x1x128xf32>
    %c0_21 = arith.constant 0 : index
    %c0_22 = arith.constant 0 : index
    %c0_23 = arith.constant 0 : index
    %29 = vector.load %arg6[%c0_21, %c0_22, %c0_23] : memref<1x1x128xf32, #tpu.memory_space<vmem>>, vector<1x1x128xf32>
    tpu.vector_store %arg6[%c0_21, %c0_22, %c0_23], %28 {strides = array<i32>} : memref<1x1x128xf32, #tpu.memory_space<vmem>>, vector<1x1x128xf32>,
    %c0_24 = arith.constant 0 : index
    %c0_25 = arith.constant 0 : index
    %c0_26 = arith.constant 0 : index
    %30 = vector.load %arg7[%c0_24, %c0_25, %c0_26] : memref<1x1x128xf32, #tpu.memory_space<vmem>>, vector<1x1x128xf32>
    %31 = vector.shape_cast %25 : vector<1x128xf32> to vector<1x1x128xf32>
    %32 = arith.addf %30, %31 : vector<1x1x128xf32>
    %c0_27 = arith.constant 0 : index
    %c0_28 = arith.constant 0 : index
    %c0_29 = arith.constant 0 : index
    %33 = vector.load %arg7[%c0_27, %c0_28, %c0_29] : memref<1x1x128xf32, #tpu.memory_space<vmem>>, vector<1x1x128xf32>
    tpu.vector_store %arg7[%c0_27, %c0_28, %c0_29], %32 {strides = array<i32>} : memref<1x1x128xf32, #tpu.memory_space<vmem>>, vector<1x1x128xf32>,
    return
  }
  func.func @transform_0(%arg0: i32, %arg1: i32) -> (i32, i32, i32, i32, i32) {
    %c0_i32 = arith.constant 0 : i32
    %c0_i32_0 = arith.constant 0 : i32
    %c0_i32_1 = arith.constant 0 : i32
    %c0_i32_2 = arith.constant 0 : i32
    return %arg0, %arg1, %c0_i32, %c0_i32_0, %c0_i32_1 : i32, i32, i32, i32, i32
  }
  func.func @transform_1(%arg0: i32, %arg1: i32) -> (i32, i32, i32) {
    %c0_i32 = arith.constant 0 : i32
    %c0_i32_0 = arith.constant 0 : i32
    %c0_i32_1 = arith.constant 0 : i32
    %c0_i32_2 = arith.constant 0 : i32
    return %c0_i32, %c0_i32_0, %c0_i32_1 : i32, i32, i32
  }
  func.func @transform_2(%arg0: i32, %arg1: i32) -> (i32, i32) {
    %c0_i32 = arith.constant 0 : i32
    %c0_i32_0 = arith.constant 0 : i32
    %c0_i32_1 = arith.constant 0 : i32
    return %c0_i32, %c0_i32_0 : i32, i32
  }
  func.func @transform_3(%arg0: i32, %arg1: i32) -> (i32, i32, i32) {
    %c0_i32 = arith.constant 0 : i32
    %c0_i32_0 = arith.constant 0 : i32
    return %arg0, %arg1, %c0_i32 : i32, i32, i32
  }
  func.func @transform_4(%arg0: i32, %arg1: i32) -> (i32, i32, i32) {
    %c0_i32 = arith.constant 0 : i32
    %c0_i32_0 = arith.constant 0 : i32
    %c0_i32_1 = arith.constant 0 : i32
    return %arg0, %c0_i32, %c0_i32_0 : i32, i32, i32
  }
  func.func @transform_5(%arg0: i32, %arg1: i32) -> (i32, i32, i32) {
    %c0_i32 = arith.constant 0 : i32
    %c0_i32_0 = arith.constant 0 : i32
    %c0_i32_1 = arith.constant 0 : i32
    return %arg0, %c0_i32, %c0_i32_0 : i32, i32, i32
  }
}

module attributes {stable_mosaic.version = 11 : i64} {
  func.func @_conv_bn_stats_kernel(%arg0: i32, %arg1: i32, %arg2: memref<1x1x36x9x8xf32, #tpu.memory_space<vmem>>, %arg3: memref<9x8x128xf32, #tpu.memory_space<vmem>>, %arg4: memref<1x128xf32, #tpu.memory_space<vmem>>, %arg5: memref<1x64x128xf32, #tpu.memory_space<vmem>>, %arg6: memref<1x1x128xf32, #tpu.memory_space<vmem>>, %arg7: memref<1x1x128xf32, #tpu.memory_space<vmem>>) attributes {dimension_semantics = [#tpu.dimension_semantics<parallel>, #tpu.dimension_semantics<arbitrary>], iteration_bounds = array<i64: 2, 1>, scalar_prefetch = 0 : i64, scratch_operands = 0 : i64, tpu.core_type = #tpu.core_type<tc>, window_params = [{transform_indices = @transform_0, window_bounds = array<i64: 1, 1, 36, 9, 8>}, {pipeline_mode = #tpu.pipeline_mode<synchronous>, transform_indices = @transform_1, window_bounds = array<i64: 9, 8, 128>}, {pipeline_mode = #tpu.pipeline_mode<synchronous>, transform_indices = @transform_2, window_bounds = array<i64: 1, 128>}, {transform_indices = @transform_3, window_bounds = array<i64: 1, 64, 128>}, {transform_indices = @transform_4, window_bounds = array<i64: 1, 1, 128>}, {transform_indices = @transform_5, window_bounds = array<i64: 1, 1, 128>}]} {
    %c0 = arith.constant 0 : index
    %c0_0 = arith.constant 0 : index
    %0 = vector.load %arg4[%c0, %c0_0] : memref<1x128xf32, #tpu.memory_space<vmem>>, vector<1x128xf32>
    %c0_i32 = arith.constant 0 : i32
    %1 = arith.cmpi eq, %arg1, %c0_i32 : i32
    %2 = arith.extui %1 : i1 to i32
    %c0_i32_1 = arith.constant 0 : i32
    %3 = arith.cmpi ne, %2, %c0_i32_1 : i32
    scf.if %3 {
      %cst_90 = arith.constant 0.000000e+00 : f32
      %90 = vector.broadcast %cst_90 : f32 to vector<1x1x128xf32>
      %c0_91 = arith.constant 0 : index
      %c0_92 = arith.constant 0 : index
      %c0_93 = arith.constant 0 : index
      %91 = vector.load %arg6[%c0_91, %c0_92, %c0_93] : memref<1x1x128xf32, #tpu.memory_space<vmem>>, vector<1x1x128xf32>
      tpu.vector_store %arg6[%c0_91, %c0_92, %c0_93], %90 {strides = array<i32>} : memref<1x1x128xf32, #tpu.memory_space<vmem>>, vector<1x1x128xf32>,
      %cst_94 = arith.constant 0.000000e+00 : f32
      %92 = vector.broadcast %cst_94 : f32 to vector<1x1x128xf32>
      %c0_95 = arith.constant 0 : index
      %c0_96 = arith.constant 0 : index
      %c0_97 = arith.constant 0 : index
      %93 = vector.load %arg7[%c0_95, %c0_96, %c0_97] : memref<1x1x128xf32, #tpu.memory_space<vmem>>, vector<1x1x128xf32>
      tpu.vector_store %arg7[%c0_95, %c0_96, %c0_97], %92 {strides = array<i32>} : memref<1x1x128xf32, #tpu.memory_space<vmem>>, vector<1x1x128xf32>,
    } else {
    }
    %cst = arith.constant 0.000000e+00 : f32
    %4 = vector.broadcast %cst : f32 to vector<1x128xf32>
    %cst_2 = arith.constant 0.000000e+00 : f32
    %5 = vector.broadcast %cst_2 : f32 to vector<1x128xf32>
    %cst_3 = arith.constant 0.000000e+00 : f32
    %6 = vector.broadcast %cst_3 : f32 to vector<64x128xf32>
    %c0_4 = arith.constant 0 : index
    %c0_5 = arith.constant 0 : index
    %c0_6 = arith.constant 0 : index
    %c0_7 = arith.constant 0 : index
    %c0_8 = arith.constant 0 : index
    %7 = vector.load %arg2[%c0_4, %c0_5, %c0_6, %c0_7, %c0_8] : memref<1x1x36x9x8xf32, #tpu.memory_space<vmem>>, vector<1x1x8x8x8xf32>
    %8 = vector.shape_cast %7 : vector<1x1x8x8x8xf32> to vector<8x8x8xf32>
    %9 = vector.shape_cast %8 : vector<8x8x8xf32> to vector<64x8xf32>
    %c0_9 = arith.constant 0 : index
    %c0_10 = arith.constant 0 : index
    %c0_11 = arith.constant 0 : index
    %10 = vector.load %arg3[%c0_9, %c0_10, %c0_11] : memref<9x8x128xf32, #tpu.memory_space<vmem>>, vector<1x8x128xf32>
    %11 = vector.shape_cast %10 : vector<1x8x128xf32> to vector<8x128xf32>
    %cst_12 = arith.constant dense<0.000000e+00> : vector<64x128xf32>
    %12 = tpu.matmul %9, %11, %cst_12 {dimension_numbers = #tpu.dot_dimension_numbers<[1], [0], [0], [1], [0, 0, 1, 1], [], []>} : vector<64x8xf32>, vector<8x128xf32>, vector<64x128xf32> -> vector<64x128xf32>
    %13 = arith.addf %6, %12 : vector<64x128xf32>
    %c0_13 = arith.constant 0 : index
    %c0_14 = arith.constant 0 : index
    %c9 = arith.constant 9 : index
    %c0_15 = arith.constant 0 : index
    %c0_16 = arith.constant 0 : index
    %14 = vector.load %arg2[%c0_13, %c0_14, %c9, %c0_15, %c0_16] : memref<1x1x36x9x8xf32, #tpu.memory_space<vmem>>, vector<1x1x8x8x8xf32>
    %15 = vector.shape_cast %14 : vector<1x1x8x8x8xf32> to vector<8x8x8xf32>
    %16 = vector.shape_cast %15 : vector<8x8x8xf32> to vector<64x8xf32>
    %c1 = arith.constant 1 : index
    %c0_17 = arith.constant 0 : index
    %c0_18 = arith.constant 0 : index
    %17 = vector.load %arg3[%c1, %c0_17, %c0_18] : memref<9x8x128xf32, #tpu.memory_space<vmem>>, vector<1x8x128xf32>
    %18 = vector.shape_cast %17 : vector<1x8x128xf32> to vector<8x128xf32>
    %cst_19 = arith.constant dense<0.000000e+00> : vector<64x128xf32>
    %19 = tpu.matmul %16, %18, %cst_19 {dimension_numbers = #tpu.dot_dimension_numbers<[1], [0], [0], [1], [0, 0, 1, 1], [], []>} : vector<64x8xf32>, vector<8x128xf32>, vector<64x128xf32> -> vector<64x128xf32>
    %20 = arith.addf %13, %19 : vector<64x128xf32>
    %c0_20 = arith.constant 0 : index
    %c0_21 = arith.constant 0 : index
    %c0_22 = arith.constant 0 : index
    %c1_23 = arith.constant 1 : index
    %c0_24 = arith.constant 0 : index
    %21 = vector.load %arg2[%c0_20, %c0_21, %c0_22, %c1_23, %c0_24] : memref<1x1x36x9x8xf32, #tpu.memory_space<vmem>>, vector<1x1x8x8x8xf32>
    %22 = vector.shape_cast %21 : vector<1x1x8x8x8xf32> to vector<8x8x8xf32>
    %23 = vector.shape_cast %22 : vector<8x8x8xf32> to vector<64x8xf32>
    %c2 = arith.constant 2 : index
    %c0_25 = arith.constant 0 : index
    %c0_26 = arith.constant 0 : index
    %24 = vector.load %arg3[%c2, %c0_25, %c0_26] : memref<9x8x128xf32, #tpu.memory_space<vmem>>, vector<1x8x128xf32>
    %25 = vector.shape_cast %24 : vector<1x8x128xf32> to vector<8x128xf32>
    %cst_27 = arith.constant dense<0.000000e+00> : vector<64x128xf32>
    %26 = tpu.matmul %23, %25, %cst_27 {dimension_numbers = #tpu.dot_dimension_numbers<[1], [0], [0], [1], [0, 0, 1, 1], [], []>} : vector<64x8xf32>, vector<8x128xf32>, vector<64x128xf32> -> vector<64x128xf32>
    %27 = arith.addf %20, %26 : vector<64x128xf32>
    %c0_28 = arith.constant 0 : index
    %c0_29 = arith.constant 0 : index
    %c18 = arith.constant 18 : index
    %c0_30 = arith.constant 0 : index
    %c0_31 = arith.constant 0 : index
    %28 = vector.load %arg2[%c0_28, %c0_29, %c18, %c0_30, %c0_31] : memref<1x1x36x9x8xf32, #tpu.memory_space<vmem>>, vector<1x1x8x8x8xf32>
    %29 = vector.shape_cast %28 : vector<1x1x8x8x8xf32> to vector<8x8x8xf32>
    %30 = vector.shape_cast %29 : vector<8x8x8xf32> to vector<64x8xf32>
    %c3 = arith.constant 3 : index
    %c0_32 = arith.constant 0 : index
    %c0_33 = arith.constant 0 : index
    %31 = vector.load %arg3[%c3, %c0_32, %c0_33] : memref<9x8x128xf32, #tpu.memory_space<vmem>>, vector<1x8x128xf32>
    %32 = vector.shape_cast %31 : vector<1x8x128xf32> to vector<8x128xf32>
    %cst_34 = arith.constant dense<0.000000e+00> : vector<64x128xf32>
    %33 = tpu.matmul %30, %32, %cst_34 {dimension_numbers = #tpu.dot_dimension_numbers<[1], [0], [0], [1], [0, 0, 1, 1], [], []>} : vector<64x8xf32>, vector<8x128xf32>, vector<64x128xf32> -> vector<64x128xf32>
    %34 = arith.addf %27, %33 : vector<64x128xf32>
    %c0_35 = arith.constant 0 : index
    %c0_36 = arith.constant 0 : index
    %c27 = arith.constant 27 : index
    %c0_37 = arith.constant 0 : index
    %c0_38 = arith.constant 0 : index
    %35 = vector.load %arg2[%c0_35, %c0_36, %c27, %c0_37, %c0_38] : memref<1x1x36x9x8xf32, #tpu.memory_space<vmem>>, vector<1x1x8x8x8xf32>
    %36 = vector.shape_cast %35 : vector<1x1x8x8x8xf32> to vector<8x8x8xf32>
    %37 = vector.shape_cast %36 : vector<8x8x8xf32> to vector<64x8xf32>
    %c4 = arith.constant 4 : index
    %c0_39 = arith.constant 0 : index
    %c0_40 = arith.constant 0 : index
    %38 = vector.load %arg3[%c4, %c0_39, %c0_40] : memref<9x8x128xf32, #tpu.memory_space<vmem>>, vector<1x8x128xf32>
    %39 = vector.shape_cast %38 : vector<1x8x128xf32> to vector<8x128xf32>
    %cst_41 = arith.constant dense<0.000000e+00> : vector<64x128xf32>
    %40 = tpu.matmul %37, %39, %cst_41 {dimension_numbers = #tpu.dot_dimension_numbers<[1], [0], [0], [1], [0, 0, 1, 1], [], []>} : vector<64x8xf32>, vector<8x128xf32>, vector<64x128xf32> -> vector<64x128xf32>
    %41 = arith.addf %34, %40 : vector<64x128xf32>
    %c0_42 = arith.constant 0 : index
    %c0_43 = arith.constant 0 : index
    %c18_44 = arith.constant 18 : index
    %c1_45 = arith.constant 1 : index
    %c0_46 = arith.constant 0 : index
    %42 = vector.load %arg2[%c0_42, %c0_43, %c18_44, %c1_45, %c0_46] : memref<1x1x36x9x8xf32, #tpu.memory_space<vmem>>, vector<1x1x8x8x8xf32>
    %43 = vector.shape_cast %42 : vector<1x1x8x8x8xf32> to vector<8x8x8xf32>
    %44 = vector.shape_cast %43 : vector<8x8x8xf32> to vector<64x8xf32>
    %c5 = arith.constant 5 : index
    %c0_47 = arith.constant 0 : index
    %c0_48 = arith.constant 0 : index
    %45 = vector.load %arg3[%c5, %c0_47, %c0_48] : memref<9x8x128xf32, #tpu.memory_space<vmem>>, vector<1x8x128xf32>
    %46 = vector.shape_cast %45 : vector<1x8x128xf32> to vector<8x128xf32>
    %cst_49 = arith.constant dense<0.000000e+00> : vector<64x128xf32>
    %47 = tpu.matmul %44, %46, %cst_49 {dimension_numbers = #tpu.dot_dimension_numbers<[1], [0], [0], [1], [0, 0, 1, 1], [], []>} : vector<64x8xf32>, vector<8x128xf32>, vector<64x128xf32> -> vector<64x128xf32>
    %48 = arith.addf %41, %47 : vector<64x128xf32>
    %c0_50 = arith.constant 0 : index
    %c0_51 = arith.constant 0 : index
    %c1_52 = arith.constant 1 : index
    %c0_53 = arith.constant 0 : index
    %c0_54 = arith.constant 0 : index
    %49 = vector.load %arg2[%c0_50, %c0_51, %c1_52, %c0_53, %c0_54] : memref<1x1x36x9x8xf32, #tpu.memory_space<vmem>>, vector<1x1x8x8x8xf32>
    %50 = vector.shape_cast %49 : vector<1x1x8x8x8xf32> to vector<8x8x8xf32>
    %51 = vector.shape_cast %50 : vector<8x8x8xf32> to vector<64x8xf32>
    %c6 = arith.constant 6 : index
    %c0_55 = arith.constant 0 : index
    %c0_56 = arith.constant 0 : index
    %52 = vector.load %arg3[%c6, %c0_55, %c0_56] : memref<9x8x128xf32, #tpu.memory_space<vmem>>, vector<1x8x128xf32>
    %53 = vector.shape_cast %52 : vector<1x8x128xf32> to vector<8x128xf32>
    %cst_57 = arith.constant dense<0.000000e+00> : vector<64x128xf32>
    %54 = tpu.matmul %51, %53, %cst_57 {dimension_numbers = #tpu.dot_dimension_numbers<[1], [0], [0], [1], [0, 0, 1, 1], [], []>} : vector<64x8xf32>, vector<8x128xf32>, vector<64x128xf32> -> vector<64x128xf32>
    %55 = arith.addf %48, %54 : vector<64x128xf32>
    %c0_58 = arith.constant 0 : index
    %c0_59 = arith.constant 0 : index
    %c10 = arith.constant 10 : index
    %c0_60 = arith.constant 0 : index
    %c0_61 = arith.constant 0 : index
    %56 = vector.load %arg2[%c0_58, %c0_59, %c10, %c0_60, %c0_61] : memref<1x1x36x9x8xf32, #tpu.memory_space<vmem>>, vector<1x1x8x8x8xf32>
    %57 = vector.shape_cast %56 : vector<1x1x8x8x8xf32> to vector<8x8x8xf32>
    %58 = vector.shape_cast %57 : vector<8x8x8xf32> to vector<64x8xf32>
    %c7 = arith.constant 7 : index
    %c0_62 = arith.constant 0 : index
    %c0_63 = arith.constant 0 : index
    %59 = vector.load %arg3[%c7, %c0_62, %c0_63] : memref<9x8x128xf32, #tpu.memory_space<vmem>>, vector<1x8x128xf32>
    %60 = vector.shape_cast %59 : vector<1x8x128xf32> to vector<8x128xf32>
    %cst_64 = arith.constant dense<0.000000e+00> : vector<64x128xf32>
    %61 = tpu.matmul %58, %60, %cst_64 {dimension_numbers = #tpu.dot_dimension_numbers<[1], [0], [0], [1], [0, 0, 1, 1], [], []>} : vector<64x8xf32>, vector<8x128xf32>, vector<64x128xf32> -> vector<64x128xf32>
    %62 = arith.addf %55, %61 : vector<64x128xf32>
    %c0_65 = arith.constant 0 : index
    %c0_66 = arith.constant 0 : index
    %c1_67 = arith.constant 1 : index
    %c1_68 = arith.constant 1 : index
    %c0_69 = arith.constant 0 : index
    %63 = vector.load %arg2[%c0_65, %c0_66, %c1_67, %c1_68, %c0_69] : memref<1x1x36x9x8xf32, #tpu.memory_space<vmem>>, vector<1x1x8x8x8xf32>
    %64 = vector.shape_cast %63 : vector<1x1x8x8x8xf32> to vector<8x8x8xf32>
    %65 = vector.shape_cast %64 : vector<8x8x8xf32> to vector<64x8xf32>
    %c8 = arith.constant 8 : index
    %c0_70 = arith.constant 0 : index
    %c0_71 = arith.constant 0 : index
    %66 = vector.load %arg3[%c8, %c0_70, %c0_71] : memref<9x8x128xf32, #tpu.memory_space<vmem>>, vector<1x8x128xf32>
    %67 = vector.shape_cast %66 : vector<1x8x128xf32> to vector<8x128xf32>
    %cst_72 = arith.constant dense<0.000000e+00> : vector<64x128xf32>
    %68 = tpu.matmul %65, %67, %cst_72 {dimension_numbers = #tpu.dot_dimension_numbers<[1], [0], [0], [1], [0, 0, 1, 1], [], []>} : vector<64x8xf32>, vector<8x128xf32>, vector<64x128xf32> -> vector<64x128xf32>
    %69 = arith.addf %62, %68 : vector<64x128xf32>
    %70 = vector.broadcast %0 : vector<1x128xf32> to vector<64x128xf32>
    %71 = arith.addf %69, %70 : vector<64x128xf32>
    %c0_73 = arith.constant 0 : index
    %c0_74 = arith.constant 0 : index
    %c0_75 = arith.constant 0 : index
    %72 = vector.load %arg5[%c0_73, %c0_74, %c0_75] : memref<1x64x128xf32, #tpu.memory_space<vmem>>, vector<1x64x128xf32>
    %73 = vector.shape_cast %72 : vector<1x64x128xf32> to vector<64x128xf32>
    %74 = vector.shape_cast %71 : vector<64x128xf32> to vector<1x64x128xf32>
    tpu.vector_store %arg5[%c0_73, %c0_74, %c0_75], %74 {strides = array<i32>} : memref<1x64x128xf32, #tpu.memory_space<vmem>>, vector<1x64x128xf32>,
    %cst_76 = arith.constant dense<0.000000e+00> : vector<128xf32>
    %75 = vector.multi_reduction <add>, %69, %cst_76 [0] : vector<64x128xf32> to vector<128xf32>
    %76 = vector.shape_cast %75 : vector<128xf32> to vector<1x128xf32>
    %77 = arith.addf %4, %76 : vector<1x128xf32>
    %78 = arith.mulf %69, %69 : vector<64x128xf32>
    %cst_77 = arith.constant dense<0.000000e+00> : vector<128xf32>
    %79 = vector.multi_reduction <add>, %78, %cst_77 [0] : vector<64x128xf32> to vector<128xf32>
    %80 = vector.shape_cast %79 : vector<128xf32> to vector<1x128xf32>
    %81 = arith.addf %5, %80 : vector<1x128xf32>
    %c0_78 = arith.constant 0 : index
    %c0_79 = arith.constant 0 : index
    %c0_80 = arith.constant 0 : index
    %82 = vector.load %arg6[%c0_78, %c0_79, %c0_80] : memref<1x1x128xf32, #tpu.memory_space<vmem>>, vector<1x1x128xf32>
    %83 = vector.shape_cast %77 : vector<1x128xf32> to vector<1x1x128xf32>
    %84 = arith.addf %82, %83 : vector<1x1x128xf32>
    %c0_81 = arith.constant 0 : index
    %c0_82 = arith.constant 0 : index
    %c0_83 = arith.constant 0 : index
    %85 = vector.load %arg6[%c0_81, %c0_82, %c0_83] : memref<1x1x128xf32, #tpu.memory_space<vmem>>, vector<1x1x128xf32>
    tpu.vector_store %arg6[%c0_81, %c0_82, %c0_83], %84 {strides = array<i32>} : memref<1x1x128xf32, #tpu.memory_space<vmem>>, vector<1x1x128xf32>,
    %c0_84 = arith.constant 0 : index
    %c0_85 = arith.constant 0 : index
    %c0_86 = arith.constant 0 : index
    %86 = vector.load %arg7[%c0_84, %c0_85, %c0_86] : memref<1x1x128xf32, #tpu.memory_space<vmem>>, vector<1x1x128xf32>
    %87 = vector.shape_cast %81 : vector<1x128xf32> to vector<1x1x128xf32>
    %88 = arith.addf %86, %87 : vector<1x1x128xf32>
    %c0_87 = arith.constant 0 : index
    %c0_88 = arith.constant 0 : index
    %c0_89 = arith.constant 0 : index
    %89 = vector.load %arg7[%c0_87, %c0_88, %c0_89] : memref<1x1x128xf32, #tpu.memory_space<vmem>>, vector<1x1x128xf32>
    tpu.vector_store %arg7[%c0_87, %c0_88, %c0_89], %88 {strides = array<i32>} : memref<1x1x128xf32, #tpu.memory_space<vmem>>, vector<1x1x128xf32>,
    return
  }
  func.func @transform_0(%arg0: i32, %arg1: i32) -> (i32, i32, i32, i32, i32) {
    %c0_i32 = arith.constant 0 : i32
    %c0_i32_0 = arith.constant 0 : i32
    %c0_i32_1 = arith.constant 0 : i32
    %c0_i32_2 = arith.constant 0 : i32
    return %arg0, %arg1, %c0_i32, %c0_i32_0, %c0_i32_1 : i32, i32, i32, i32, i32
  }
  func.func @transform_1(%arg0: i32, %arg1: i32) -> (i32, i32, i32) {
    %c0_i32 = arith.constant 0 : i32
    %c0_i32_0 = arith.constant 0 : i32
    %c0_i32_1 = arith.constant 0 : i32
    %c0_i32_2 = arith.constant 0 : i32
    return %c0_i32, %c0_i32_0, %c0_i32_1 : i32, i32, i32
  }
  func.func @transform_2(%arg0: i32, %arg1: i32) -> (i32, i32) {
    %c0_i32 = arith.constant 0 : i32
    %c0_i32_0 = arith.constant 0 : i32
    %c0_i32_1 = arith.constant 0 : i32
    return %c0_i32, %c0_i32_0 : i32, i32
  }
  func.func @transform_3(%arg0: i32, %arg1: i32) -> (i32, i32, i32) {
    %c0_i32 = arith.constant 0 : i32
    %c0_i32_0 = arith.constant 0 : i32
    return %arg0, %arg1, %c0_i32 : i32, i32, i32
  }
  func.func @transform_4(%arg0: i32, %arg1: i32) -> (i32, i32, i32) {
    %c0_i32 = arith.constant 0 : i32
    %c0_i32_0 = arith.constant 0 : i32
    %c0_i32_1 = arith.constant 0 : i32
    return %arg0, %c0_i32, %c0_i32_0 : i32, i32, i32
  }
  func.func @transform_5(%arg0: i32, %arg1: i32) -> (i32, i32, i32) {
    %c0_i32 = arith.constant 0 : i32
    %c0_i32_0 = arith.constant 0 : i32
    %c0_i32_1 = arith.constant 0 : i32
    return %arg0, %c0_i32, %c0_i32_0 : i32, i32, i32
  }
}

module attributes {stable_mosaic.version = 11 : i64} {
  func.func @_bn_relu_pad_kernel(%arg0: i32, %arg1: memref<1x64x128xf32, #tpu.memory_space<vmem>>, %arg2: memref<1x128xf32, #tpu.memory_space<vmem>>, %arg3: memref<1x128xf32, #tpu.memory_space<vmem>>, %arg4: memref<1x10x10x128xf32, #tpu.memory_space<vmem>>) attributes {dimension_semantics = [#tpu.dimension_semantics<parallel>], iteration_bounds = array<i64: 2>, scalar_prefetch = 0 : i64, scratch_operands = 0 : i64, tpu.core_type = #tpu.core_type<tc>, window_params = [{transform_indices = @transform_0, window_bounds = array<i64: 1, 64, 128>}, {pipeline_mode = #tpu.pipeline_mode<synchronous>, transform_indices = @transform_1, window_bounds = array<i64: 1, 128>}, {pipeline_mode = #tpu.pipeline_mode<synchronous>, transform_indices = @transform_2, window_bounds = array<i64: 1, 128>}, {transform_indices = @transform_3, window_bounds = array<i64: 1, 10, 10, 128>}]} {
    %cst = arith.constant 0.000000e+00 : f32
    %0 = vector.broadcast %cst : f32 to vector<1x10x10x128xf32>
    %c0 = arith.constant 0 : index
    %c0_0 = arith.constant 0 : index
    %c0_1 = arith.constant 0 : index
    %c0_2 = arith.constant 0 : index
    %1 = vector.load %arg4[%c0, %c0_0, %c0_1, %c0_2] : memref<1x10x10x128xf32, #tpu.memory_space<vmem>>, vector<1x10x10x128xf32>
    tpu.vector_store %arg4[%c0, %c0_0, %c0_1, %c0_2], %0 {strides = array<i32>} : memref<1x10x10x128xf32, #tpu.memory_space<vmem>>, vector<1x10x10x128xf32>,
    %c0_3 = arith.constant 0 : index
    %c0_4 = arith.constant 0 : index
    %c0_5 = arith.constant 0 : index
    %2 = vector.load %arg1[%c0_3, %c0_4, %c0_5] : memref<1x64x128xf32, #tpu.memory_space<vmem>>, vector<1x64x128xf32>
    %3 = vector.shape_cast %2 : vector<1x64x128xf32> to vector<64x128xf32>
    %4 = vector.shape_cast %3 : vector<64x128xf32> to vector<8x8x128xf32>
    %c0_6 = arith.constant 0 : index
    %c0_7 = arith.constant 0 : index
    %5 = vector.load %arg2[%c0_6, %c0_7] : memref<1x128xf32, #tpu.memory_space<vmem>>, vector<1x128xf32>
    %6 = vector.shape_cast %5 : vector<1x128xf32> to vector<1x1x128xf32>
    %7 = vector.broadcast %6 : vector<1x1x128xf32> to vector<8x8x128xf32>
    %8 = arith.mulf %4, %7 : vector<8x8x128xf32>
    %c0_8 = arith.constant 0 : index
    %c0_9 = arith.constant 0 : index
    %9 = vector.load %arg3[%c0_8, %c0_9] : memref<1x128xf32, #tpu.memory_space<vmem>>, vector<1x128xf32>
    %10 = vector.shape_cast %9 : vector<1x128xf32> to vector<1x1x128xf32>
    %11 = vector.broadcast %10 : vector<1x1x128xf32> to vector<8x8x128xf32>
    %12 = arith.addf %8, %11 : vector<8x8x128xf32>
    %cst_10 = arith.constant 0.000000e+00 : f32
    %13 = vector.broadcast %cst_10 : f32 to vector<8x8x128xf32>
    %14 = arith.maximumf %12, %13 : vector<8x8x128xf32>
    %c0_11 = arith.constant 0 : index
    %c1 = arith.constant 1 : index
    %c1_12 = arith.constant 1 : index
    %c0_13 = arith.constant 0 : index
    %15 = vector.load %arg4[%c0_11, %c1, %c1_12, %c0_13] : memref<1x10x10x128xf32, #tpu.memory_space<vmem>>, vector<1x8x8x128xf32>
    %16 = vector.shape_cast %15 : vector<1x8x8x128xf32> to vector<8x8x128xf32>
    %17 = vector.shape_cast %14 : vector<8x8x128xf32> to vector<1x8x8x128xf32>
    tpu.vector_store %arg4[%c0_11, %c1, %c1_12, %c0_13], %17 {strides = array<i32>} : memref<1x10x10x128xf32, #tpu.memory_space<vmem>>, vector<1x8x8x128xf32>,
    return
  }
  func.func @transform_0(%arg0: i32) -> (i32, i32, i32) {
    %c0_i32 = arith.constant 0 : i32
    %c0_i32_0 = arith.constant 0 : i32
    %c0_i32_1 = arith.constant 0 : i32
    return %arg0, %c0_i32, %c0_i32_0 : i32, i32, i32
  }
  func.func @transform_1(%arg0: i32) -> (i32, i32) {
    %c0_i32 = arith.constant 0 : i32
    %c0_i32_0 = arith.constant 0 : i32
    %c0_i32_1 = arith.constant 0 : i32
    return %c0_i32, %c0_i32_0 : i32, i32
  }
  func.func @transform_2(%arg0: i32) -> (i32, i32) {
    %c0_i32 = arith.constant 0 : i32
    %c0_i32_0 = arith.constant 0 : i32
    %c0_i32_1 = arith.constant 0 : i32
    return %c0_i32, %c0_i32_0 : i32, i32
  }
  func.func @transform_3(%arg0: i32) -> (i32, i32, i32, i32) {
    %c0_i32 = arith.constant 0 : i32
    %c0_i32_0 = arith.constant 0 : i32
    %c0_i32_1 = arith.constant 0 : i32
    %c0_i32_2 = arith.constant 0 : i32
    return %arg0, %c0_i32, %c0_i32_0, %c0_i32_1 : i32, i32, i32, i32
  }
}

module attributes {stable_mosaic.version = 11 : i64} {
  func.func @_bn_add_proj_relu_kernel(%arg0: i32, %arg1: memref<128x128xf32, #tpu.memory_space<vmem>>, %arg2: memref<1x128xf32, #tpu.memory_space<vmem>>, %arg3: memref<1x128xf32, #tpu.memory_space<vmem>>, %arg4: memref<128x128xf32, #tpu.memory_space<vmem>>, %arg5: memref<1x128xf32, #tpu.memory_space<vmem>>, %arg6: memref<1x128xf32, #tpu.memory_space<vmem>>, %arg7: memref<128x128xf32, #tpu.memory_space<vmem>>) attributes {dimension_semantics = [#tpu.dimension_semantics<parallel>], iteration_bounds = array<i64: 1>, scalar_prefetch = 0 : i64, scratch_operands = 0 : i64, tpu.core_type = #tpu.core_type<tc>, window_params = [{transform_indices = @transform_0, window_bounds = array<i64: 128, 128>}, {pipeline_mode = #tpu.pipeline_mode<synchronous>, transform_indices = @transform_1, window_bounds = array<i64: 1, 128>}, {pipeline_mode = #tpu.pipeline_mode<synchronous>, transform_indices = @transform_2, window_bounds = array<i64: 1, 128>}, {transform_indices = @transform_3, window_bounds = array<i64: 128, 128>}, {pipeline_mode = #tpu.pipeline_mode<synchronous>, transform_indices = @transform_4, window_bounds = array<i64: 1, 128>}, {pipeline_mode = #tpu.pipeline_mode<synchronous>, transform_indices = @transform_5, window_bounds = array<i64: 1, 128>}, {transform_indices = @transform_6, window_bounds = array<i64: 128, 128>}]} {
    %c0 = arith.constant 0 : index
    %c0_0 = arith.constant 0 : index
    %0 = vector.load %arg1[%c0, %c0_0] : memref<128x128xf32, #tpu.memory_space<vmem>>, vector<128x128xf32>
    %c0_1 = arith.constant 0 : index
    %c0_2 = arith.constant 0 : index
    %1 = vector.load %arg2[%c0_1, %c0_2] : memref<1x128xf32, #tpu.memory_space<vmem>>, vector<1x128xf32>
    %2 = vector.broadcast %1 : vector<1x128xf32> to vector<128x128xf32>
    %3 = arith.mulf %0, %2 : vector<128x128xf32>
    %c0_3 = arith.constant 0 : index
    %c0_4 = arith.constant 0 : index
    %4 = vector.load %arg3[%c0_3, %c0_4] : memref<1x128xf32, #tpu.memory_space<vmem>>, vector<1x128xf32>
    %5 = vector.broadcast %4 : vector<1x128xf32> to vector<128x128xf32>
    %6 = arith.addf %3, %5 : vector<128x128xf32>
    %c0_5 = arith.constant 0 : index
    %c0_6 = arith.constant 0 : index
    %7 = vector.load %arg4[%c0_5, %c0_6] : memref<128x128xf32, #tpu.memory_space<vmem>>, vector<128x128xf32>
    %c0_7 = arith.constant 0 : index
    %c0_8 = arith.constant 0 : index
    %8 = vector.load %arg5[%c0_7, %c0_8] : memref<1x128xf32, #tpu.memory_space<vmem>>, vector<1x128xf32>
    %9 = vector.broadcast %8 : vector<1x128xf32> to vector<128x128xf32>
    %10 = arith.mulf %7, %9 : vector<128x128xf32>
    %c0_9 = arith.constant 0 : index
    %c0_10 = arith.constant 0 : index
    %11 = vector.load %arg6[%c0_9, %c0_10] : memref<1x128xf32, #tpu.memory_space<vmem>>, vector<1x128xf32>
    %12 = vector.broadcast %11 : vector<1x128xf32> to vector<128x128xf32>
    %13 = arith.addf %10, %12 : vector<128x128xf32>
    %14 = arith.addf %6, %13 : vector<128x128xf32>
    %cst = arith.constant 0.000000e+00 : f32
    %15 = vector.broadcast %cst : f32 to vector<128x128xf32>
    %16 = arith.maximumf %14, %15 : vector<128x128xf32>
    %c0_11 = arith.constant 0 : index
    %c0_12 = arith.constant 0 : index
    %17 = vector.load %arg7[%c0_11, %c0_12] : memref<128x128xf32, #tpu.memory_space<vmem>>, vector<128x128xf32>
    tpu.vector_store %arg7[%c0_11, %c0_12], %16 {strides = array<i32>} : memref<128x128xf32, #tpu.memory_space<vmem>>, vector<128x128xf32>,
    return
  }
  func.func @transform_0(%arg0: i32) -> (i32, i32) {
    %c0_i32 = arith.constant 0 : i32
    %c0_i32_0 = arith.constant 0 : i32
    return %arg0, %c0_i32 : i32, i32
  }
  func.func @transform_1(%arg0: i32) -> (i32, i32) {
    %c0_i32 = arith.constant 0 : i32
    %c0_i32_0 = arith.constant 0 : i32
    %c0_i32_1 = arith.constant 0 : i32
    return %c0_i32, %c0_i32_0 : i32, i32
  }
  func.func @transform_2(%arg0: i32) -> (i32, i32) {
    %c0_i32 = arith.constant 0 : i32
    %c0_i32_0 = arith.constant 0 : i32
    %c0_i32_1 = arith.constant 0 : i32
    return %c0_i32, %c0_i32_0 : i32, i32
  }
  func.func @transform_3(%arg0: i32) -> (i32, i32) {
    %c0_i32 = arith.constant 0 : i32
    %c0_i32_0 = arith.constant 0 : i32
    return %arg0, %c0_i32 : i32, i32
  }
  func.func @transform_4(%arg0: i32) -> (i32, i32) {
    %c0_i32 = arith.constant 0 : i32
    %c0_i32_0 = arith.constant 0 : i32
    %c0_i32_1 = arith.constant 0 : i32
    return %c0_i32, %c0_i32_0 : i32, i32
  }
  func.func @transform_5(%arg0: i32) -> (i32, i32) {
    %c0_i32 = arith.constant 0 : i32
    %c0_i32_0 = arith.constant 0 : i32
    %c0_i32_1 = arith.constant 0 : i32
    return %c0_i32, %c0_i32_0 : i32, i32
  }
  func.func @transform_6(%arg0: i32) -> (i32, i32) {
    %c0_i32 = arith.constant 0 : i32
    %c0_i32_0 = arith.constant 0 : i32
    return %arg0, %c0_i32 : i32, i32
  }
}

module attributes {stable_mosaic.version = 11 : i64} {
  func.func @_conv_bn_stats_kernel(%arg0: i32, %arg1: i32, %arg2: memref<1x1x10x10x128xf32, #tpu.memory_space<vmem>>, %arg3: memref<9x128x128xf32, #tpu.memory_space<vmem>>, %arg4: memref<1x128xf32, #tpu.memory_space<vmem>>, %arg5: memref<1x64x128xf32, #tpu.memory_space<vmem>>, %arg6: memref<1x1x128xf32, #tpu.memory_space<vmem>>, %arg7: memref<1x1x128xf32, #tpu.memory_space<vmem>>) attributes {dimension_semantics = [#tpu.dimension_semantics<parallel>, #tpu.dimension_semantics<arbitrary>], iteration_bounds = array<i64: 2, 1>, scalar_prefetch = 0 : i64, scratch_operands = 0 : i64, tpu.core_type = #tpu.core_type<tc>, window_params = [{transform_indices = @transform_0, window_bounds = array<i64: 1, 1, 10, 10, 128>}, {pipeline_mode = #tpu.pipeline_mode<synchronous>, transform_indices = @transform_1, window_bounds = array<i64: 9, 128, 128>}, {pipeline_mode = #tpu.pipeline_mode<synchronous>, transform_indices = @transform_2, window_bounds = array<i64: 1, 128>}, {transform_indices = @transform_3, window_bounds = array<i64: 1, 64, 128>}, {transform_indices = @transform_4, window_bounds = array<i64: 1, 1, 128>}, {transform_indices = @transform_5, window_bounds = array<i64: 1, 1, 128>}]} {
    %c0 = arith.constant 0 : index
    %c0_0 = arith.constant 0 : index
    %0 = vector.load %arg4[%c0, %c0_0] : memref<1x128xf32, #tpu.memory_space<vmem>>, vector<1x128xf32>
    %c0_i32 = arith.constant 0 : i32
    %1 = arith.cmpi eq, %arg1, %c0_i32 : i32
    %2 = arith.extui %1 : i1 to i32
    %c0_i32_1 = arith.constant 0 : i32
    %3 = arith.cmpi ne, %2, %c0_i32_1 : i32
    scf.if %3 {
      %cst_94 = arith.constant 0.000000e+00 : f32
      %90 = vector.broadcast %cst_94 : f32 to vector<1x1x128xf32>
      %c0_95 = arith.constant 0 : index
      %c0_96 = arith.constant 0 : index
      %c0_97 = arith.constant 0 : index
      %91 = vector.load %arg6[%c0_95, %c0_96, %c0_97] : memref<1x1x128xf32, #tpu.memory_space<vmem>>, vector<1x1x128xf32>
      tpu.vector_store %arg6[%c0_95, %c0_96, %c0_97], %90 {strides = array<i32>} : memref<1x1x128xf32, #tpu.memory_space<vmem>>, vector<1x1x128xf32>,
      %cst_98 = arith.constant 0.000000e+00 : f32
      %92 = vector.broadcast %cst_98 : f32 to vector<1x1x128xf32>
      %c0_99 = arith.constant 0 : index
      %c0_100 = arith.constant 0 : index
      %c0_101 = arith.constant 0 : index
      %93 = vector.load %arg7[%c0_99, %c0_100, %c0_101] : memref<1x1x128xf32, #tpu.memory_space<vmem>>, vector<1x1x128xf32>
      tpu.vector_store %arg7[%c0_99, %c0_100, %c0_101], %92 {strides = array<i32>} : memref<1x1x128xf32, #tpu.memory_space<vmem>>, vector<1x1x128xf32>,
    } else {
    }
    %cst = arith.constant 0.000000e+00 : f32
    %4 = vector.broadcast %cst : f32 to vector<1x128xf32>
    %cst_2 = arith.constant 0.000000e+00 : f32
    %5 = vector.broadcast %cst_2 : f32 to vector<1x128xf32>
    %cst_3 = arith.constant 0.000000e+00 : f32
    %6 = vector.broadcast %cst_3 : f32 to vector<64x128xf32>
    %c0_4 = arith.constant 0 : index
    %c0_5 = arith.constant 0 : index
    %c0_6 = arith.constant 0 : index
    %c0_7 = arith.constant 0 : index
    %c0_8 = arith.constant 0 : index
    %7 = vector.load %arg2[%c0_4, %c0_5, %c0_6, %c0_7, %c0_8] : memref<1x1x10x10x128xf32, #tpu.memory_space<vmem>>, vector<1x1x8x8x128xf32>
    %8 = vector.shape_cast %7 : vector<1x1x8x8x128xf32> to vector<8x8x128xf32>
    %9 = vector.shape_cast %8 : vector<8x8x128xf32> to vector<64x128xf32>
    %c0_9 = arith.constant 0 : index
    %c0_10 = arith.constant 0 : index
    %c0_11 = arith.constant 0 : index
    %10 = vector.load %arg3[%c0_9, %c0_10, %c0_11] : memref<9x128x128xf32, #tpu.memory_space<vmem>>, vector<1x128x128xf32>
    %11 = vector.shape_cast %10 : vector<1x128x128xf32> to vector<128x128xf32>
    %cst_12 = arith.constant dense<0.000000e+00> : vector<64x128xf32>
    %12 = tpu.matmul %9, %11, %cst_12 {dimension_numbers = #tpu.dot_dimension_numbers<[1], [0], [0], [1], [0, 0, 1, 1], [], []>} : vector<64x128xf32>, vector<128x128xf32>, vector<64x128xf32> -> vector<64x128xf32>
    %13 = arith.addf %6, %12 : vector<64x128xf32>
    %c0_13 = arith.constant 0 : index
    %c0_14 = arith.constant 0 : index
    %c0_15 = arith.constant 0 : index
    %c1 = arith.constant 1 : index
    %c0_16 = arith.constant 0 : index
    %14 = vector.load %arg2[%c0_13, %c0_14, %c0_15, %c1, %c0_16] : memref<1x1x10x10x128xf32, #tpu.memory_space<vmem>>, vector<1x1x8x8x128xf32>
    %15 = vector.shape_cast %14 : vector<1x1x8x8x128xf32> to vector<8x8x128xf32>
    %16 = vector.shape_cast %15 : vector<8x8x128xf32> to vector<64x128xf32>
    %c1_17 = arith.constant 1 : index
    %c0_18 = arith.constant 0 : index
    %c0_19 = arith.constant 0 : index
    %17 = vector.load %arg3[%c1_17, %c0_18, %c0_19] : memref<9x128x128xf32, #tpu.memory_space<vmem>>, vector<1x128x128xf32>
    %18 = vector.shape_cast %17 : vector<1x128x128xf32> to vector<128x128xf32>
    %cst_20 = arith.constant dense<0.000000e+00> : vector<64x128xf32>
    %19 = tpu.matmul %16, %18, %cst_20 {dimension_numbers = #tpu.dot_dimension_numbers<[1], [0], [0], [1], [0, 0, 1, 1], [], []>} : vector<64x128xf32>, vector<128x128xf32>, vector<64x128xf32> -> vector<64x128xf32>
    %20 = arith.addf %13, %19 : vector<64x128xf32>
    %c0_21 = arith.constant 0 : index
    %c0_22 = arith.constant 0 : index
    %c0_23 = arith.constant 0 : index
    %c2 = arith.constant 2 : index
    %c0_24 = arith.constant 0 : index
    %21 = vector.load %arg2[%c0_21, %c0_22, %c0_23, %c2, %c0_24] : memref<1x1x10x10x128xf32, #tpu.memory_space<vmem>>, vector<1x1x8x8x128xf32>
    %22 = vector.shape_cast %21 : vector<1x1x8x8x128xf32> to vector<8x8x128xf32>
    %23 = vector.shape_cast %22 : vector<8x8x128xf32> to vector<64x128xf32>
    %c2_25 = arith.constant 2 : index
    %c0_26 = arith.constant 0 : index
    %c0_27 = arith.constant 0 : index
    %24 = vector.load %arg3[%c2_25, %c0_26, %c0_27] : memref<9x128x128xf32, #tpu.memory_space<vmem>>, vector<1x128x128xf32>
    %25 = vector.shape_cast %24 : vector<1x128x128xf32> to vector<128x128xf32>
    %cst_28 = arith.constant dense<0.000000e+00> : vector<64x128xf32>
    %26 = tpu.matmul %23, %25, %cst_28 {dimension_numbers = #tpu.dot_dimension_numbers<[1], [0], [0], [1], [0, 0, 1, 1], [], []>} : vector<64x128xf32>, vector<128x128xf32>, vector<64x128xf32> -> vector<64x128xf32>
    %27 = arith.addf %20, %26 : vector<64x128xf32>
    %c0_29 = arith.constant 0 : index
    %c0_30 = arith.constant 0 : index
    %c1_31 = arith.constant 1 : index
    %c0_32 = arith.constant 0 : index
    %c0_33 = arith.constant 0 : index
    %28 = vector.load %arg2[%c0_29, %c0_30, %c1_31, %c0_32, %c0_33] : memref<1x1x10x10x128xf32, #tpu.memory_space<vmem>>, vector<1x1x8x8x128xf32>
    %29 = vector.shape_cast %28 : vector<1x1x8x8x128xf32> to vector<8x8x128xf32>
    %30 = vector.shape_cast %29 : vector<8x8x128xf32> to vector<64x128xf32>
    %c3 = arith.constant 3 : index
    %c0_34 = arith.constant 0 : index
    %c0_35 = arith.constant 0 : index
    %31 = vector.load %arg3[%c3, %c0_34, %c0_35] : memref<9x128x128xf32, #tpu.memory_space<vmem>>, vector<1x128x128xf32>
    %32 = vector.shape_cast %31 : vector<1x128x128xf32> to vector<128x128xf32>
    %cst_36 = arith.constant dense<0.000000e+00> : vector<64x128xf32>
    %33 = tpu.matmul %30, %32, %cst_36 {dimension_numbers = #tpu.dot_dimension_numbers<[1], [0], [0], [1], [0, 0, 1, 1], [], []>} : vector<64x128xf32>, vector<128x128xf32>, vector<64x128xf32> -> vector<64x128xf32>
    %34 = arith.addf %27, %33 : vector<64x128xf32>
    %c0_37 = arith.constant 0 : index
    %c0_38 = arith.constant 0 : index
    %c1_39 = arith.constant 1 : index
    %c1_40 = arith.constant 1 : index
    %c0_41 = arith.constant 0 : index
    %35 = vector.load %arg2[%c0_37, %c0_38, %c1_39, %c1_40, %c0_41] : memref<1x1x10x10x128xf32, #tpu.memory_space<vmem>>, vector<1x1x8x8x128xf32>
    %36 = vector.shape_cast %35 : vector<1x1x8x8x128xf32> to vector<8x8x128xf32>
    %37 = vector.shape_cast %36 : vector<8x8x128xf32> to vector<64x128xf32>
    %c4 = arith.constant 4 : index
    %c0_42 = arith.constant 0 : index
    %c0_43 = arith.constant 0 : index
    %38 = vector.load %arg3[%c4, %c0_42, %c0_43] : memref<9x128x128xf32, #tpu.memory_space<vmem>>, vector<1x128x128xf32>
    %39 = vector.shape_cast %38 : vector<1x128x128xf32> to vector<128x128xf32>
    %cst_44 = arith.constant dense<0.000000e+00> : vector<64x128xf32>
    %40 = tpu.matmul %37, %39, %cst_44 {dimension_numbers = #tpu.dot_dimension_numbers<[1], [0], [0], [1], [0, 0, 1, 1], [], []>} : vector<64x128xf32>, vector<128x128xf32>, vector<64x128xf32> -> vector<64x128xf32>
    %41 = arith.addf %34, %40 : vector<64x128xf32>
    %c0_45 = arith.constant 0 : index
    %c0_46 = arith.constant 0 : index
    %c1_47 = arith.constant 1 : index
    %c2_48 = arith.constant 2 : index
    %c0_49 = arith.constant 0 : index
    %42 = vector.load %arg2[%c0_45, %c0_46, %c1_47, %c2_48, %c0_49] : memref<1x1x10x10x128xf32, #tpu.memory_space<vmem>>, vector<1x1x8x8x128xf32>
    %43 = vector.shape_cast %42 : vector<1x1x8x8x128xf32> to vector<8x8x128xf32>
    %44 = vector.shape_cast %43 : vector<8x8x128xf32> to vector<64x128xf32>
    %c5 = arith.constant 5 : index
    %c0_50 = arith.constant 0 : index
    %c0_51 = arith.constant 0 : index
    %45 = vector.load %arg3[%c5, %c0_50, %c0_51] : memref<9x128x128xf32, #tpu.memory_space<vmem>>, vector<1x128x128xf32>
    %46 = vector.shape_cast %45 : vector<1x128x128xf32> to vector<128x128xf32>
    %cst_52 = arith.constant dense<0.000000e+00> : vector<64x128xf32>
    %47 = tpu.matmul %44, %46, %cst_52 {dimension_numbers = #tpu.dot_dimension_numbers<[1], [0], [0], [1], [0, 0, 1, 1], [], []>} : vector<64x128xf32>, vector<128x128xf32>, vector<64x128xf32> -> vector<64x128xf32>
    %48 = arith.addf %41, %47 : vector<64x128xf32>
    %c0_53 = arith.constant 0 : index
    %c0_54 = arith.constant 0 : index
    %c2_55 = arith.constant 2 : index
    %c0_56 = arith.constant 0 : index
    %c0_57 = arith.constant 0 : index
    %49 = vector.load %arg2[%c0_53, %c0_54, %c2_55, %c0_56, %c0_57] : memref<1x1x10x10x128xf32, #tpu.memory_space<vmem>>, vector<1x1x8x8x128xf32>
    %50 = vector.shape_cast %49 : vector<1x1x8x8x128xf32> to vector<8x8x128xf32>
    %51 = vector.shape_cast %50 : vector<8x8x128xf32> to vector<64x128xf32>
    %c6 = arith.constant 6 : index
    %c0_58 = arith.constant 0 : index
    %c0_59 = arith.constant 0 : index
    %52 = vector.load %arg3[%c6, %c0_58, %c0_59] : memref<9x128x128xf32, #tpu.memory_space<vmem>>, vector<1x128x128xf32>
    %53 = vector.shape_cast %52 : vector<1x128x128xf32> to vector<128x128xf32>
    %cst_60 = arith.constant dense<0.000000e+00> : vector<64x128xf32>
    %54 = tpu.matmul %51, %53, %cst_60 {dimension_numbers = #tpu.dot_dimension_numbers<[1], [0], [0], [1], [0, 0, 1, 1], [], []>} : vector<64x128xf32>, vector<128x128xf32>, vector<64x128xf32> -> vector<64x128xf32>
    %55 = arith.addf %48, %54 : vector<64x128xf32>
    %c0_61 = arith.constant 0 : index
    %c0_62 = arith.constant 0 : index
    %c2_63 = arith.constant 2 : index
    %c1_64 = arith.constant 1 : index
    %c0_65 = arith.constant 0 : index
    %56 = vector.load %arg2[%c0_61, %c0_62, %c2_63, %c1_64, %c0_65] : memref<1x1x10x10x128xf32, #tpu.memory_space<vmem>>, vector<1x1x8x8x128xf32>
    %57 = vector.shape_cast %56 : vector<1x1x8x8x128xf32> to vector<8x8x128xf32>
    %58 = vector.shape_cast %57 : vector<8x8x128xf32> to vector<64x128xf32>
    %c7 = arith.constant 7 : index
    %c0_66 = arith.constant 0 : index
    %c0_67 = arith.constant 0 : index
    %59 = vector.load %arg3[%c7, %c0_66, %c0_67] : memref<9x128x128xf32, #tpu.memory_space<vmem>>, vector<1x128x128xf32>
    %60 = vector.shape_cast %59 : vector<1x128x128xf32> to vector<128x128xf32>
    %cst_68 = arith.constant dense<0.000000e+00> : vector<64x128xf32>
    %61 = tpu.matmul %58, %60, %cst_68 {dimension_numbers = #tpu.dot_dimension_numbers<[1], [0], [0], [1], [0, 0, 1, 1], [], []>} : vector<64x128xf32>, vector<128x128xf32>, vector<64x128xf32> -> vector<64x128xf32>
    %62 = arith.addf %55, %61 : vector<64x128xf32>
    %c0_69 = arith.constant 0 : index
    %c0_70 = arith.constant 0 : index
    %c2_71 = arith.constant 2 : index
    %c2_72 = arith.constant 2 : index
    %c0_73 = arith.constant 0 : index
    %63 = vector.load %arg2[%c0_69, %c0_70, %c2_71, %c2_72, %c0_73] : memref<1x1x10x10x128xf32, #tpu.memory_space<vmem>>, vector<1x1x8x8x128xf32>
    %64 = vector.shape_cast %63 : vector<1x1x8x8x128xf32> to vector<8x8x128xf32>
    %65 = vector.shape_cast %64 : vector<8x8x128xf32> to vector<64x128xf32>
    %c8 = arith.constant 8 : index
    %c0_74 = arith.constant 0 : index
    %c0_75 = arith.constant 0 : index
    %66 = vector.load %arg3[%c8, %c0_74, %c0_75] : memref<9x128x128xf32, #tpu.memory_space<vmem>>, vector<1x128x128xf32>
    %67 = vector.shape_cast %66 : vector<1x128x128xf32> to vector<128x128xf32>
    %cst_76 = arith.constant dense<0.000000e+00> : vector<64x128xf32>
    %68 = tpu.matmul %65, %67, %cst_76 {dimension_numbers = #tpu.dot_dimension_numbers<[1], [0], [0], [1], [0, 0, 1, 1], [], []>} : vector<64x128xf32>, vector<128x128xf32>, vector<64x128xf32> -> vector<64x128xf32>
    %69 = arith.addf %62, %68 : vector<64x128xf32>
    %70 = vector.broadcast %0 : vector<1x128xf32> to vector<64x128xf32>
    %71 = arith.addf %69, %70 : vector<64x128xf32>
    %c0_77 = arith.constant 0 : index
    %c0_78 = arith.constant 0 : index
    %c0_79 = arith.constant 0 : index
    %72 = vector.load %arg5[%c0_77, %c0_78, %c0_79] : memref<1x64x128xf32, #tpu.memory_space<vmem>>, vector<1x64x128xf32>
    %73 = vector.shape_cast %72 : vector<1x64x128xf32> to vector<64x128xf32>
    %74 = vector.shape_cast %71 : vector<64x128xf32> to vector<1x64x128xf32>
    tpu.vector_store %arg5[%c0_77, %c0_78, %c0_79], %74 {strides = array<i32>} : memref<1x64x128xf32, #tpu.memory_space<vmem>>, vector<1x64x128xf32>,
    %cst_80 = arith.constant dense<0.000000e+00> : vector<128xf32>
    %75 = vector.multi_reduction <add>, %69, %cst_80 [0] : vector<64x128xf32> to vector<128xf32>
    %76 = vector.shape_cast %75 : vector<128xf32> to vector<1x128xf32>
    %77 = arith.addf %4, %76 : vector<1x128xf32>
    %78 = arith.mulf %69, %69 : vector<64x128xf32>
    %cst_81 = arith.constant dense<0.000000e+00> : vector<128xf32>
    %79 = vector.multi_reduction <add>, %78, %cst_81 [0] : vector<64x128xf32> to vector<128xf32>
    %80 = vector.shape_cast %79 : vector<128xf32> to vector<1x128xf32>
    %81 = arith.addf %5, %80 : vector<1x128xf32>
    %c0_82 = arith.constant 0 : index
    %c0_83 = arith.constant 0 : index
    %c0_84 = arith.constant 0 : index
    %82 = vector.load %arg6[%c0_82, %c0_83, %c0_84] : memref<1x1x128xf32, #tpu.memory_space<vmem>>, vector<1x1x128xf32>
    %83 = vector.shape_cast %77 : vector<1x128xf32> to vector<1x1x128xf32>
    %84 = arith.addf %82, %83 : vector<1x1x128xf32>
    %c0_85 = arith.constant 0 : index
    %c0_86 = arith.constant 0 : index
    %c0_87 = arith.constant 0 : index
    %85 = vector.load %arg6[%c0_85, %c0_86, %c0_87] : memref<1x1x128xf32, #tpu.memory_space<vmem>>, vector<1x1x128xf32>
    tpu.vector_store %arg6[%c0_85, %c0_86, %c0_87], %84 {strides = array<i32>} : memref<1x1x128xf32, #tpu.memory_space<vmem>>, vector<1x1x128xf32>,
    %c0_88 = arith.constant 0 : index
    %c0_89 = arith.constant 0 : index
    %c0_90 = arith.constant 0 : index
    %86 = vector.load %arg7[%c0_88, %c0_89, %c0_90] : memref<1x1x128xf32, #tpu.memory_space<vmem>>, vector<1x1x128xf32>
    %87 = vector.shape_cast %81 : vector<1x128xf32> to vector<1x1x128xf32>
    %88 = arith.addf %86, %87 : vector<1x1x128xf32>
    %c0_91 = arith.constant 0 : index
    %c0_92 = arith.constant 0 : index
    %c0_93 = arith.constant 0 : index
    %89 = vector.load %arg7[%c0_91, %c0_92, %c0_93] : memref<1x1x128xf32, #tpu.memory_space<vmem>>, vector<1x1x128xf32>
    tpu.vector_store %arg7[%c0_91, %c0_92, %c0_93], %88 {strides = array<i32>} : memref<1x1x128xf32, #tpu.memory_space<vmem>>, vector<1x1x128xf32>,
    return
  }
  func.func @transform_0(%arg0: i32, %arg1: i32) -> (i32, i32, i32, i32, i32) {
    %c0_i32 = arith.constant 0 : i32
    %c0_i32_0 = arith.constant 0 : i32
    %c0_i32_1 = arith.constant 0 : i32
    %c0_i32_2 = arith.constant 0 : i32
    return %arg0, %arg1, %c0_i32, %c0_i32_0, %c0_i32_1 : i32, i32, i32, i32, i32
  }
  func.func @transform_1(%arg0: i32, %arg1: i32) -> (i32, i32, i32) {
    %c0_i32 = arith.constant 0 : i32
    %c0_i32_0 = arith.constant 0 : i32
    %c0_i32_1 = arith.constant 0 : i32
    %c0_i32_2 = arith.constant 0 : i32
    return %c0_i32, %c0_i32_0, %c0_i32_1 : i32, i32, i32
  }
  func.func @transform_2(%arg0: i32, %arg1: i32) -> (i32, i32) {
    %c0_i32 = arith.constant 0 : i32
    %c0_i32_0 = arith.constant 0 : i32
    %c0_i32_1 = arith.constant 0 : i32
    return %c0_i32, %c0_i32_0 : i32, i32
  }
  func.func @transform_3(%arg0: i32, %arg1: i32) -> (i32, i32, i32) {
    %c0_i32 = arith.constant 0 : i32
    %c0_i32_0 = arith.constant 0 : i32
    return %arg0, %arg1, %c0_i32 : i32, i32, i32
  }
  func.func @transform_4(%arg0: i32, %arg1: i32) -> (i32, i32, i32) {
    %c0_i32 = arith.constant 0 : i32
    %c0_i32_0 = arith.constant 0 : i32
    %c0_i32_1 = arith.constant 0 : i32
    return %arg0, %c0_i32, %c0_i32_0 : i32, i32, i32
  }
  func.func @transform_5(%arg0: i32, %arg1: i32) -> (i32, i32, i32) {
    %c0_i32 = arith.constant 0 : i32
    %c0_i32_0 = arith.constant 0 : i32
    %c0_i32_1 = arith.constant 0 : i32
    return %arg0, %c0_i32, %c0_i32_0 : i32, i32, i32
  }
}

</mosaic_0001>

<bundles_post_ra>
// kernel: residual_block_forward.14
= control target key start
LH: loop header
LB: loop body
LE: loop exit
PB: predicated region body
PF: predicated region fallthrough
CT: control target
= control target key end

     0   :  { %12 = vsyncpa [#allocation3], 0  ;;  %vm25_vm0 = vcmask 1041408   ;;  %s213_s0 = inlined_call_operand.vmem [shape: f32[2,128], index: 0, kind: input, shape index: {}]   ;;  %s214_s1 = inlined_call_operand.vmem [shape: f32[2,128], index: 1, kind: input, shape index: {}]   ;;  %s215_s2 = inlined_call_operand.vmem [shape: f32[1,128], index: 2, kind: input, shape index: {}]   ;;  %s216_s3 = inlined_call_operand.vmem [shape: f32[1,128], index: 3, kind: input, shape index: {}]   ;;  %s217_s4 = inlined_call_operand.vmem [shape: f32[1,128], index: 4, kind: input, shape index: {}]   ;;  %s218_s5 = inlined_call_operand.hbm [shape: f32[1,128], index: 5, kind: output, shape index: {0}]   ;;  %s219_s6 = inlined_call_operand.hbm [shape: f32[1,128], index: 6, kind: output, shape index: {1}]  }
   0x1   :  { %v24_v0 = vld [vmem:[%s213_s0] sm:$0x3] }
   0x2   :  { %v33_v1 = vld [vmem:[%s214_s1] sm:$0x3]  ;;  %v26_v2 = vsel %vm25_vm0, %v24_v0, 0.0 }
   0x3   :  { %v34_v3 = vsel %vm25_vm0, %v33_v1, 0.0  ;;  %v27_v4 = vrot.slane %v26_v2, 4 }
   0x4   :  { %v35_v5 = vrot.slane %v34_v3, 4 }
   0x5   :  { %13 = vsyncpa [#allocation5], 0  ;;  %v28_v6 = vadd.f32 %v27_v4, %v26_v2  ;;  %v52_v22 = vld [vmem:[%s215_s2] sm:$0x1]  ;;  %s137_s27 = smov [#allocation2]   ;;  %s138_s7 = smov [#allocation4]  }
   0x6   :  { %v36_v7 = vadd.f32 %v35_v5, %v34_v3  ;;  %v48_v23 = vld [vmem:[%s216_s3] sm:$0x1]  ;;  %s63_s28 = sshll.u32 %s137_s27, 4  ;;  %s73_s8 = sshll.u32 %s138_s7, 4  ;;  %s64_s28 = int_to_ptr.vmem [resolvable:$true] %s63_s28  ;;  %s74_s8 = int_to_ptr.vmem [resolvable:$true] %s73_s8 }
   0x7   :  { %v29_v8 = vrot.slane %v28_v6, 2  ;;  %v51_v27 = vld [vmem:[%s217_s4] sm:$0x1]  ;;  %s89_s9 = scalar_lea.vmem %s64_s28, 16  ;;  %s93_s2 = scalar_lea.vmem %s64_s28, 32 }
   0x8   :  { %v37_v9 = vrot.slane %v36_v7, 2  ;;  %p90_p0 = scmp.ne.s32.totalorder %s64_s28, %s89_s9  ;;  %p94_p1 = scmp.lt.s32.totalorder %s64_s28, %s64_s28 }
   0x9   :  { %v30_v10 = vadd.f32 %v29_v8, %v28_v6  ;;  %p95_p2 = scmp.lt.s32.totalorder %s93_s2, %s89_s9 }
   0xa   :  { %v38_v11 = vadd.f32 %v37_v9, %v36_v7 }
   0xb   :  { %v31_v12 = vrot.slane %v30_v10, 1  ;;  %p96_p3 = por %p95_p2, %p94_p1 }
   0xc   :  { %v39_v13 = vrot.slane %v38_v11, 1 }
   0xd   :  { %v32_v14 = vadd.f32 %v31_v12, %v30_v10  ;;  %p97_p4 = pnand %p96_p3, %p90_p0 }
   0xe   :  { %v40_v15 = vadd.f32 %v39_v13, %v38_v11 }
   0xf   :  { %v41_v16 = vmul.f32 0.0078125, %v32_v14 }
  0x10   :  { %v42_v17 = vmul.f32 0.0078125, %v40_v15 }
  0x11   :  { %v43_v18 = vmul.f32 %v41_v16, %v41_v16  ;;  %v53_v24 = vadd.f32 %v52_v22, %v41_v16 }
  0x13   :  { %v44_v19 = vsub.f32 %v42_v17, %v43_v18 }
  0x15   :  { %v45_v20 = vmax.f32 %v44_v19, 0.0 }
  0x17   :  { %v46_v21 = vadd.f32 1e-05, %v45_v20 }
  0x19   :  { %87 = vrsqrt.f32 %v46_v21 }
  0x23   :  { %v88_v25 = vpop.eup %87 }
  0x24   :  { %v49_v26 = vmul.f32 %v88_v25, %v48_v23 }
  0x26   :  { %50 = vst [vmem:[#allocation2] sm:$0x1] %v49_v26  ;;  %v54_v28 = vmul.f32 %v53_v24, %v49_v26 }
  0x27   :  { %100 = shalt.err (!%p97_p4)
}
  0x28   :  { %s101_s11 = scalar_lea.hbm %s218_s5, 16 }
  0x29   :  { %p102_p5 = scmp.ne.s32.totalorder %s218_s5, %s101_s11  ;;  %p105_p6 = scmp.lt.u32.totalorder %s101_s11, %s218_s5 }
  0x2b   :  { %p107_p7 = pnand %p105_p6, %p102_p5 }
  0x2d   :  { %110 = shalt.err (!%p107_p7)
}
  0x2e   :  { %66 = dma.vmem_to_hbm [thread:$0]  %s64_s28, 16, %s218_s5, [#allocation3]   ;;  %v55_v29 = vsub.f32 %v51_v27, %v54_v28 }
  0x2f   :  { %s111_s17 = scalar_lea.vmem %s74_s8, 16  ;;  %s115_s18 = scalar_lea.vmem %s74_s8, 32 }
  0x30   :  { %56 = vst [vmem:[#allocation4] sm:$0x1] %v55_v29  ;;  %p112_p8 = scmp.ne.s32.totalorder %s74_s8, %s111_s17  ;;  %p116_p9 = scmp.lt.s32.totalorder %s74_s8, %s74_s8 }
  0x31   :  { %p117_p10 = scmp.lt.s32.totalorder %s115_s18, %s111_s17 }
  0x33   :  { %p118_p11 = por %p117_p10, %p116_p9 }
  0x35   :  { %p119_p12 = pnand %p118_p11, %p112_p8 }
  0x37   :  { %122 = shalt.err (!%p119_p12)
}
  0x38   :  { %s123_s21 = scalar_lea.hbm %s219_s6, 16 }
  0x39   :  { %p124_p13 = scmp.ne.s32.totalorder %s219_s6, %s123_s21  ;;  %p127_p0 = scmp.lt.u32.totalorder %s123_s21, %s219_s6 }
  0x3b   :  { %p129_p1 = pnand %p127_p0, %p124_p13 }
  0x3d   :  { %132 = shalt.err (!%p129_p1)
}
  0x3e   :  { %76 = dma.vmem_to_hbm [thread:$0]  %s74_s8, 16, %s219_s6, [#allocation5]  }
  0x3f   :  { %133 = dma.done.wait [#allocation3], 16  }
  0x40   :  { %134 = vsyncadd [#allocation3], 4294967280 }
  0x41   :  { %135 = dma.done.wait [#allocation5], 16  }
  0x42   :  { %136 = vsyncadd [#allocation5], 4294967280 }
  0x43   :  { %83 = vsyncpa [#allocation3], 1 }
  0x44   :  { %84 = vsyncpa [#allocation5], 1 }

// kernel: residual_block_forward.13
= control target key start
LH: loop header
LB: loop body
LE: loop exit
PB: predicated region body
PF: predicated region fallthrough
CT: control target
= control target key end

     0   :  { %s1510_s0 = inlined_call_operand.hbm [shape: f32[2,1,8,8,8], index: 0, kind: input, shape index: {}]   ;;  %s1511_s1 = inlined_call_operand.hbm [shape: f32[1,8,128], index: 1, kind: input, shape index: {}]   ;;  %s1512_s2 = inlined_call_operand.hbm [shape: f32[1,128], index: 2, kind: input, shape index: {}]   ;;  %s1513_s3 = inlined_call_operand.hbm [shape: f32[2,64,128], index: 3, kind: output, shape index: {0}]   ;;  %s1514_s4 = inlined_call_operand.hbm [shape: f32[2,1,128], index: 4, kind: output, shape index: {1}]   ;;  %s1515_s5 = inlined_call_operand.hbm [shape: f32[2,1,128], index: 5, kind: output, shape index: {2}]  }
   0x1   :  { %1522 = sst [smem:[#allocation16_spill]] %s1511_s1 }
   0x2   :  { %11 = vsyncpa [#allocation3], 0 }
   0x3   :  { %13 = vsyncpa [#allocation3 + $0x1], 0 }
   0x4   :  { %14 = vsyncpa [#allocation6], 0 }
   0x5   :  { %15 = vsyncpa [#allocation4], 0 }
   0x6   :  { %17 = vsyncpa [#allocation4 + $0x1], 0 }
   0x7   :  { %18 = vsyncpa [#allocation10], 0 }
   0x8   :  { %20 = vsyncpa [#allocation10 + $0x1], 0  ;;  %s1152_s18 = smov 0   ;;  %s1154_s19 = smov 0  }
   0x9   :  { %s1156_s20 = smov 0   ;;  %s1158_s21 = smov 0  }
   0xa   :  { %s1160_s22 = smov 0   ;;  %s1162_s23 = smov 0  }
   0xb LB: > { %s1183_s24 = sadd.s32 4294967295, %s1109_s23   ;;  %s1521_s25 = sadd.s32 4294967294, %s1109_s23   ;;  %s1109_s23 = sphi %s1162_s23, %s26_s23   ;;  %s1105_s22 = sphi %s1160_s22, %s1544_s22   ;;  %s1101_s21 = sphi %s1158_s21, %s1543_s21   ;;  %s1097_s20 = sphi %s1156_s20, %s1542_s20   ;;  %s1093_s19 = sphi %s1154_s19, %s1541_s19   ;;  %s1089_s18 = sphi %s1152_s18, %s1540_s18  }
   0xc   : > { %s47_s26 = sadd.s32 1, %s1097_s20  ;;  %p54_p0 = scmp.ne.s32.totalorder %s1097_s20, %s1093_s19 }
   0xd   : > { %p55_p1 = scmp.eq.s32.totalorder %s1109_s23, 0  ;;  %p60_p2 = scmp.ne.s32.totalorder %s1093_s19, %s1089_s18 }
   0xe   : > { %p1516_p3 = scmp.eq.s32.totalorder %s1183_s24, 0  ;;  %p128_p4 = scmp.eq.s32.totalorder %s1183_s24, 1 }
   0xf   : > { %p1194_p5 = por %p55_p1, %p54_p0  ;;  %p134_p6 = scmp.eq.s32.totalorder %s1521_s25, 1 }
  0x10   : > { %p1202_p7 = por %p1516_p3, %p60_p2  ;;  %p1206_p8 = por %p128_p4, %p54_p0 }
  0x11   : > { %p1210_p9 = por %p134_p6, %p60_p2  ;;  %p724_p10 = scmp.ge.s32.totalorder %s1109_s23, 1 }
  0x12   : > { %s1524_s28 = scalar_select %p1202_p7, 1, 0 }
  0x13   : > { %s1525_s29 = scalar_select %p1206_p8, 1, 0 }
  0x14   : > { %s1526_s30 = scalar_select %p1210_p9, 1, 0 }
  0x15   : > { %p193_p11 = scmp.lt.s32.totalorder %s1109_s23, 3  ;;  %s1111_s7 = smov [#allocation5]  }
  0x16   : > { %s206_s8 = sshll.u32 %s1111_s7, 4  ;;  %p818_p1 = scmp.lt.s32.totalorder %s1109_s23, 2  ;;  %s207_s8 = int_to_ptr.vmem [resolvable:$true] %s206_s8 }
  0x17   : > { %p1217_p13 = pnand %p724_p10, %p193_p11  ;;  %s1112_s10 = smov [#allocation7]  }
  0x18   : > { %p1226_p4 = pnand %p818_p1, %p1194_p5  ;;  %s217_s11 = sshll.u32 %s1112_s10, 4  ;;  %s1236_s11 = int_to_ptr.vmem [resolvable:$true] %s217_s11 }
  0x19   : > { %s1527_s6 = scalar_select %p1217_p13, 1, 0 }
  0x1a   : > { %p795_p0 = pneg %p1217_p13  ;;  %s1530_s1 = sld [smem:[#allocation16_spill]] }
  0x1b   : > { %s1528_s9 = scalar_select %p1226_p4, 1, 0 }
  0x1c   : > { %p1232_p2 = pnand %p795_p0, %p1516_p3 }
  0x1e   : > { %p879_p6 = pneg %p1232_p2 }
  0x20   : > { %s877_s15 = scalar_lea.hbm %s1530_s1, 128 }
  0x21   : > { %p878_p5 = scmp.ne.s32.totalorder %s1530_s1, %s877_s15  ;;  %p884_p1 = scmp.lt.u32.totalorder %s877_s15, %s1530_s1 }
  0x23   : > { %p880_p10 = pnand %p879_p6, %p878_p5 }
  0x25   : > { %p881_p11 = pneg %p880_p10 }
  0x27   : > { %p886_p0 = pnand %p884_p1, %p881_p11 }
  0x29   : > { %889 = shalt.err (!%p886_p0)
}
  0x2a   : > { %s890_s10 = scalar_lea.vmem %s207_s8, 128  ;;  %p898_p8 = scmp.lt.s32.totalorder %s207_s8, %s207_s8 }
  0x2b   : > { %p891_p12 = scmp.ne.s32.totalorder %s207_s8, %s890_s10  ;;  %p899_p7 = scmp.lt.s32.totalorder %s890_s10, %s890_s10 }
  0x2d   : > { %p893_p3 = pnand %p891_p12, %p879_p6  ;;  %p900_p13 = por %p899_p7, %p898_p8 }
  0x2f   : > { %p894_p9 = pneg %p893_p3 }
  0x31   : > { %p901_p4 = pnand %p900_p13, %p894_p9 }
  0x33   : > { %904 = shalt.err (!%p901_p4)
}
  0x34   : > { %798 = dma.hbm_to_vmem [thread:$0]  (!%p1232_p2), %s1530_s1, 128, %s207_s8, [#allocation6]  }
  0x35   : > { %s905_s17 = scalar_lea.hbm %s1512_s2, 16 }
  0x36   : > { %p906_p3 = scmp.ne.s32.totalorder %s1512_s2, %s905_s17  ;;  %p912_p9 = scmp.lt.u32.totalorder %s905_s17, %s1512_s2 }
  0x38   : > { %p908_p7 = pnand %p906_p3, %p879_p6 }
  0x3a   : > { %p909_p8 = pneg %p908_p7 }
  0x3c   : > { %p914_p12 = pnand %p912_p9, %p909_p8 }
  0x3e   : > { %917 = shalt.err (!%p914_p12)
}
  0x3f   : > { %s918_s8 = scalar_lea.vmem %s1236_s11, 16  ;;  %s925_s13 = scalar_lea.vmem %s1236_s11, 32 }
  0x40   : > { %p919_p13 = scmp.ne.s32.totalorder %s1236_s11, %s918_s8  ;;  %p926_p10 = scmp.lt.s32.totalorder %s1236_s11, %s1236_s11 }
  0x41   : > { %p927_p11 = scmp.lt.s32.totalorder %s925_s13, %s918_s8 }
  0x42   : > { %p921_p4 = pnand %p919_p13, %p879_p6 }
  0x43   : > { %p928_p1 = por %p927_p11, %p926_p10 }
  0x44   : > { %p922_p5 = pneg %p921_p4 }
  0x46   : > { %p929_p0 = pnand %p928_p1, %p922_p5 }
  0x48   : > { %932 = shalt.err (!%p929_p0)
}
  0x49   : > { %801 = dma.hbm_to_vmem [thread:$0]  (!%p1232_p2), %s1512_s2, 16, %s1236_s11, [#allocation6]  }
  0x4a   : > { %s38_s15 = sadd.s32 1, %s1105_s22  ;;  %s228_s16 = sand.u32 1, %s1097_s20  }
  0x4b   : > { %p40_p6 = scmp.ge.s32.totalorder %s38_s15, 2  ;;  %s728_s17 = sshll.u32 %s228_s16, 6 }
  0x4c   : > { %s752_s27 = sshll.u32 %s1105_s22, 10  ;;  %s232_s11 = scalar_lea.vmem [#allocation2], %s728_s17 }
  0x4d   : > { %s1546_s15 = smov (%p40_p6, %s38_s15), 0  ;;  %s1294_s10 = scalar_lea.hbm %s1510_s0, %s752_s27 }
  0x4e   : > { %s42_s8 = ssub.s32 %s1105_s22, %s1546_s15  ;;  %s241_s13 = sshll.u32 %s232_s11, 4  ;;  %s1298_s13 = int_to_ptr.vmem [resolvable:$true] %s241_s13 }
  0x4f   : > { %p45_p2 = scmp.eq.s32.totalorder %s42_s8, 0  ;;  %s1305_s14 = scalar_lea.sflag [#allocation3], %s228_s16 }
  0x50   : > { %s933_s1 = scalar_lea.hbm %s1294_s10, 1024  ;;  %p1531_p7 = scmp.ne.s32.totalorder %s1528_s9, 0 }
  0x51   : > { %s1303_s25 = scalar_select %p45_p2, %s1097_s20, %s47_s26  }
  0x52   : > { %p934_p3 = scmp.ne.s32.totalorder %s1294_s10, %s933_s1  ;;  %p935_p8 = pneg %p1531_p7 }
  0x53   : > { %s938_s17 = scalar_lea.hbm %s1510_s0, 2048  ;;  %p939_p13 = scmp.lt.u32.totalorder %s1294_s10, %s1510_s0 }
  0x54   : > { %p936_p9 = pnand %p935_p8, %p934_p3  ;;  %p940_p4 = scmp.lt.u32.totalorder %s938_s17, %s933_s1 }
  0x55   : > { %p942_p10 = scmp.lt.u32.totalorder %s933_s1, %s1294_s10 }
  0x56   : > { %p937_p12 = pneg %p936_p9  ;;  %p941_p5 = por %p940_p4, %p939_p13 }
  0x58   : > { %p943_p11 = por %p942_p10, %p941_p5 }
  0x5a   : > { %p944_p1 = pnand %p943_p11, %p937_p12 }
  0x5c   : > { %947 = shalt.err (!%p944_p1)
}
  0x5d   : > { %s948_s26 = scalar_lea.vmem %s1298_s13, 1024  ;;  %s1113_s16 = smov [#allocation2]  }
  0x5e   : > { %p949_p0 = scmp.ne.s32.totalorder %s1298_s13, %s948_s26  ;;  %s953_s11 = sshll.u32 %s1113_s16, 4  ;;  %s954_s11 = int_to_ptr.vmem [resolvable:$false] %s953_s11 }
  0x5f   : > { %s955_s27 = scalar_lea.vmem %s954_s11, 2048  ;;  %p956_p3 = scmp.lt.s32.totalorder %s1298_s13, %s954_s11 }
  0x60   : > { %p951_p6 = pnand %p949_p0, %p935_p8  ;;  %p957_p9 = scmp.lt.s32.totalorder %s955_s27, %s948_s26 }
  0x62   : > { %p952_p2 = pneg %p951_p6  ;;  %p958_p13 = por %p957_p9, %p956_p3 }
  0x64   : > { %p959_p4 = pnand %p958_p13, %p952_p2 }
  0x66   : > { %962 = shalt.err (!%p959_p4)
}
  0x67   : > { %s1114_s1 = smov 128   ;;  %s1115_s12 = smov 8  }
  0x68   : > { %805 = dma.hbm_to_vmem [thread:$0]  (!%p1531_p7), %s1294_s10, 1024, %s1298_s13, %s1305_s14, %s1114_s1, %s1114_s1, %s1115_s12  }
  0x69   : > { %p1532_p8 = scmp.ne.s32.totalorder %s1527_s6, 0 }
  0x6a   : > { %s1336_s17 = sand.u32 (!%p1532_p8), 1, %s1093_s19   ;;  %p1533_p12 = scmp.ne.s32.totalorder (!%p1532_p8), %s1524_s28, 0 }
  0x6b   : > { %253 = sbr.rel (%p1532_p8) target bundleno = 411 (0x19b), region = 32  ;;  %s732_s7 = sshll.u32 (!%p1532_p8), %s1336_s17, 6 }
  0x6c   : > { %s256_s8 = scalar_lea.sflag (!%p1532_p8), [#allocation3], %s1336_s17  ;;  %s259_s26 = scalar_lea.vmem (!%p1532_p8), [#allocation2], %s732_s7 }
  0x72   : > { %1072 = dma.done.wait (%p1533_p12), %s256_s8, 1024  }
  0x73   : > { %1074 = vsyncadd (%p1533_p12), %s256_s8, 4294966272  ;;  %p1534_p7 = scmp.eq.s32.totalorder %s1183_s24, 0 }
  0x75   : > { %1076 = dma.done.wait (%p1534_p7), [#allocation6], 144   ;;  %p1535_p5 = pmov %p1534_p7 }
  0x76   : > { %vm319_vm0 = vcmask 64512   ;;  %v318_v0 = vld [vmem:[#allocation5] sm:$0xff]  ;;  %v311_v2 = vld [vmem:[%s259_s26 + $0x8] sm:$0xff]  ;;  %v312_v3 = vld [vmem:[%s259_s26 + $0x10] sm:$0xff]  ;;  %s1359_s28 = scalar_lea.vmem [#allocation9], %s1336_s17  ;;  %v1116_v9 = vmov 0.0  }
  0x77   : > { %1078 = vsyncadd (%p1535_p5), [#allocation6], 4294967152  ;;  %v310_v1 = vld [vmem:[%s259_s26] sm:$0xff]  ;;  %763 = vmatprep.subr.mxu0 %v318_v0  ;;  %777 = vmatprep.subr.mxu1 %v318_v0  ;;  %v315_v5 = vld [vmem:[%s259_s26 + $0x28] sm:$0xff]  ;;  %308 = vst [vmem:[%s1359_s28] sm:$0x1] %v1116_v9  ;;  %s1363_s6 = scalar_lea.vmem [#allocation11], %s1336_s17 }
  0x78   : > { %765 = vmatprep.mubr.msk.f32.mxu0 %vm319_vm0, %v310_v1  ;;  %v314_v4 = vld [vmem:[%s259_s26 + $0x20] sm:$0xff]  ;;  %764 = vmatpush3.msra.mxu0 %v318_v0  ;;  %v316_v6 = vld [vmem:[%s259_s26 + $0x30] sm:$0xff]  ;;  %v313_v7 = vld [vmem:[%s259_s26 + $0x18] sm:$0xff]  ;;  %309 = vst [vmem:[%s1363_s6] sm:$0x1] %v1116_v9  ;;  %s1370_s9 = scalar_lea.vmem [#allocation8], %s732_s7  ;;  %s753_s13 = sshll.u32 %s1101_s21, 10 }
  0x79   : > { %766 = vmatmul.mubr.msk.f32.vlgmr.msra.gmra.mrb[0].mxu0 %vm319_vm0, %v311_v2  ;;  %778 = vmatpush3.msra.mxu1 %v318_v0  ;;  %v317_v8 = vld [vmem:[%s259_s26 + $0x38] sm:$0xff]  ;;  %v744_v10 = vld [vmem:[#allocation7] ss:$0 sm:$0xff]  ;;  %s537_s10 = sshll.u32 %s1370_s9, 4  ;;  %s1383_s11 = scalar_lea.hbm %s1513_s3, %s753_s13  ;;  %s1385_s10 = int_to_ptr.vmem [resolvable:$true] %s537_s10 }
  0x7a   : > { %768 = vmatprep.mubr.msk.f32.mxu0 %vm319_vm0, %v312_v3  ;;  %771 = vmatprep.mubr.msk.f32.mxu1 %vm319_vm0, %v314_v4  ;;  %s514_s27 = scalar_lea.sflag [#allocation4], %s1336_s17  ;;  %s963_s1 = scalar_lea.vmem %s1385_s10, 1024 }
  0x7b   : > { %772 = vmatmul.mubr.msk.f32.vlgmr.msra.gmra.mrb[0].mxu1 %vm319_vm0, %v315_v5  ;;  %p964_p10 = scmp.ne.s32.totalorder %s1385_s10, %s963_s1  ;;  %p1536_p11 = scmp.ne.s32.totalorder %s1525_s29, 0 }
  0x7c   : > { %774 = vmatprep.mubr.msk.f32.mxu1 %vm319_vm0, %v316_v6  ;;  %s1117_s12 = smov [#allocation8]  }
  0x7d   : > { %769 = vmatmul.mubr.msk.f32.gmra.mrb[2].mxu0 %vm319_vm0, %v313_v7  ;;  %p965_p1 = pnand %p964_p10, %p1536_p11  ;;  %s967_s7 = sshll.u32 %s1117_s12, 4  ;;  %s968_s7 = int_to_ptr.vmem [resolvable:$false] %s967_s7 }
  0x7e   : > { %s969_s8 = scalar_lea.vmem %s968_s7, 2048  ;;  %p970_p6 = scmp.lt.s32.totalorder %s1385_s10, %s968_s7 }
  0x7f   : > { %775 = vmatmul.mubr.msk.f32.gmra.mrb[2].mxu1 %vm319_vm0, %v317_v8  ;;  %p966_p0 = pneg %p965_p1  ;;  %p971_p2 = scmp.lt.s32.totalorder %s969_s8, %s963_s1 }
  0x81   : > { %p972_p3 = por %p971_p2, %p970_p6 }
  0x83   : > { %p973_p9 = pnand %p972_p3, %p966_p0 }
 0x14c   : > { %v767_v11 = vpop.f32.mrb[0].mxu0 }
 0x14d   : > { %v456_v12 = vadd.f32 %v767_v11, %v744_v10  ;;  %v486_v13 = vmul.f32 %v767_v11, %v767_v11  ;;  %v410_v14 = vpop.f32.mrb[1].mxu0 }
 0x14e   : > { %v455_v15 = vadd.f32 %v744_v10, %v410_v14  ;;  %v471_v16 = vadd.f32 %v767_v11, %v410_v14  ;;  %v485_v17 = vmul.f32 %v410_v14, %v410_v14  ;;  %v1366_v18 = vpop.f32.mrb[0].mxu1 }
 0x14f   : > { %464 = vst [vmem:[%s1370_s9 + $0x8] sm:$0xff] %v456_v12  ;;  %v460_v19 = vadd.f32 %v1366_v18, %v744_v10  ;;  %v430_v20 = vpop.f32.mrb[1].mxu1 }
 0x150   : > { %463 = vst [vmem:[%s1370_s9] sm:$0xff] %v455_v15  ;;  %v493_v21 = vadd.f32 %v486_v13, %v485_v17  ;;  %v770_v22 = vpop.f32.mrb[2].mxu0  ;;  %v459_v23 = vadd.f32 %v744_v10, %v430_v20  ;;  %v489_v30 = vmul.f32 %v430_v20, %v430_v20 }
 0x151   : > { %v458_v24 = vadd.f32 %v770_v22, %v744_v10  ;;  %v420_v25 = vpop.f32.mrb[3].mxu0  ;;  %468 = vst [vmem:[%s1370_s9 + $0x28] sm:$0xff] %v460_v19  ;;  %v488_v33 = vmul.f32 %v770_v22, %v770_v22 }
 0x152   : > { %v457_v26 = vadd.f32 %v744_v10, %v420_v25  ;;  %v472_v27 = vadd.f32 %v471_v16, %v420_v25  ;;  %v487_v28 = vmul.f32 %v420_v25, %v420_v25  ;;  %467 = vst [vmem:[%s1370_s9 + $0x20] sm:$0xff] %v459_v23  ;;  %v776_v29 = vpop.f32.mrb[2].mxu1 }
 0x153   : > { %466 = vst [vmem:[%s1370_s9 + $0x18] sm:$0xff] %v458_v24  ;;  %v462_v31 = vadd.f32 %v776_v29, %v744_v10  ;;  %v440_v32 = vpop.f32.mrb[3].mxu1 }
 0x154   : > { %465 = vst [vmem:[%s1370_s9 + $0x10] sm:$0xff] %v457_v26  ;;  %v473_v34 = vadd.f32 %v770_v22, %v472_v27  ;;  %v494_v35 = vadd.f32 %v493_v21, %v487_v28  ;;  %v461_v36 = vadd.f32 %v744_v10, %v440_v32 }
 0x155   : > { %470 = vst [vmem:[%s1370_s9 + $0x38] sm:$0xff] %v462_v31 }
 0x156   : > { %v495_v37 = vadd.f32 %v494_v35, %v488_v33  ;;  %v474_v38 = vadd.f32 %v473_v34, %v430_v20  ;;  %469 = vst [vmem:[%s1370_s9 + $0x30] sm:$0xff] %v461_v36 }
 0x157   : > { %976 = shalt.err (!%p973_p9)
}
 0x158   : > { %s977_s26 = scalar_lea.hbm %s1383_s11, 1024  ;;  %s981_s14 = scalar_lea.hbm %s1513_s3, 2048 }
 0x159   : > { %p978_p13 = scmp.ne.s32.totalorder %s1383_s11, %s977_s26  ;;  %p982_p12 = scmp.lt.u32.totalorder %s1383_s11, %s1513_s3 }
 0x15a   : > { %p983_p7 = scmp.lt.u32.totalorder %s981_s14, %s977_s26  ;;  %p985_p10 = scmp.lt.u32.totalorder %s977_s26, %s1383_s11 }
 0x15b   : > { %p979_p4 = pnand %p978_p13, %p1536_p11 }
 0x15c   : > { %p984_p5 = por %p983_p7, %p982_p12 }
 0x15d   : > { %p980_p8 = pneg %p979_p4 }
 0x15e   : > { %p986_p1 = por %p985_p10, %p984_p5 }
 0x160   : > { %p987_p0 = pnand %p986_p1, %p980_p8 }
 0x162   : > { %990 = shalt.err (!%p987_p0)
}
 0x163   : > { %s1118_s1 = smov 128   ;;  %s1119_s7 = smov 8   ;;  %v490_v39 = vmul.f32 %v1366_v18, %v1366_v18  ;;  %v496_v40 = vadd.f32 %v495_v37, %v489_v30  ;;  %v475_v41 = vadd.f32 %v1366_v18, %v474_v38  ;;  %v491_v42 = vmul.f32 %v440_v32, %v440_v32  ;;  %v507_v58 = vld [vmem:[%s1359_s28] sm:$0x1] }
 0x164   : > { %789 = dma.vmem_to_hbm [thread:$0]  (%p1536_p11), %s1385_s10, 1024, %s1383_s11, %s514_s27, %s1118_s1, %s1118_s1, %s1119_s7   ;;  %v492_v45 = vmul.f32 %v776_v29, %v776_v29 }
 0x165   : > { %v476_v43 = vadd.f32 %v475_v41, %v440_v32  ;;  %v497_v44 = vadd.f32 %v496_v40, %v490_v39  ;;  %s518_s17 = sand.u32 1, %s1183_s24   ;;  %s748_s10 = sshll.u32 %s1101_s21, 4  ;;  %v510_v61 = vld [vmem:[%s1363_s6] sm:$0x1] }
 0x166   : > { %s553_s11 = sshll.u32 %s1359_s28, 4  ;;  %s566_s27 = sshll.u32 %s1363_s6, 4  ;;  %s1428_s11 = int_to_ptr.vmem [resolvable:$true] %s553_s11  ;;  %s1436_s27 = int_to_ptr.vmem [resolvable:$true] %s566_s27 }
 0x167   : > { %v477_v46 = vadd.f32 %v776_v29, %v476_v43  ;;  %v498_v47 = vadd.f32 %v497_v44, %v491_v42  ;;  %s1426_s9 = scalar_lea.hbm %s1514_s4, %s748_s10  ;;  %s1434_s13 = scalar_lea.hbm %s1515_s5, %s748_s10 }
 0x168   : > { %s1438_s14 = scalar_lea.sflag [#allocation10], %s518_s17  ;;  %s991_s16 = scalar_lea.vmem %s1428_s11, 16 }
 0x169   : > { %v478_v48 = vrot.slane %v477_v46, 4  ;;  %v499_v49 = vadd.f32 %v498_v47, %v492_v45  ;;  %p992_p6 = scmp.ne.s32.totalorder %s1428_s11, %s991_s16  ;;  %s1120_s12 = smov [#allocation9]  }
 0x16a   : > { %s995_s1 = sshll.u32 %s1120_s12, 4  ;;  %s996_s1 = int_to_ptr.vmem [resolvable:$false] %s995_s1 }
 0x16b   : > { %v479_v50 = vadd.f32 %v478_v48, %v477_v46  ;;  %v500_v51 = vrot.slane %v499_v49, 4  ;;  %p993_p2 = pnand %p992_p6, %p1536_p11  ;;  %s997_s7 = scalar_lea.vmem %s996_s1, 32 }
 0x16c   : > { %p998_p9 = scmp.lt.s32.totalorder %s1428_s11, %s996_s1  ;;  %p999_p13 = scmp.lt.s32.totalorder %s997_s7, %s991_s16 }
 0x16d   : > { %v480_v52 = vrot.slane %v479_v50, 2  ;;  %v501_v53 = vadd.f32 %v500_v51, %v499_v49  ;;  %p994_p3 = pneg %p993_p2 }
 0x16e   : > { %p1000_p4 = por %p999_p13, %p998_p9 }
 0x16f   : > { %v481_v54 = vadd.f32 %v480_v52, %v479_v50  ;;  %v502_v55 = vrot.slane %v501_v53, 2 }
 0x170   : > { %p1001_p8 = pnand %p1000_p4, %p994_p3 }
 0x171   : > { %v482_v56 = vrot.slane %v481_v54, 1  ;;  %v503_v57 = vadd.f32 %v502_v55, %v501_v53 }
 0x173   : > { %v483_v59 = vadd.f32 %v482_v56, %v481_v54  ;;  %v504_v60 = vrot.slane %v503_v57, 1 }
 0x175   : > { %v505_v62 = vadd.f32 %v504_v60, %v503_v57  ;;  %v508_v63 = vadd.f32 %v507_v58, %v483_v59 }
 0x177   : > { %509 = vst [vmem:[%s1359_s28] sm:$0x1] %v508_v63  ;;  %v511_v0 = vadd.f32 %v510_v61, %v505_v62 }
 0x178   : > { %1004 = shalt.err (!%p1001_p8)
}
 0x179   : > { %s1005_s28 = scalar_lea.hbm %s1426_s9, 16  ;;  %s1009_s8 = scalar_lea.hbm %s1514_s4, 32 }
 0x17a   : > { %p1006_p12 = scmp.ne.s32.totalorder %s1426_s9, %s1005_s28  ;;  %p1010_p10 = scmp.lt.u32.totalorder %s1426_s9, %s1514_s4 }
 0x17b   : > { %p1011_p1 = scmp.lt.u32.totalorder %s1009_s8, %s1005_s28  ;;  %p1013_p6 = scmp.lt.u32.totalorder %s1005_s28, %s1426_s9 }
 0x17c   : > { %p1007_p7 = pnand %p1006_p12, %p1536_p11 }
 0x17d   : > { %p1012_p0 = por %p1011_p1, %p1010_p10 }
 0x17e   : > { %p1008_p5 = pneg %p1007_p7 }
 0x17f   : > { %p1014_p2 = por %p1013_p6, %p1012_p0 }
 0x181   : > { %p1015_p3 = pnand %p1014_p2, %p1008_p5 }
 0x183   : > { %1018 = shalt.err (!%p1015_p3)
}
 0x184   : > { %790 = dma.vmem_to_hbm [thread:$0]  (%p1536_p11), %s1428_s11, 16, %s1426_s9, %s1438_s14   ;;  %512 = vst [vmem:[%s1363_s6] sm:$0x1] %v511_v0 }
 0x185   : > { %s1019_s24 = scalar_lea.vmem %s1436_s27, 16  ;;  %s1121_s16 = smov [#allocation11]  }
 0x186   : > { %p1020_p9 = scmp.ne.s32.totalorder %s1436_s27, %s1019_s24  ;;  %s1023_s12 = sshll.u32 %s1121_s16, 4  ;;  %s1024_s12 = int_to_ptr.vmem [resolvable:$false] %s1023_s12 }
 0x187   : > { %s1025_s1 = scalar_lea.vmem %s1024_s12, 32  ;;  %p1026_p8 = scmp.lt.s32.totalorder %s1436_s27, %s1024_s12 }
 0x188   : > { %p1021_p13 = pnand %p1020_p9, %p1536_p11  ;;  %p1027_p12 = scmp.lt.s32.totalorder %s1025_s1, %s1019_s24 }
 0x18a   : > { %p1022_p4 = pneg %p1021_p13  ;;  %p1028_p7 = por %p1027_p12, %p1026_p8 }
 0x18c   : > { %p1029_p5 = pnand %p1028_p7, %p1022_p4 }
 0x18e   : > { %1032 = shalt.err (!%p1029_p5)
}
 0x18f   : > { %s1033_s6 = scalar_lea.hbm %s1434_s13, 16  ;;  %s1037_s7 = scalar_lea.hbm %s1515_s5, 32 }
 0x190   : > { %p1034_p10 = scmp.ne.s32.totalorder %s1434_s13, %s1033_s6  ;;  %p1038_p6 = scmp.lt.u32.totalorder %s1434_s13, %s1515_s5 }
 0x191   : > { %p1039_p2 = scmp.lt.u32.totalorder %s1037_s7, %s1033_s6  ;;  %p1041_p9 = scmp.lt.u32.totalorder %s1033_s6, %s1434_s13 }
 0x192   : > { %p1035_p1 = pnand %p1034_p10, %p1536_p11 }
 0x193   : > { %p1040_p3 = por %p1039_p2, %p1038_p6 }
 0x194   : > { %p1036_p0 = pneg %p1035_p1 }
 0x195   : > { %p1042_p13 = por %p1041_p9, %p1040_p3 }
 0x197   : > { %p1043_p4 = pnand %p1042_p13, %p1036_p0 }
 0x199   : > { %1046 = shalt.err (!%p1043_p4)
}
 0x19a   : > { %791 = dma.vmem_to_hbm [thread:$0]  (%p1536_p11), %s1436_s27, 16, %s1434_s13, %s1438_s14  }
 0x19b PF: > { %s578_s10 = sand.u32 1, %s1089_s18   ;;  %p1537_p8 = scmp.ne.s32.totalorder %s1526_s30, 0 }
 0x19c   : > { %p1538_p12 = scmp.ge.s32.totalorder %s1109_s23, 2  ;;  %s579_s8 = scalar_lea.sflag [#allocation4], %s578_s10 }
 0x19e   : > { %p807_p7 = pnand %p1538_p12, %p1537_p8 }
 0x1a0   : > { %1080 = dma.done.wait (!%p807_p7), %s579_s8, 1024  }
 0x1a1   : > { %1082 = vsyncadd (!%p807_p7), %s579_s8, 4294966272  ;;  %s1539_s26 = sadd.s32 4294967294, %s1109_s23  }
 0x1a2   : > { %s587_s21 = sand.u32 1, %s1539_s26  }
 0x1a3   : > { %s588_s24 = scalar_lea.sflag [#allocation10], %s587_s21 }
 0x1a4   : > { %1084 = dma.done.wait (!%p807_p7), %s588_s24, 32  }
 0x1a5   : > { %1086 = vsyncadd (!%p807_p7), %s588_s24, 4294967264  ;;  %s26_s23 = sadd.s32 1, %s1109_s23   ;;  %s1540_s18 = smov %s1093_s19 }
 0x1a6   : > { %p23_p11 = scmp.ge.s32.totalorder %s26_s23, 4   ;;  %s1541_s19 = smov %s1097_s20 }
 0x1a7   : > { %s1542_s20 = smov %s1303_s25  ;;  %s1543_s21 = smov %s1105_s22 }
 0x1a8   : > { %s1544_s22 = smov %s1546_s15  ;;  %25 = sbr.rel (!%p23_p11) target bundleno = 11 (0xb), region = 121 }
 0x1af   :  { %600 = vsyncpa [#allocation3], 1 }
 0x1b0   :  { %602 = vsyncpa [#allocation3 + $0x1], 1 }
 0x1b1   :  { %603 = vsyncpa [#allocation6], 1 }
 0x1b2   :  { %604 = vsyncpa [#allocation4], 1 }
 0x1b3   :  { %606 = vsyncpa [#allocation4 + $0x1], 1 }
 0x1b4   :  { %607 = vsyncpa [#allocation10], 1 }
 0x1b5   :  { %609 = vsyncpa [#allocation10 + $0x1], 1 }

// kernel: residual_block_forward.10
= control target key start
LH: loop header
LB: loop body
LE: loop exit
PB: predicated region body
PF: predicated region fallthrough
CT: control target
= control target key end

     0   :  { %8 = vsyncpa [#allocation3], 0  ;;  %s956_s0 = inlined_call_operand.hbm [shape: f32[2,64,128], index: 0, kind: input, shape index: {}]   ;;  %s957_s1 = inlined_call_operand.hbm [shape: f32[1,128], index: 1, kind: input, shape index: {}]   ;;  %s958_s2 = inlined_call_operand.hbm [shape: f32[1,128], index: 2, kind: input, shape index: {}]   ;;  %s959_s3 = inlined_call_operand.hbm [shape: f32[2,10,10,128], index: 3, kind: output, shape index: {}]  }
   0x1   :  { %10 = vsyncpa [#allocation3 + $0x1], 0 }
   0x2   :  { %11 = vsyncpa [#allocation6], 0 }
   0x3   :  { %12 = vsyncpa [#allocation4], 0 }
   0x4   :  { %14 = vsyncpa [#allocation4 + $0x1], 0  ;;  %s682_s12 = smov 0   ;;  %s684_s13 = smov 0  }
   0x5   :  { %s686_s14 = smov 0   ;;  %s688_s15 = smov 0  }
   0x6 LB: > { %s703_s16 = sadd.s32 4294967295, %s651_s15   ;;  %s395_s17 = sadd.s32 4294967294, %s651_s15   ;;  %s651_s15 = sphi %s688_s15, %s984_s15   ;;  %s647_s14 = sphi %s686_s14, %s983_s14   ;;  %s643_s13 = sphi %s684_s13, %s982_s13   ;;  %s639_s12 = sphi %s682_s12, %s981_s12  }
   0x7   : > { %s707_s18 = sadd.s32 1, %s651_s15   ;;  %s27_s19 = sadd.s32 1, %s647_s14 }
   0x8   : > { %s24_s20 = ssub.s32 %s651_s15, %s707_s18  ;;  %p34_p0 = scmp.ne.s32.totalorder %s647_s14, %s643_s13 }
   0x9   : > { %p25_p1 = scmp.eq.s32.totalorder %s24_s20, 0  ;;  %p35_p2 = scmp.eq.s32.totalorder %s651_s15, 0 }
   0xa   : > { %p40_p3 = scmp.ne.s32.totalorder %s643_s13, %s639_s12  ;;  %p960_p4 = scmp.eq.s32.totalorder %s703_s16, 0 }
   0xb   : > { %s719_s21 = scalar_select %p25_p1, %s647_s14, %s27_s19  }
   0xc   : > { %p721_p5 = por %p35_p2, %p34_p0  ;;  %p727_p6 = por %p960_p4, %p40_p3 }
   0xd   : > { %p106_p7 = scmp.eq.s32.totalorder %s703_s16, 1  ;;  %p112_p8 = scmp.eq.s32.totalorder %s395_s17, 1 }
   0xe   : > { %s966_s23 = scalar_select %p727_p6, 1, 0 }
   0xf   : > { %p396_p9 = scmp.ge.s32.totalorder %s651_s15, 1  ;;  %p119_p10 = scmp.lt.s32.totalorder %s651_s15, 3 }
  0x10   : > { %p734_p11 = por %p106_p7, %p34_p0  ;;  %p738_p12 = por %p112_p8, %p40_p3 }
  0x11   : > { %p742_p13 = pnand %p396_p9, %p119_p10  ;;  %s653_s27 = smov [#allocation5]  }
  0x12   : > { %s967_s24 = scalar_select %p734_p11, 1, 0 }
  0x13   : > { %s968_s25 = scalar_select %p738_p12, 1, 0 }
  0x14   : > { %s969_s26 = scalar_select %p742_p13, 1, 0 }
  0x15   : > { %p435_p2 = pneg %p742_p13  ;;  %s132_s28 = sshll.u32 %s653_s27, 4  ;;  %s133_s28 = int_to_ptr.vmem [resolvable:$true] %s132_s28 }
  0x16   : > { %p452_p4 = scmp.lt.s32.totalorder %s651_s15, 2  ;;  %p970_p0 = scmp.eq.s32.totalorder %s703_s16, 0 }
  0x17   : > { %s654_s4 = smov [#allocation7]   ;;  %s495_s8 = scalar_lea.hbm %s957_s1, 16 }
  0x18   : > { %p752_p7 = pnand %p435_p2, %p970_p0  ;;  %p758_p3 = pnand %p452_p4, %p721_p5 }
  0x19   : > { %s143_s5 = sshll.u32 %s654_s4, 4  ;;  %p496_p8 = scmp.ne.s32.totalorder %s957_s1, %s495_s8  ;;  %s762_s5 = int_to_ptr.vmem [resolvable:$true] %s143_s5 }
  0x1a   : > { %s972_s30 = scalar_select %p758_p3, 1, 0 }
  0x1b   : > { %p497_p9 = pneg %p752_p7  ;;  %p502_p10 = scmp.lt.u32.totalorder %s495_s8, %s957_s1 }
  0x1d   : > { %p498_p4 = pnand %p497_p9, %p496_p8 }
  0x1f   : > { %p499_p5 = pneg %p498_p4 }
  0x21   : > { %p504_p2 = pnand %p502_p10, %p499_p5 }
  0x23   : > { %507 = shalt.err (!%p504_p2)
}
  0x24   : > { %s508_s19 = scalar_lea.vmem %s133_s28, 16  ;;  %s515_s20 = scalar_lea.vmem %s133_s28, 32 }
  0x25   : > { %p509_p0 = scmp.ne.s32.totalorder %s133_s28, %s508_s19  ;;  %p516_p11 = scmp.lt.s32.totalorder %s133_s28, %s133_s28 }
  0x26   : > { %p517_p6 = scmp.lt.s32.totalorder %s515_s20, %s508_s19 }
  0x27   : > { %p511_p1 = pnand %p509_p0, %p497_p9 }
  0x28   : > { %p518_p13 = por %p517_p6, %p516_p11 }
  0x29   : > { %p512_p12 = pneg %p511_p1 }
  0x2b   : > { %p519_p3 = pnand %p518_p13, %p512_p12 }
  0x2d   : > { %522 = shalt.err (!%p519_p3)
}
  0x2e   : > { %438 = dma.hbm_to_vmem [thread:$0]  (!%p752_p7), %s957_s1, 16, %s133_s28, [#allocation6]  }
  0x2f   : > { %s154_s4 = sand.u32 1, %s647_s14   ;;  %s523_s8 = scalar_lea.hbm %s958_s2, 16 }
  0x30   : > { %p524_p1 = scmp.ne.s32.totalorder %s958_s2, %s523_s8  ;;  %p530_p12 = scmp.lt.u32.totalorder %s523_s8, %s958_s2 }
  0x32   : > { %p526_p6 = pnand %p524_p1, %p497_p9 }
  0x34   : > { %p527_p11 = pneg %p526_p6 }
  0x36   : > { %p532_p13 = pnand %p530_p12, %p527_p11 }
  0x38   : > { %535 = shalt.err (!%p532_p13)
}
  0x39   : > { %s536_s28 = scalar_lea.vmem %s762_s5, 16  ;;  %s543_s19 = scalar_lea.vmem %s762_s5, 32 }
  0x3a   : > { %p537_p3 = scmp.ne.s32.totalorder %s762_s5, %s536_s28  ;;  %p544_p5 = scmp.lt.s32.totalorder %s762_s5, %s762_s5 }
  0x3b   : > { %p545_p10 = scmp.lt.s32.totalorder %s543_s19, %s536_s28 }
  0x3c   : > { %p539_p8 = pnand %p537_p3, %p497_p9 }
  0x3d   : > { %p546_p2 = por %p545_p10, %p544_p5 }
  0x3e   : > { %p540_p4 = pneg %p539_p8 }
  0x40   : > { %p547_p0 = pnand %p546_p2, %p540_p4 }
  0x42   : > { %550 = shalt.err (!%p547_p0)
}
  0x43   : > { %441 = dma.hbm_to_vmem [thread:$0]  (!%p752_p7), %s958_s2, 16, %s762_s5, [#allocation6]  }
  0x44   : > { %s400_s27 = sshll.u32 %s154_s4, 6  ;;  %s420_s6 = sshll.u32 %s651_s15, 10 }
  0x45   : > { %s817_s9 = scalar_lea.hbm %s956_s0, %s420_s6  ;;  %s158_s29 = scalar_lea.vmem [#allocation2], %s400_s27 }
  0x46   : > { %s165_s10 = sshll.u32 %s158_s29, 4  ;;  %s821_s11 = scalar_lea.sflag [#allocation3], %s154_s4  ;;  %s819_s10 = int_to_ptr.vmem [resolvable:$true] %s165_s10 }
  0x47   : > { %s551_s17 = scalar_lea.hbm %s817_s9, 1024  ;;  %p973_p7 = scmp.ne.s32.totalorder %s972_s30, 0 }
  0x48   : > { %p552_p9 = scmp.ne.s32.totalorder %s817_s9, %s551_s17  ;;  %s556_s19 = scalar_lea.hbm %s956_s0, 2048 }
  0x49   : > { %p553_p1 = pneg %p973_p7  ;;  %p557_p12 = scmp.lt.u32.totalorder %s817_s9, %s956_s0 }
  0x4a   : > { %p558_p13 = scmp.lt.u32.totalorder %s556_s19, %s551_s17  ;;  %p560_p8 = scmp.lt.u32.totalorder %s551_s17, %s817_s9 }
  0x4b   : > { %p554_p6 = pnand %p553_p1, %p552_p9 }
  0x4c   : > { %p559_p3 = por %p558_p13, %p557_p12 }
  0x4d   : > { %p555_p11 = pneg %p554_p6 }
  0x4e   : > { %p561_p4 = por %p560_p8, %p559_p3 }
  0x50   : > { %p562_p5 = pnand %p561_p4, %p555_p11 }
  0x52   : > { %565 = shalt.err (!%p562_p5)
}
  0x53   : > { %s566_s4 = scalar_lea.vmem %s819_s10, 1024  ;;  %s655_s27 = smov [#allocation2]  }
  0x54   : > { %p567_p10 = scmp.ne.s32.totalorder %s819_s10, %s566_s4  ;;  %s571_s6 = sshll.u32 %s655_s27, 4  ;;  %s572_s6 = int_to_ptr.vmem [resolvable:$false] %s571_s6 }
  0x55   : > { %s573_s7 = scalar_lea.vmem %s572_s6, 2048  ;;  %p574_p9 = scmp.lt.s32.totalorder %s819_s10, %s572_s6 }
  0x56   : > { %p569_p2 = pnand %p567_p10, %p553_p1  ;;  %p575_p6 = scmp.lt.s32.totalorder %s573_s7, %s566_s4 }
  0x58   : > { %p570_p0 = pneg %p569_p2  ;;  %p576_p12 = por %p575_p6, %p574_p9 }
  0x5a   : > { %p577_p13 = pnand %p576_p12, %p570_p0 }
  0x5c   : > { %580 = shalt.err (!%p577_p13)
}
  0x5d   : > { %s656_s8 = smov 128   ;;  %s657_s29 = smov 8  }
  0x5e   : > { %445 = dma.hbm_to_vmem [thread:$0]  (!%p973_p7), %s817_s9, 1024, %s819_s10, %s821_s11, %s656_s8, %s656_s8, %s657_s29  }
  0x5f   : > { %p974_p1 = scmp.ne.s32.totalorder %s969_s26, 0 }
  0x60   : > { %s852_s17 = sand.u32 (!%p974_p1), 1, %s643_s13   ;;  %p975_p11 = scmp.ne.s32.totalorder (!%p974_p1), %s966_s23, 0 }
  0x61   : > { %177 = sbr.rel (%p974_p1) target bundleno = 139 (0x8b), region = 32  ;;  %s404_s5 = sshll.u32 (!%p974_p1), %s852_s17, 6 }
  0x62   : > { %s180_s28 = scalar_lea.sflag (!%p974_p1), [#allocation3], %s852_s17  ;;  %s856_s19 = scalar_lea.vmem (!%p974_p1), [#allocation2], %s404_s5 }
  0x68   : > { %626 = dma.done.wait (%p975_p11), %s180_s28, 1024  }
  0x69   : > { %628 = vsyncadd (%p975_p11), %s180_s28, 4294966272  ;;  %p976_p7 = scmp.eq.s32.totalorder %s703_s16, 0 }
  0x6b   : > { %630 = dma.done.wait (%p976_p7), [#allocation6], 32   ;;  %p977_p3 = pmov %p976_p7 }
  0x6c   : > { %s421_s26 = smul.u32 160, %s852_s17  ;;  %v658_v0 = vmov 0.0   ;;  %v234_v1 = vld [vmem:[%s856_s19] sm:$0xff]  ;;  %v235_v5 = vld [vmem:[%s856_s19 + $0x8] sm:$0xff]  ;;  %v236_v6 = vld [vmem:[%s856_s19 + $0x10] sm:$0xff]  ;;  %s290_s20 = scalar_lea.sflag [#allocation4], %s852_s17 }
  0x6d   : > { %632 = vsyncadd (%p977_p3), [#allocation6], 4294967264  ;;  %v407_v2 = vld [vmem:[#allocation5] ss:$0 sm:$0xff]  ;;  %v408_v3 = vld [vmem:[#allocation7] ss:$0 sm:$0xff] }
  0x6e   : > { %s867_s30 = scalar_lea.vmem [#allocation8], %s421_s26  ;;  %v249_v4 = vmul.f32 %v407_v2, %v234_v1  ;;  %v237_v7 = vld [vmem:[%s856_s19 + $0x18] sm:$0xff]  ;;  %v250_v8 = vmul.f32 %v407_v2, %v235_v5  ;;  %v251_v9 = vmul.f32 %v407_v2, %v236_v6  ;;  %v238_v11 = vld [vmem:[%s856_s19 + $0x20] sm:$0xff]  ;;  %v239_v12 = vld [vmem:[%s856_s19 + $0x28] sm:$0xff]  ;;  %s422_s23 = smul.u32 2560, %s703_s16 }
  0x6f   : > { %216 = vst [vmem:[%s867_s30 + $0x10] sm:$0xff] %v658_v0  ;;  %214 = vst [vmem:[%s867_s30] sm:$0xff] %v658_v0  ;;  %v252_v10 = vmul.f32 %v407_v2, %v237_v7  ;;  %v240_v13 = vld [vmem:[%s856_s19 + $0x30] sm:$0xff]  ;;  %v253_v15 = vmul.f32 %v407_v2, %v238_v11  ;;  %v254_v16 = vmul.f32 %v407_v2, %v239_v12  ;;  %v241_v18 = vld [vmem:[%s856_s19 + $0x38] sm:$0xff]  ;;  %s303_s9 = sshll.u32 %s867_s30, 4  ;;  %p978_p4 = scmp.ne.s32.totalorder %s967_s24, 0  ;;  %s908_s9 = int_to_ptr.vmem [resolvable:$true] %s303_s9 }
  0x70   : > { %215 = vst [vmem:[%s867_s30 + $0x8] sm:$0x3] %v658_v0  ;;  %217 = vst [vmem:[%s867_s30 + $0x18] sm:$0x3] %v658_v0  ;;  %v264_v14 = vadd.f32 %v408_v3, %v249_v4  ;;  %v255_v17 = vmul.f32 %v407_v2, %v240_v13  ;;  %v265_v19 = vadd.f32 %v408_v3, %v250_v8  ;;  %s906_s11 = scalar_lea.hbm %s959_s3, %s422_s23  ;;  %s581_s22 = scalar_lea.vmem %s908_s9, 2560 }
  0x71   : > { %218 = vst [vmem:[%s867_s30 + $0x20] sm:$0xff] %v658_v0  ;;  %219 = vst [vmem:[%s867_s30 + $0x28] sm:$0x3] %v658_v0  ;;  %v266_v20 = vadd.f32 %v408_v3, %v251_v9  ;;  %v267_v21 = vadd.f32 %v408_v3, %v252_v10  ;;  %v256_v22 = vmul.f32 %v407_v2, %v241_v18  ;;  %p582_p8 = scmp.ne.s32.totalorder %s908_s9, %s581_s22  ;;  %s659_s4 = smov [#allocation8]  }
  0x72   : > { %220 = vst [vmem:[%s867_s30 + $0x30] sm:$0xff] %v658_v0  ;;  %221 = vst [vmem:[%s867_s30 + $0x38] sm:$0x3] %v658_v0  ;;  %v272_v23 = vmax.f32 %v264_v14, 0.0  ;;  %v268_v24 = vadd.f32 %v408_v3, %v253_v15  ;;  %v269_v25 = vadd.f32 %v408_v3, %v254_v16  ;;  %v270_v26 = vadd.f32 %v408_v3, %v255_v17  ;;  %s585_s27 = sshll.u32 %s659_s4, 4  ;;  %s586_s27 = int_to_ptr.vmem [resolvable:$false] %s585_s27 }
  0x73   : > { %222 = vst [vmem:[%s867_s30 + $0x40] sm:$0xff] %v658_v0  ;;  %223 = vst [vmem:[%s867_s30 + $0x48] sm:$0x3] %v658_v0  ;;  %v273_v27 = vmax.f32 %v265_v19, 0.0  ;;  %v274_v28 = vmax.f32 %v266_v20, 0.0  ;;  %v275_v29 = vmax.f32 %v267_v21, 0.0  ;;  %v271_v30 = vadd.f32 %v408_v3, %v256_v22  ;;  %p583_p5 = pnand %p582_p8, %p978_p4  ;;  %p588_p2 = scmp.lt.s32.totalorder %s908_s9, %s586_s27 }
  0x74   : > { %224 = vst [vmem:[%s867_s30 + $0x50] sm:$0xff] %v658_v0  ;;  %225 = vst [vmem:[%s867_s30 + $0x58] sm:$0x3] %v658_v0  ;;  %v276_v31 = vmax.f32 %v268_v24, 0.0  ;;  %v277_v32 = vmax.f32 %v269_v25, 0.0  ;;  %v278_v33 = vmax.f32 %v270_v26, 0.0 }
  0x75   : > { %226 = vst [vmem:[%s867_s30 + $0x60] sm:$0xff] %v658_v0  ;;  %227 = vst [vmem:[%s867_s30 + $0x68] sm:$0x3] %v658_v0  ;;  %v279_v34 = vmax.f32 %v271_v30, 0.0  ;;  %p584_p10 = pneg %p583_p5  ;;  %s587_s6 = scalar_lea.vmem %s586_s27, 5120 }
  0x76   : > { %228 = vst [vmem:[%s867_s30 + $0x70] sm:$0xff] %v658_v0  ;;  %229 = vst [vmem:[%s867_s30 + $0x78] sm:$0x3] %v658_v0  ;;  %p589_p0 = scmp.lt.s32.totalorder %s587_s6, %s581_s22 }
  0x77   : > { %230 = vst [vmem:[%s867_s30 + $0x80] sm:$0xff] %v658_v0  ;;  %231 = vst [vmem:[%s867_s30 + $0x88] sm:$0x3] %v658_v0 }
  0x78   : > { %232 = vst [vmem:[%s867_s30 + $0x90] sm:$0xff] %v658_v0  ;;  %233 = vst [vmem:[%s867_s30 + $0x98] sm:$0x3] %v658_v0  ;;  %p590_p9 = por %p589_p0, %p588_p2 }
  0x79   : > { %409 = vst [vmem:[%s867_s30 + $0x11] sm:$0xff] %v272_v23  ;;  %410 = vst [vmem:[%s867_s30 + $0x21] sm:$0xff] %v273_v27 }
  0x7a   : > { %411 = vst [vmem:[%s867_s30 + $0x31] sm:$0xff] %v274_v28  ;;  %412 = vst [vmem:[%s867_s30 + $0x41] sm:$0xff] %v275_v29  ;;  %p591_p6 = pnand %p590_p9, %p584_p10 }
  0x7b   : > { %413 = vst [vmem:[%s867_s30 + $0x51] sm:$0xff] %v276_v31  ;;  %414 = vst [vmem:[%s867_s30 + $0x61] sm:$0xff] %v277_v32 }
  0x7c   : > { %415 = vst [vmem:[%s867_s30 + $0x71] sm:$0xff] %v278_v33  ;;  %416 = vst [vmem:[%s867_s30 + $0x81] sm:$0xff] %v279_v34 }
  0x7d   : > { %594 = shalt.err (!%p591_p6)
}
  0x7e   : > { %s595_s7 = scalar_lea.hbm %s906_s11, 2560  ;;  %s599_s5 = scalar_lea.hbm %s959_s3, 5120 }
  0x7f   : > { %p596_p12 = scmp.ne.s32.totalorder %s906_s11, %s595_s7  ;;  %p600_p11 = scmp.lt.u32.totalorder %s906_s11, %s959_s3 }
  0x80   : > { %p601_p7 = scmp.lt.u32.totalorder %s599_s5, %s595_s7  ;;  %p603_p8 = scmp.lt.u32.totalorder %s595_s7, %s906_s11 }
  0x81   : > { %p597_p13 = pnand %p596_p12, %p978_p4 }
  0x82   : > { %p602_p3 = por %p601_p7, %p600_p11 }
  0x83   : > { %p598_p1 = pneg %p597_p13 }
  0x84   : > { %p604_p5 = por %p603_p8, %p602_p3 }
  0x86   : > { %p605_p10 = pnand %p604_p5, %p598_p1 }
  0x88   : > { %608 = shalt.err (!%p605_p10)
}
  0x89   : > { %s660_s26 = smov 128   ;;  %s661_s30 = smov 8  }
  0x8a   : > { %433 = dma.vmem_to_hbm [thread:$0]  (%p978_p4), %s908_s9, 2560, %s906_s11, %s290_s20, %s660_s26, %s660_s26, %s661_s30  }
  0x8b PF: > { %s318_s23 = sand.u32 1, %s639_s12   ;;  %p979_p2 = scmp.ne.s32.totalorder %s968_s25, 0 }
  0x8c   : > { %p980_p0 = scmp.ge.s32.totalorder %s651_s15, 2  ;;  %s319_s16 = scalar_lea.sflag [#allocation4], %s318_s23 }
  0x8e   : > { %p447_p9 = pnand %p980_p0, %p979_p2 }
  0x90   : > { %634 = dma.done.wait (!%p447_p9), %s319_s16, 2560  }
  0x91   : > { %636 = vsyncadd (!%p447_p9), %s319_s16, 4294964736  ;;  %p17_p6 = scmp.ge.s32.totalorder %s707_s18, 4   ;;  %s981_s12 = smov %s643_s13 }
  0x92   : > { %s982_s13 = smov %s647_s14  ;;  %s983_s14 = smov %s719_s21 }
  0x93   : > { %s984_s15 = smov %s707_s18  ;;  %19 = sbr.rel (!%p17_p6) target bundleno = 6 (0x6), region = 86 }
  0x9a   :  { %324 = vsyncpa [#allocation3], 1 }
  0x9b   :  { %326 = vsyncpa [#allocation3 + $0x1], 1 }
  0x9c   :  { %327 = vsyncpa [#allocation6], 1 }
  0x9d   :  { %328 = vsyncpa [#allocation4], 1 }
  0x9e   :  { %330 = vsyncpa [#allocation4 + $0x1], 1 }

// kernel: residual_block_forward.8
= control target key start
LH: loop header
LB: loop body
LE: loop exit
PB: predicated region body
PF: predicated region fallthrough
CT: control target
= control target key end

     0   :  { %11 = vsyncpa [#allocation3], 0  ;;  %s3201_s0 = inlined_call_operand.hbm [shape: f32[2,1,36,9,8], index: 0, kind: input, shape index: {}]   ;;  %s3202_s1 = inlined_call_operand.hbm [shape: f32[9,8,128], index: 1, kind: input, shape index: {}]   ;;  %s3203_s2 = inlined_call_operand.hbm [shape: f32[1,128], index: 2, kind: input, shape index: {}]   ;;  %s3204_s3 = inlined_call_operand.hbm [shape: f32[2,64,128], index: 3, kind: output, shape index: {0}]   ;;  %s3205_s4 = inlined_call_operand.hbm [shape: f32[2,1,128], index: 4, kind: output, shape index: {1}]   ;;  %s3206_s5 = inlined_call_operand.hbm [shape: f32[2,1,128], index: 5, kind: output, shape index: {2}]  }
   0x1   :  { %13 = vsyncpa [#allocation3 + $0x1], 0 }
   0x2   :  { %14 = vsyncpa [#allocation6], 0 }
   0x3   :  { %15 = vsyncpa [#allocation4], 0 }
   0x4   :  { %17 = vsyncpa [#allocation4 + $0x1], 0 }
   0x5   :  { %18 = vsyncpa [#allocation10], 0 }
   0x6   :  { %20 = vsyncpa [#allocation10 + $0x1], 0  ;;  %s2694_s18 = smov 0   ;;  %s2696_s19 = smov 0  }
   0x7   :  { %s2698_s20 = smov 0   ;;  %s2700_s21 = smov 0  }
   0x8   :  { %s2702_s22 = smov 0   ;;  %s2704_s23 = smov 0  }
   0x9 LB: > { %s2725_s24 = sadd.s32 4294967295, %s2651_s23   ;;  %s3208_s25 = sadd.s32 4294967294, %s2651_s23   ;;  %s2651_s23 = sphi %s2704_s23, %s26_s23   ;;  %s2647_s22 = sphi %s2702_s22, %s3233_s22   ;;  %s2643_s21 = sphi %s2700_s21, %s3232_s21   ;;  %s2639_s20 = sphi %s2698_s20, %s3231_s20   ;;  %s2635_s19 = sphi %s2696_s19, %s3230_s19   ;;  %s2631_s18 = sphi %s2694_s18, %s3229_s18  }
   0xa   : > { %p60_p0 = scmp.ne.s32.totalorder %s2635_s19, %s2631_s18  ;;  %p3207_p1 = scmp.eq.s32.totalorder %s2725_s24, 0 }
   0xb   : > { %p134_p3 = scmp.eq.s32.totalorder %s3208_s25, 1  ;;  %p1899_p5 = scmp.ge.s32.totalorder %s2651_s23, 1 }
   0xc   : > { %p2736_p4 = por %p3207_p1, %p60_p0  ;;  %p193_p7 = scmp.lt.s32.totalorder %s2651_s23, 3 }
   0xd   : > { %p2741_p6 = por %p134_p3, %p60_p0  ;;  %s2653_s29 = smov [#allocation5]  }
   0xe   : > { %s3213_s26 = scalar_select %p2736_p4, 1, 0 }
   0xf   : > { %s3214_s27 = scalar_select %p2741_p6, 1, 0 }
  0x10   : > { %p2746_p8 = pnand %p1899_p5, %p193_p7  ;;  %s205_s30 = sshll.u32 %s2653_s29, 4  ;;  %s2750_s30 = int_to_ptr.vmem [resolvable:$true] %s205_s30 }
  0x11   : > { %s2654_s7 = smov [#allocation7]   ;;  %s2419_s11 = scalar_lea.hbm %s3202_s1, 1152 }
  0x12   : > { %p2337_p9 = pneg %p2746_p8  ;;  %s219_s8 = sshll.u32 %s2654_s7, 4  ;;  %s2761_s8 = int_to_ptr.vmem [resolvable:$true] %s219_s8 }
  0x13   : > { %p2420_p12 = scmp.ne.s32.totalorder %s3202_s1, %s2419_s11  ;;  %p2426_p5 = scmp.lt.u32.totalorder %s2419_s11, %s3202_s1 }
  0x14   : > { %p2757_p11 = pnand %p2337_p9, %p3207_p1 }
  0x16   : > { %p2421_p13 = pneg %p2757_p11 }
  0x18   : > { %p2422_p0 = pnand %p2421_p13, %p2420_p12 }
  0x1a   : > { %p2423_p3 = pneg %p2422_p0 }
  0x1c   : > { %p2428_p7 = pnand %p2426_p5, %p2423_p3 }
  0x1e   : > { %2431 = shalt.err (!%p2428_p7)
}
  0x1f   : > { %s2432_s16 = scalar_lea.vmem %s2750_s30, 1152  ;;  %p2440_p2 = scmp.lt.s32.totalorder %s2750_s30, %s2750_s30 }
  0x20   : > { %p2433_p9 = scmp.ne.s32.totalorder %s2750_s30, %s2432_s16  ;;  %p2441_p12 = scmp.lt.s32.totalorder %s2432_s16, %s2432_s16 }
  0x22   : > { %p2435_p10 = pnand %p2433_p9, %p2421_p13  ;;  %p2442_p0 = por %p2441_p12, %p2440_p2 }
  0x24   : > { %p2436_p1 = pneg %p2435_p10 }
  0x26   : > { %p2443_p6 = pnand %p2442_p0, %p2436_p1 }
  0x28   : > { %2446 = shalt.err (!%p2443_p6)
}
  0x29   : > { %s3209_s17 = smov 128   ;;  %s3210_s29 = smov 8  }
  0x2a   : > { %2340 = dma.hbm_to_vmem [thread:$0]  (!%p2757_p11), %s3202_s1, 1152, %s2750_s30, [#allocation6], %s3209_s17, %s3209_s17, %s3210_s29  }
  0x2b   : > { %s2447_s12 = scalar_lea.hbm %s3203_s2, 16 }
  0x2c   : > { %p2448_p1 = scmp.ne.s32.totalorder %s3203_s2, %s2447_s12  ;;  %p2454_p10 = scmp.lt.u32.totalorder %s2447_s12, %s3203_s2 }
  0x2e   : > { %p2450_p2 = pnand %p2448_p1, %p2421_p13 }
  0x30   : > { %p2451_p6 = pneg %p2450_p2 }
  0x32   : > { %p2456_p3 = pnand %p2454_p10, %p2451_p6 }
  0x34   : > { %2459 = shalt.err (!%p2456_p3)
}
  0x35   : > { %s2460_s30 = scalar_lea.vmem %s2761_s8, 16  ;;  %s2467_s7 = scalar_lea.vmem %s2761_s8, 32 }
  0x36   : > { %p2461_p5 = scmp.ne.s32.totalorder %s2761_s8, %s2460_s30  ;;  %p2468_p12 = scmp.lt.s32.totalorder %s2761_s8, %s2761_s8 }
  0x37   : > { %p2469_p0 = scmp.lt.s32.totalorder %s2467_s7, %s2460_s30 }
  0x38   : > { %p2463_p7 = pnand %p2461_p5, %p2421_p13 }
  0x39   : > { %p2470_p1 = por %p2469_p0, %p2468_p12 }
  0x3a   : > { %p2464_p9 = pneg %p2463_p7 }
  0x3c   : > { %p2471_p2 = pnand %p2470_p1, %p2464_p9 }
  0x3e   : > { %2474 = shalt.err (!%p2471_p2)
}
  0x3f   : > { %2343 = dma.hbm_to_vmem [thread:$0]  (!%p2757_p11), %s3203_s2, 16, %s2761_s8, [#allocation6]  }
  0x40   : > { %s38_s11 = sadd.s32 1, %s2647_s22  ;;  %s47_s12 = sadd.s32 1, %s2639_s20 }
  0x41   : > { %p40_p13 = scmp.ge.s32.totalorder %s38_s11, 2  ;;  %p54_p6 = scmp.ne.s32.totalorder %s2639_s20, %s2635_s19 }
  0x42   : > { %p55_p10 = scmp.eq.s32.totalorder %s2651_s23, 0  ;;  %p2360_p3 = scmp.lt.s32.totalorder %s2651_s23, 2 }
  0x43   : > { %s3235_s11 = smov (%p40_p13, %s38_s11), 0  ;;  %p3217_p7 = scmp.eq.s32.totalorder %s2725_s24, 1 }
  0x44   : > { %p56_p5 = por %p55_p10, %p54_p6  ;;  %s42_s13 = ssub.s32 %s2647_s22, %s3235_s11 }
  0x45   : > { %p2829_p9 = por %p3217_p7, %p54_p6  ;;  %s230_s14 = sand.u32 1, %s2639_s20  }
  0x46   : > { %p45_p12 = scmp.eq.s32.totalorder %s42_s13, 0  ;;  %s2318_s8 = smul.u32 576, %s230_s14 }
  0x47   : > { %s3218_s6 = scalar_select %p2829_p9, 1, 0 }
  0x48   : > { %p2836_p11 = pnand %p2360_p3, %p56_p5  ;;  %s2319_s30 = smul.u32 9216, %s2647_s22 }
  0x49   : > { %s2841_s16 = scalar_select %p45_p12, %s2639_s20, %s47_s12  }
  0x4a   : > { %s234_s7 = scalar_lea.vmem [#allocation2], %s2318_s8  ;;  %s2847_s17 = scalar_lea.hbm %s3201_s0, %s2319_s30 }
  0x4b   : > { %s243_s9 = sshll.u32 %s234_s7, 4  ;;  %s2851_s13 = scalar_lea.sflag [#allocation3], %s230_s14  ;;  %s2849_s9 = int_to_ptr.vmem [resolvable:$true] %s243_s9 }
  0x4c   : > { %s2475_s29 = scalar_lea.hbm %s2847_s17, 9216  ;;  %p2477_p1 = pneg %p2836_p11 }
  0x4d   : > { %p2476_p0 = scmp.ne.s32.totalorder %s2847_s17, %s2475_s29  ;;  %s2480_s8 = scalar_lea.hbm %s3201_s0, 18432 }
  0x4e   : > { %p2481_p6 = scmp.lt.u32.totalorder %s2847_s17, %s3201_s0  ;;  %p2482_p10 = scmp.lt.u32.totalorder %s2480_s8, %s2475_s29 }
  0x4f   : > { %p2478_p2 = pnand %p2477_p1, %p2476_p0  ;;  %p2484_p5 = scmp.lt.u32.totalorder %s2475_s29, %s2847_s17 }
  0x50   : > { %p2483_p3 = por %p2482_p10, %p2481_p6 }
  0x51   : > { %p2479_p13 = pneg %p2478_p2 }
  0x52   : > { %p2485_p7 = por %p2484_p5, %p2483_p3 }
  0x54   : > { %p2486_p12 = pnand %p2485_p7, %p2479_p13 }
  0x56   : > { %2489 = shalt.err (!%p2486_p12)
}
  0x57   : > { %s2490_s14 = scalar_lea.vmem %s2849_s9, 9216  ;;  %s2657_s10 = smov [#allocation2]  }
  0x58   : > { %p2491_p0 = scmp.ne.s32.totalorder %s2849_s9, %s2490_s14  ;;  %s2495_s12 = sshll.u32 %s2657_s10, 4  ;;  %s2496_s12 = int_to_ptr.vmem [resolvable:$false] %s2495_s12 }
  0x59   : > { %s2497_s25 = scalar_lea.vmem %s2496_s12, 18432  ;;  %p2498_p4 = scmp.lt.s32.totalorder %s2849_s9, %s2496_s12 }
  0x5a   : > { %p2493_p2 = pnand %p2491_p0, %p2477_p1  ;;  %p2499_p6 = scmp.lt.s32.totalorder %s2497_s25, %s2490_s14 }
  0x5c   : > { %p2494_p9 = pneg %p2493_p2  ;;  %p2500_p10 = por %p2499_p6, %p2498_p4 }
  0x5e   : > { %p2501_p3 = pnand %p2500_p10, %p2494_p9 }
  0x60   : > { %2504 = shalt.err (!%p2501_p3)
}
  0x61   : > { %s3220_s29 = smov 8   ;;  %s3221_s8 = smov 128  }
  0x62   : > { %2347 = dma.hbm_to_vmem [thread:$0]  (!%p2836_p11), %s2847_s17, 9216, %s2849_s9, %s2851_s13, %s3221_s8, %s3221_s8, %s3220_s29  }
  0x63   : > { %255 = sbr.rel (%p2746_p8) target bundleno = 463 (0x1cf), region = 32  ;;  %s2885_s30 = sand.u32 (!%p2746_p8), 1, %s2635_s19  }
  0x64   : > { %s2320_s7 = smul.u32 (!%p2746_p8), 576, %s2885_s30  ;;  %s258_s14 = scalar_lea.sflag (!%p2746_p8), [#allocation3], %s2885_s30 }
  0x65   : > { %p3222_p4 = scmp.ne.s32.totalorder (!%p2746_p8), %s3213_s26, 0 }
  0x66   : > { %s2889_s10 = scalar_lea.vmem (!%p2746_p8), [#allocation2], %s2320_s7 }
  0x6a   : > { %2614 = dma.done.wait (%p3222_p4), %s258_s14, 9216  }
  0x6b   : > { %2616 = vsyncadd (%p3222_p4), %s258_s14, 4294958080  ;;  %p3223_p9 = scmp.eq.s32.totalorder %s2725_s24, 0 }
  0x6d   : > { %2618 = dma.done.wait (%p3223_p9), [#allocation6], 1168   ;;  %p3224_p8 = pmov %p3223_p9 }
  0x6e   : > { %vm332_vm0 = vcmask 64512   ;;  %v331_v0 = vld [vmem:[#allocation5 + $0x8] sm:$0xff]  ;;  %v2899_v1 = vld [vmem:[#allocation5 + $0x20] sm:$0xff]  ;;  %v1908_v2 = vld [vmem:[%s2889_s10 + $0x90] sm:$0xff]  ;;  %s3057_s26 = scalar_lea.vmem [#allocation9], %s2885_s30  ;;  %v2658_v60 = vmov 0.0  }
  0x6f   : > { %2620 = vsyncadd (%p3224_p8), [#allocation6], 4294966128  ;;  %2126 = vmatprep.subr.mxu1 %v331_v0  ;;  %2182 = vmatprep.subr.mxu0 %v2899_v1  ;;  %v1956_v3 = vld [vmem:[%s2889_s10 + $0x1b0] sm:$0xff]  ;;  %v2905_v4 = vld [vmem:[%s2889_s10 + $0xa0] sm:$0xff]  ;;  %310 = vst [vmem:[%s3057_s26] sm:$0x1] %v2658_v60  ;;  %s3061_s28 = scalar_lea.vmem [#allocation11], %s2885_s30 }
  0x70   : > { %v320_v5 = vld [vmem:[#allocation5] sm:$0xff]  ;;  %2127 = vmatpush3.msra.mxu1 %v331_v0  ;;  %2128 = vmatprep.mubr.msk.f32.mxu1 %vm332_vm0, %v1908_v2  ;;  %v1043_v7 = vld [vmem:[#allocation5 + $0x28] sm:$0xff]  ;;  %v2914_v8 = vld [vmem:[%s2889_s10 + $0xb0] sm:$0xff]  ;;  %311 = vst [vmem:[%s3061_s28] sm:$0x1] %v2658_v60  ;;  %s1907_s17 = sshll.u32 %s2885_s30, 6  ;;  %s2044_s9 = sshll.u32 %s2643_s21, 10 }
  0x71   : > { %v1957_v6 = vld [vmem:[%s2889_s10 + $0x1c0] sm:$0xff]  ;;  %2183 = vmatpush3.msra.mxu0 %v2899_v1  ;;  %2184 = vmatprep.mubr.msk.f32.mxu0 %vm332_vm0, %v1956_v3  ;;  %v1958_v9 = vld [vmem:[%s2889_s10 + $0x1d0] sm:$0xff]  ;;  %v1339_v20 = vld [vmem:[#allocation5 + $0x38] sm:$0xff]  ;;  %s3065_s15 = scalar_lea.vmem [#allocation8], %s1907_s17  ;;  %s3078_s29 = scalar_lea.hbm %s3204_s3, %s2044_s9 }
  0x72   : > { %2129 = vmatmul.mubr.msk.f32.vlgmr.msra.gmra.mrb[0].mxu1 %vm332_vm0, %v2905_v4  ;;  %2140 = vmatprep.subr.mxu1 %v320_v5  ;;  %v2919_v10 = vld [vmem:[%s2889_s10 + $0xc0] sm:$0xff]  ;;  %v1191_v11 = vld [vmem:[#allocation5 + $0x30] sm:$0xff]  ;;  %v748_v29 = vld [vmem:[#allocation5 + $0x18] sm:$0xff]  ;;  %s1712_s13 = sshll.u32 %s3065_s15, 4  ;;  %s1689_s8 = scalar_lea.sflag [#allocation4], %s2885_s30  ;;  %s3080_s13 = int_to_ptr.vmem [resolvable:$true] %s1712_s13 }
  0x73   : > { %2185 = vmatmul.mubr.msk.f32.vlgmr.msra.gmra.mrb[0].mxu0 %vm332_vm0, %v1957_v6  ;;  %2196 = vmatprep.subr.mxu0 %v1043_v7  ;;  %v1959_v12 = vld [vmem:[%s2889_s10 + $0x1e0] sm:$0xff]  ;;  %v2923_v13 = vld [vmem:[%s2889_s10 + $0xd0] sm:$0xff]  ;;  %s2505_s7 = scalar_lea.vmem %s3080_s13, 1024  ;;  %p3225_p1 = scmp.ne.s32.totalorder %s3218_s6, 0 }
  0x74   : > { %2141 = vmatpush3.msra.mxu1 %v320_v5  ;;  %2197 = vmatpush3.msra.mxu0 %v1043_v7  ;;  %v1972_v14 = vld [vmem:[%s2889_s10 + $0x121] sm:$0xff]  ;;  %v600_v15 = vld [vmem:[#allocation5 + $0x10] sm:$0xff]  ;;  %p2506_p11 = scmp.ne.s32.totalorder %s3080_s13, %s2505_s7  ;;  %s2659_s14 = smov [#allocation8]  }
  0x75   : > { %2131 = vmatprep.mubr.msk.f32.mxu1 %vm332_vm0, %v2914_v8  ;;  %2187 = vmatprep.mubr.msk.f32.mxu0 %vm332_vm0, %v1958_v9  ;;  %v2935_v16 = vld [vmem:[%s2889_s10 + $0xe0] sm:$0xff]  ;;  %v1973_v17 = vld [vmem:[%s2889_s10 + $0x131] sm:$0xff] }
  0x76   : > { %2132 = vmatmul.mubr.msk.f32.gmra.mrb[2].mxu1 %vm332_vm0, %v2919_v10  ;;  %2210 = vmatprep.subr.mxu0 %v1191_v11  ;;  %v2940_v18 = vld [vmem:[%s2889_s10 + $0xf0] sm:$0xff]  ;;  %v1974_v19 = vld [vmem:[%s2889_s10 + $0x141] sm:$0xff]  ;;  %p2507_p13 = pnand %p2506_p11, %p3225_p1 }
  0x77   : > { %2188 = vmatmul.mubr.msk.f32.gmra.mrb[2].mxu0 %vm332_vm0, %v1959_v12  ;;  %2134 = vmatprep.mubr.msk.f32.mxu1 %vm332_vm0, %v2923_v13  ;;  %v2949_v21 = vld [vmem:[%s2889_s10 + $0x100] sm:$0xff]  ;;  %v1975_v22 = vld [vmem:[%s2889_s10 + $0x151] sm:$0xff] }
  0x78   : > { %2198 = vmatprep.mubr.msk.f32.mxu0 %vm332_vm0, %v1972_v14  ;;  %2154 = vmatprep.subr.mxu1 %v600_v15  ;;  %v312_v23 = vld [vmem:[%s2889_s10] sm:$0xff]  ;;  %v313_v25 = vld [vmem:[%s2889_s10 + $0x10] sm:$0xff]  ;;  %p2508_p5 = pneg %p2507_p13 }
  0x79   : > { %v1976_v24 = vld [vmem:[%s2889_s10 + $0x161] sm:$0xff]  ;;  %v1977_v26 = vld [vmem:[%s2889_s10 + $0x171] sm:$0xff] }
  0x7a   : > { %2135 = vmatmul.mubr.msk.f32.gmra.mrb[4].mxu1 %vm332_vm0, %v2935_v16  ;;  %v314_v27 = vld [vmem:[%s2889_s10 + $0x20] sm:$0xff]  ;;  %v315_v30 = vld [vmem:[%s2889_s10 + $0x30] sm:$0xff] }
  0x7b   : > { %2199 = vmatmul.mubr.msk.f32.vlgmr.msra.gmra.mrb[0].mxu0 %vm332_vm0, %v1973_v17  ;;  %2137 = vmatprep.mubr.msk.f32.mxu1 %vm332_vm0, %v2940_v18  ;;  %v1978_v28 = vld [vmem:[%s2889_s10 + $0x181] sm:$0xff]  ;;  %v1979_v31 = vld [vmem:[%s2889_s10 + $0x191] sm:$0xff] }
  0x7c   : > { %2211 = vmatpush3.msra.mxu0 %v1191_v11  ;;  %2201 = vmatprep.mubr.msk.f32.mxu0 %vm332_vm0, %v1974_v19  ;;  %v316_v32 = vld [vmem:[%s2889_s10 + $0x40] sm:$0xff]  ;;  %v317_v33 = vld [vmem:[%s2889_s10 + $0x50] sm:$0xff] }
  0x7d   : > { %2224 = vmatprep.subr.mxu0 %v1339_v20  ;;  %v318_v34 = vld [vmem:[%s2889_s10 + $0x60] sm:$0xff]  ;;  %v319_v36 = vld [vmem:[%s2889_s10 + $0x70] sm:$0xff] }
  0x7e   : > { %2138 = vmatmul.mubr.msk.f32.gmra.mrb[6].mxu1 %vm332_vm0, %v2949_v21  ;;  %v1486_v35 = vld [vmem:[#allocation5 + $0x40] sm:$0xff]  ;;  %v592_v38 = vld [vmem:[%s2889_s10 + $0x11] sm:$0xff] }
  0x7f   : > { %2202 = vmatmul.mubr.msk.f32.gmra.mrb[2].mxu0 %vm332_vm0, %v1975_v22  ;;  %2142 = vmatprep.mubr.msk.f32.mxu1 %vm332_vm0, %v312_v23  ;;  %v591_v37 = vld [vmem:[%s2889_s10 + $0x1] sm:$0xff]  ;;  %v594_v40 = vld [vmem:[%s2889_s10 + $0x31] sm:$0xff] }
  0x80   : > { %2204 = vmatprep.mubr.msk.f32.mxu0 %vm332_vm0, %v1976_v24  ;;  %v593_v39 = vld [vmem:[%s2889_s10 + $0x21] sm:$0xff]  ;;  %v596_v43 = vld [vmem:[%s2889_s10 + $0x51] sm:$0xff] }
  0x81   : > { %v1995_v41 = vld [vmem:[%s2889_s10 + $0x80] sm:$0xff]  ;;  %v598_v45 = vld [vmem:[%s2889_s10 + $0x71] sm:$0xff] }
  0x82   : > { %2143 = vmatmul.mubr.msk.f32.vlgmr.msra.gmra.mrb[0].mxu1 %vm332_vm0, %v313_v25  ;;  %v595_v42 = vld [vmem:[%s2889_s10 + $0x41] sm:$0xff]  ;;  %v1941_v47 = vld [vmem:[%s2889_s10 + $0x130] sm:$0xff] }
  0x83   : > { %2205 = vmatmul.mubr.msk.f32.gmra.mrb[4].mxu0 %vm332_vm0, %v1977_v26  ;;  %2155 = vmatpush3.msra.mxu1 %v600_v15  ;;  %v597_v44 = vld [vmem:[%s2889_s10 + $0x61] sm:$0xff]  ;;  %v1943_v49 = vld [vmem:[%s2889_s10 + $0x150] sm:$0xff] }
  0x84   : > { %2145 = vmatprep.mubr.msk.f32.mxu1 %vm332_vm0, %v314_v27  ;;  %2207 = vmatprep.mubr.msk.f32.mxu0 %vm332_vm0, %v1978_v28  ;;  %v1940_v46 = vld [vmem:[%s2889_s10 + $0x120] sm:$0xff]  ;;  %v2011_v50 = vld [vmem:[%s2889_s10 + $0x110] sm:$0xff] }
  0x85   : > { %2168 = vmatprep.subr.mxu1 %v748_v29  ;;  %v1942_v48 = vld [vmem:[%s2889_s10 + $0x140] sm:$0xff]  ;;  %v1945_v52 = vld [vmem:[%s2889_s10 + $0x170] sm:$0xff] }
  0x86   : > { %2146 = vmatmul.mubr.msk.f32.gmra.mrb[2].mxu1 %vm332_vm0, %v315_v30  ;;  %v1944_v51 = vld [vmem:[%s2889_s10 + $0x160] sm:$0xff]  ;;  %v1947_v54 = vld [vmem:[%s2889_s10 + $0x190] sm:$0xff] }
  0x87   : > { %2208 = vmatmul.mubr.msk.f32.gmra.mrb[6].mxu0 %vm332_vm0, %v1979_v31  ;;  %2148 = vmatprep.mubr.msk.f32.mxu1 %vm332_vm0, %v316_v32  ;;  %v1946_v53 = vld [vmem:[%s2889_s10 + $0x180] sm:$0xff]  ;;  %v1960_v55 = vld [vmem:[%s2889_s10 + $0x1f0] sm:$0xff] }
  0x88   : > { %2212 = vmatprep.mubr.msk.f32.mxu0 %vm332_vm0, %v313_v25  ;;  %v1961_v56 = vld [vmem:[%s2889_s10 + $0x200] sm:$0xff]  ;;  %v1962_v57 = vld [vmem:[%s2889_s10 + $0x210] sm:$0xff] }
  0x89   : > { %v1963_v58 = vld [vmem:[%s2889_s10 + $0x220] sm:$0xff] }
  0x8a   : > { %2149 = vmatmul.mubr.msk.f32.gmra.mrb[4].mxu1 %vm332_vm0, %v317_v33  ;;  %v2027_v59 = vld [vmem:[%s2889_s10 + $0x81] sm:$0xff]  ;;  %s2509_s10 = sshll.u32 %s2659_s14, 4  ;;  %s2510_s10 = int_to_ptr.vmem [resolvable:$false] %s2509_s10 }
  0x8b   : > { %2213 = vmatmul.mubr.msk.f32.vlgmr.msra.gmra.mrb[0].mxu0 %vm332_vm0, %v314_v27  ;;  %2151 = vmatprep.mubr.msk.f32.mxu1 %vm332_vm0, %v318_v34  ;;  %s2511_s17 = scalar_lea.vmem %s2510_s10, 2048  ;;  %p2512_p7 = scmp.lt.s32.totalorder %s3080_s13, %s2510_s10 }
  0x8c   : > { %2225 = vmatpush3.msra.mxu0 %v1339_v20  ;;  %2215 = vmatprep.mubr.msk.f32.mxu0 %vm332_vm0, %v315_v30  ;;  %p2513_p12 = scmp.lt.s32.totalorder %s2511_s17, %s2505_s7 }
  0x8d   : > { %2238 = vmatprep.subr.mxu0 %v1486_v35 }
  0x8e   : > { %2152 = vmatmul.mubr.msk.f32.gmra.mrb[6].mxu1 %vm332_vm0, %v319_v36  ;;  %p2514_p0 = por %p2513_p12, %p2512_p7 }
  0x8f   : > { %2216 = vmatmul.mubr.msk.f32.gmra.mrb[2].mxu0 %vm332_vm0, %v316_v32  ;;  %2156 = vmatprep.mubr.msk.f32.mxu1 %vm332_vm0, %v591_v37 }
  0x90   : > { %2218 = vmatprep.mubr.msk.f32.mxu0 %vm332_vm0, %v317_v33  ;;  %p2515_p2 = pnand %p2514_p0, %p2508_p5 }
  0x92   : > { %2157 = vmatmul.mubr.msk.f32.vlgmr.msra.gmra.mrb[0].mxu1 %vm332_vm0, %v592_v38 }
  0x93   : > { %2219 = vmatmul.mubr.msk.f32.gmra.mrb[4].mxu0 %vm332_vm0, %v318_v34  ;;  %2169 = vmatpush3.msra.mxu1 %v748_v29 }
  0x94   : > { %2159 = vmatprep.mubr.msk.f32.mxu1 %vm332_vm0, %v593_v39  ;;  %2221 = vmatprep.mubr.msk.f32.mxu0 %vm332_vm0, %v319_v36 }
  0x95   : > { %2252 = vmatprep.subr.mxu1 %v2899_v1 }
  0x96   : > { %2160 = vmatmul.mubr.msk.f32.gmra.mrb[2].mxu1 %vm332_vm0, %v594_v40 }
  0x97   : > { %2222 = vmatmul.mubr.msk.f32.gmra.mrb[6].mxu0 %vm332_vm0, %v1995_v41  ;;  %2162 = vmatprep.mubr.msk.f32.mxu1 %vm332_vm0, %v595_v42 }
  0x98   : > { %2226 = vmatprep.mubr.msk.f32.mxu0 %vm332_vm0, %v2905_v4 }
  0x9a   : > { %2163 = vmatmul.mubr.msk.f32.gmra.mrb[4].mxu1 %vm332_vm0, %v596_v43 }
  0x9b   : > { %2227 = vmatmul.mubr.msk.f32.vlgmr.msra.gmra.mrb[0].mxu0 %vm332_vm0, %v2914_v8  ;;  %2165 = vmatprep.mubr.msk.f32.mxu1 %vm332_vm0, %v597_v44 }
  0x9c   : > { %2239 = vmatpush3.msra.mxu0 %v1486_v35  ;;  %2229 = vmatprep.mubr.msk.f32.mxu0 %vm332_vm0, %v2919_v10 }
  0x9e   : > { %2166 = vmatmul.mubr.msk.f32.gmra.mrb[6].mxu1 %vm332_vm0, %v598_v45 }
  0x9f   : > { %2230 = vmatmul.mubr.msk.f32.gmra.mrb[2].mxu0 %vm332_vm0, %v2923_v13  ;;  %2170 = vmatprep.mubr.msk.f32.mxu1 %vm332_vm0, %v1940_v46 }
  0xa0   : > { %2232 = vmatprep.mubr.msk.f32.mxu0 %vm332_vm0, %v2935_v16 }
  0xa2   : > { %2171 = vmatmul.mubr.msk.f32.vlgmr.msra.gmra.mrb[0].mxu1 %vm332_vm0, %v1941_v47 }
  0xa3   : > { %2233 = vmatmul.mubr.msk.f32.gmra.mrb[4].mxu0 %vm332_vm0, %v2940_v18  ;;  %2253 = vmatpush3.msra.mxu1 %v2899_v1  ;;  %v2036_v1 = vld [vmem:[#allocation7] ss:$0 sm:$0xff] }
  0xa4   : > { %2173 = vmatprep.mubr.msk.f32.mxu1 %vm332_vm0, %v1942_v48  ;;  %2235 = vmatprep.mubr.msk.f32.mxu0 %vm332_vm0, %v2949_v21 }
  0xa6   : > { %2174 = vmatmul.mubr.msk.f32.gmra.mrb[2].mxu1 %vm332_vm0, %v1943_v49 }
  0xa7   : > { %2236 = vmatmul.mubr.msk.f32.gmra.mrb[6].mxu0 %vm332_vm0, %v2011_v50  ;;  %2176 = vmatprep.mubr.msk.f32.mxu1 %vm332_vm0, %v1944_v51 }
  0xa8   : > { %2240 = vmatprep.mubr.msk.f32.mxu0 %vm332_vm0, %v592_v38 }
  0xaa   : > { %2177 = vmatmul.mubr.msk.f32.gmra.mrb[4].mxu1 %vm332_vm0, %v1945_v52 }
  0xab   : > { %2241 = vmatmul.mubr.msk.f32.vlgmr.msra.gmra.mrb[0].mxu0 %vm332_vm0, %v593_v39  ;;  %2179 = vmatprep.mubr.msk.f32.mxu1 %vm332_vm0, %v1946_v53 }
  0xac   : > { %2243 = vmatprep.mubr.msk.f32.mxu0 %vm332_vm0, %v594_v40 }
  0xae   : > { %2180 = vmatmul.mubr.msk.f32.gmra.mrb[6].mxu1 %vm332_vm0, %v1947_v54 }
  0xaf   : > { %2244 = vmatmul.mubr.msk.f32.gmra.mrb[2].mxu0 %vm332_vm0, %v595_v42  ;;  %2190 = vmatprep.mubr.msk.f32.mxu1 %vm332_vm0, %v1960_v55 }
  0xb0   : > { %2246 = vmatprep.mubr.msk.f32.mxu0 %vm332_vm0, %v596_v43 }
  0xb2   : > { %2191 = vmatmul.mubr.msk.f32.vlgmr.msra.gmra.mrb[4].mxu1 %vm332_vm0, %v1961_v56 }
  0xb3   : > { %2247 = vmatmul.mubr.msk.f32.gmra.mrb[4].mxu0 %vm332_vm0, %v597_v44  ;;  %2193 = vmatprep.mubr.msk.f32.mxu1 %vm332_vm0, %v1962_v57 }
  0xb4   : > { %2249 = vmatprep.mubr.msk.f32.mxu0 %vm332_vm0, %v598_v45 }
  0xb6   : > { %2194 = vmatmul.mubr.msk.f32.gmra.mrb[6].mxu1 %vm332_vm0, %v1963_v58 }
  0xb7   : > { %2250 = vmatmul.mubr.msk.f32.gmra.mrb[6].mxu0 %vm332_vm0, %v2027_v59 }
 0x175   : > { %v2172_v61 = vpop.f32.mrb[0].mxu1 }
 0x176   : > { %v839_v62 = vpop.f32.mrb[1].mxu1 }
 0x179   : > { %v2175_v63 = vpop.f32.mrb[2].mxu1 }
 0x17a   : > { %v849_v0 = vpop.f32.mrb[3].mxu1 }
 0x17e   : > { %v2242_v2 = vpop.f32.mrb[0].mxu0 }
 0x17f   : > { %v2254_v3 = vadd.f32 %v2242_v2, %v2172_v61  ;;  %v1577_v4 = vpop.f32.mrb[1].mxu0 }
 0x180   : > { %v2255_v5 = vadd.f32 %v1577_v4, %v839_v62 }
 0x181   : > { %v1631_v6 = vadd.f32 %v2254_v3, %v2036_v1  ;;  %v1661_v7 = vmul.f32 %v2254_v3, %v2254_v3 }
 0x182   : > { %v1630_v8 = vadd.f32 %v2255_v5, %v2036_v1  ;;  %v1646_v9 = vadd.f32 %v2255_v5, %v2254_v3  ;;  %v1660_v10 = vmul.f32 %v2255_v5, %v2255_v5  ;;  %v2245_v11 = vpop.f32.mrb[2].mxu0 }
 0x183   : > { %1639 = vst [vmem:[%s3065_s15 + $0x8] sm:$0xff] %v1631_v6  ;;  %v2256_v12 = vadd.f32 %v2245_v11, %v2175_v63  ;;  %v1587_v13 = vpop.f32.mrb[3].mxu0 }
 0x184   : > { %1638 = vst [vmem:[%s3065_s15] sm:$0xff] %v1630_v8  ;;  %v1668_v14 = vadd.f32 %v1661_v7, %v1660_v10  ;;  %v2257_v15 = vadd.f32 %v1587_v13, %v849_v0 }
 0x185   : > { %v1633_v16 = vadd.f32 %v2256_v12, %v2036_v1  ;;  %v2192_v17 = vpop.f32.mrb[4].mxu1  ;;  %v1663_v25 = vmul.f32 %v2256_v12, %v2256_v12 }
 0x186   : > { %v1632_v18 = vadd.f32 %v2257_v15, %v2036_v1  ;;  %v1647_v19 = vadd.f32 %v2257_v15, %v1646_v9  ;;  %v1662_v20 = vmul.f32 %v2257_v15, %v2257_v15  ;;  %v2248_v21 = vpop.f32.mrb[4].mxu0  ;;  %v1007_v22 = vpop.f32.mrb[5].mxu1 }
 0x187   : > { %1641 = vst [vmem:[%s3065_s15 + $0x18] sm:$0xff] %v1633_v16  ;;  %v2258_v23 = vadd.f32 %v2248_v21, %v2192_v17  ;;  %v1597_v24 = vpop.f32.mrb[5].mxu0 }
 0x188   : > { %1640 = vst [vmem:[%s3065_s15 + $0x10] sm:$0xff] %v1632_v18  ;;  %v1669_v26 = vadd.f32 %v1668_v14, %v1662_v20  ;;  %v2259_v27 = vadd.f32 %v1597_v24, %v1007_v22  ;;  %v1648_v28 = vadd.f32 %v2256_v12, %v1647_v19 }
 0x189   : > { %v1635_v29 = vadd.f32 %v2258_v23, %v2036_v1  ;;  %v2195_v30 = vpop.f32.mrb[6].mxu1  ;;  %v1665_v39 = vmul.f32 %v2258_v23, %v2258_v23 }
 0x18a   : > { %v1634_v31 = vadd.f32 %v2259_v27, %v2036_v1  ;;  %v1649_v32 = vadd.f32 %v2259_v27, %v1648_v28  ;;  %v1664_v33 = vmul.f32 %v2259_v27, %v2259_v27  ;;  %v1670_v34 = vadd.f32 %v1669_v26, %v1663_v25  ;;  %v2251_v35 = vpop.f32.mrb[6].mxu0  ;;  %v1017_v36 = vpop.f32.mrb[7].mxu1 }
 0x18b   : > { %1643 = vst [vmem:[%s3065_s15 + $0x28] sm:$0xff] %v1635_v29  ;;  %v2260_v37 = vadd.f32 %v2251_v35, %v2195_v30  ;;  %v1607_v38 = vpop.f32.mrb[7].mxu0 }
 0x18c   : > { %1642 = vst [vmem:[%s3065_s15 + $0x20] sm:$0xff] %v1634_v31  ;;  %v1671_v40 = vadd.f32 %v1670_v34, %v1664_v33  ;;  %v2261_v41 = vadd.f32 %v1607_v38, %v1017_v36  ;;  %v1650_v42 = vadd.f32 %v2258_v23, %v1649_v32 }
 0x18d   : > { %v1637_v43 = vadd.f32 %v2260_v37, %v2036_v1  ;;  %v1667_v48 = vmul.f32 %v2260_v37, %v2260_v37 }
 0x18e   : > { %v1636_v44 = vadd.f32 %v2261_v41, %v2036_v1  ;;  %v1651_v45 = vadd.f32 %v2261_v41, %v1650_v42  ;;  %v1666_v46 = vmul.f32 %v2261_v41, %v2261_v41  ;;  %v1672_v47 = vadd.f32 %v1671_v40, %v1665_v39 }
 0x18f   : > { %1645 = vst [vmem:[%s3065_s15 + $0x38] sm:$0xff] %v1637_v43 }
 0x190   : > { %1644 = vst [vmem:[%s3065_s15 + $0x30] sm:$0xff] %v1636_v44  ;;  %v1652_v49 = vadd.f32 %v2260_v37, %v1651_v45  ;;  %v1673_v50 = vadd.f32 %v1672_v47, %v1666_v46 }
 0x191   : > { %2518 = shalt.err (!%p2515_p2)
}
 0x192   : > { %s2519_s15 = scalar_lea.hbm %s3078_s29, 1024  ;;  %s2523_s25 = scalar_lea.hbm %s3204_s3, 2048 }
 0x193   : > { %p2520_p6 = scmp.ne.s32.totalorder %s3078_s29, %s2519_s15  ;;  %p2524_p4 = scmp.lt.u32.totalorder %s3078_s29, %s3204_s3 }
 0x194   : > { %p2525_p9 = scmp.lt.u32.totalorder %s2523_s25, %s2519_s15  ;;  %p2527_p11 = scmp.lt.u32.totalorder %s2519_s15, %s3078_s29 }
 0x195   : > { %p2521_p10 = pnand %p2520_p6, %p3225_p1 }
 0x196   : > { %p2526_p8 = por %p2525_p9, %p2524_p4 }
 0x197   : > { %p2522_p3 = pneg %p2521_p10 }
 0x198   : > { %p2528_p13 = por %p2527_p11, %p2526_p8 }
 0x19a   : > { %p2529_p5 = pnand %p2528_p13, %p2522_p3 }
 0x19c   : > { %2532 = shalt.err (!%p2529_p5)
}
 0x19d   : > { %s2660_s7 = smov 128   ;;  %s2661_s17 = smov 8   ;;  %v1653_v51 = vrot.slane %v1652_v49, 4  ;;  %v1674_v52 = vadd.f32 %v1673_v50, %v1667_v48  ;;  %v1682_v61 = vld [vmem:[%s3057_s26] sm:$0x1] }
 0x19e   : > { %2331 = dma.vmem_to_hbm [thread:$0]  (%p3225_p1), %s3080_s13, 1024, %s3078_s29, %s1689_s8, %s2660_s7, %s2660_s7, %s2661_s17  }
 0x19f   : > { %v1654_v53 = vadd.f32 %v1653_v51, %v1652_v49  ;;  %v1675_v54 = vrot.slane %v1674_v52, 4  ;;  %s1693_s15 = sand.u32 1, %s2725_s24   ;;  %s2040_s9 = sshll.u32 %s2643_s21, 4  ;;  %v1685_v0 = vld [vmem:[%s3061_s28] sm:$0x1] }
 0x1a0   : > { %s1728_s12 = sshll.u32 %s3057_s26, 4  ;;  %s1741_s30 = sshll.u32 %s3061_s28, 4  ;;  %s3119_s12 = int_to_ptr.vmem [resolvable:$true] %s1728_s12  ;;  %s3127_s30 = int_to_ptr.vmem [resolvable:$true] %s1741_s30 }
 0x1a1   : > { %v1655_v55 = vrot.slane %v1654_v53, 2  ;;  %v1676_v56 = vadd.f32 %v1675_v54, %v1674_v52  ;;  %s3117_s8 = scalar_lea.hbm %s3205_s4, %s2040_s9  ;;  %s3125_s25 = scalar_lea.hbm %s3206_s5, %s2040_s9 }
 0x1a2   : > { %s3129_s14 = scalar_lea.sflag [#allocation10], %s1693_s15  ;;  %s2533_s10 = scalar_lea.vmem %s3119_s12, 16 }
 0x1a3   : > { %v1656_v57 = vadd.f32 %v1655_v55, %v1654_v53  ;;  %v1677_v58 = vrot.slane %v1676_v56, 2  ;;  %p2534_p7 = scmp.ne.s32.totalorder %s3119_s12, %s2533_s10  ;;  %s2662_s7 = smov [#allocation9]  }
 0x1a4   : > { %s2537_s17 = sshll.u32 %s2662_s7, 4  ;;  %s2538_s17 = int_to_ptr.vmem [resolvable:$false] %s2537_s17 }
 0x1a5   : > { %v1657_v59 = vrot.slane %v1656_v57, 1  ;;  %v1678_v60 = vadd.f32 %v1677_v58, %v1676_v56  ;;  %p2535_p12 = pnand %p2534_p7, %p3225_p1  ;;  %s2539_s13 = scalar_lea.vmem %s2538_s17, 32 }
 0x1a6   : > { %p2540_p2 = scmp.lt.s32.totalorder %s3119_s12, %s2538_s17  ;;  %p2541_p6 = scmp.lt.s32.totalorder %s2539_s13, %s2533_s10 }
 0x1a7   : > { %v1658_v62 = vadd.f32 %v1657_v59, %v1656_v57  ;;  %v1679_v63 = vrot.slane %v1678_v60, 1  ;;  %p2536_p0 = pneg %p2535_p12 }
 0x1a8   : > { %p2542_p10 = por %p2541_p6, %p2540_p2 }
 0x1a9   : > { %v1680_v1 = vadd.f32 %v1679_v63, %v1678_v60  ;;  %v1683_v2 = vadd.f32 %v1682_v61, %v1658_v62 }
 0x1aa   : > { %p2543_p3 = pnand %p2542_p10, %p2536_p0 }
 0x1ab   : > { %1684 = vst [vmem:[%s3057_s26] sm:$0x1] %v1683_v2  ;;  %v1686_v3 = vadd.f32 %v1685_v0, %v1680_v1 }
 0x1ac   : > { %2546 = shalt.err (!%p2543_p3)
}
 0x1ad   : > { %s2547_s26 = scalar_lea.hbm %s3117_s8, 16  ;;  %s2551_s29 = scalar_lea.hbm %s3205_s4, 32 }
 0x1ae   : > { %p2548_p4 = scmp.ne.s32.totalorder %s3117_s8, %s2547_s26  ;;  %p2552_p11 = scmp.lt.u32.totalorder %s3117_s8, %s3205_s4 }
 0x1af   : > { %p2553_p13 = scmp.lt.u32.totalorder %s2551_s29, %s2547_s26  ;;  %p2555_p7 = scmp.lt.u32.totalorder %s2547_s26, %s3117_s8 }
 0x1b0   : > { %p2549_p9 = pnand %p2548_p4, %p3225_p1 }
 0x1b1   : > { %p2554_p5 = por %p2553_p13, %p2552_p11 }
 0x1b2   : > { %p2550_p8 = pneg %p2549_p9 }
 0x1b3   : > { %p2556_p12 = por %p2555_p7, %p2554_p5 }
 0x1b5   : > { %p2557_p0 = pnand %p2556_p12, %p2550_p8 }
 0x1b7   : > { %2560 = shalt.err (!%p2557_p0)
}
 0x1b8   : > { %2332 = dma.vmem_to_hbm [thread:$0]  (%p3225_p1), %s3119_s12, 16, %s3117_s8, %s3129_s14   ;;  %1687 = vst [vmem:[%s3061_s28] sm:$0x1] %v1686_v3 }
 0x1b9   : > { %s2561_s10 = scalar_lea.vmem %s3127_s30, 16  ;;  %s2663_s7 = smov [#allocation11]  }
 0x1ba   : > { %p2562_p2 = scmp.ne.s32.totalorder %s3127_s30, %s2561_s10  ;;  %s2565_s17 = sshll.u32 %s2663_s7, 4  ;;  %s2566_s17 = int_to_ptr.vmem [resolvable:$false] %s2565_s17 }
 0x1bb   : > { %s2567_s13 = scalar_lea.vmem %s2566_s17, 32  ;;  %p2568_p3 = scmp.lt.s32.totalorder %s3127_s30, %s2566_s17 }
 0x1bc   : > { %p2563_p6 = pnand %p2562_p2, %p3225_p1  ;;  %p2569_p4 = scmp.lt.s32.totalorder %s2567_s13, %s2561_s10 }
 0x1be   : > { %p2564_p10 = pneg %p2563_p6  ;;  %p2570_p9 = por %p2569_p4, %p2568_p3 }
 0x1c0   : > { %p2571_p8 = pnand %p2570_p9, %p2564_p10 }
 0x1c2   : > { %2574 = shalt.err (!%p2571_p8)
}
 0x1c3   : > { %s2575_s28 = scalar_lea.hbm %s3125_s25, 16  ;;  %s2579_s26 = scalar_lea.hbm %s3206_s5, 32 }
 0x1c4   : > { %p2576_p11 = scmp.ne.s32.totalorder %s3125_s25, %s2575_s28  ;;  %p2580_p7 = scmp.lt.u32.totalorder %s3125_s25, %s3206_s5 }
 0x1c5   : > { %p2581_p12 = scmp.lt.u32.totalorder %s2579_s26, %s2575_s28  ;;  %p2583_p2 = scmp.lt.u32.totalorder %s2575_s28, %s3125_s25 }
 0x1c6   : > { %p2577_p13 = pnand %p2576_p11, %p3225_p1 }
 0x1c7   : > { %p2582_p0 = por %p2581_p12, %p2580_p7 }
 0x1c8   : > { %p2578_p5 = pneg %p2577_p13 }
 0x1c9   : > { %p2584_p6 = por %p2583_p2, %p2582_p0 }
 0x1cb   : > { %p2585_p10 = pnand %p2584_p6, %p2578_p5 }
 0x1cd   : > { %2588 = shalt.err (!%p2585_p10)
}
 0x1ce   : > { %2333 = dma.vmem_to_hbm [thread:$0]  (%p3225_p1), %s3127_s30, 16, %s3125_s25, %s3129_s14  }
 0x1cf PF: > { %s1753_s29 = sand.u32 1, %s2631_s18   ;;  %p3226_p3 = scmp.ne.s32.totalorder %s3214_s27, 0 }
 0x1d0   : > { %p3227_p4 = scmp.ge.s32.totalorder %s2651_s23, 2  ;;  %s1754_s21 = scalar_lea.sflag [#allocation4], %s1753_s29 }
 0x1d2   : > { %p2349_p9 = pnand %p3227_p4, %p3226_p3 }
 0x1d4   : > { %2622 = dma.done.wait (!%p2349_p9), %s1754_s21, 1024  }
 0x1d5   : > { %2624 = vsyncadd (!%p2349_p9), %s1754_s21, 4294966272  ;;  %s3228_s24 = sadd.s32 4294967294, %s2651_s23  }
 0x1d6   : > { %s1762_s10 = sand.u32 1, %s3228_s24  }
 0x1d7   : > { %s1763_s7 = scalar_lea.sflag [#allocation10], %s1762_s10 }
 0x1d8   : > { %2626 = dma.done.wait (!%p2349_p9), %s1763_s7, 32  }
 0x1d9   : > { %2628 = vsyncadd (!%p2349_p9), %s1763_s7, 4294967264  ;;  %s26_s23 = sadd.s32 1, %s2651_s23   ;;  %s3229_s18 = smov %s2635_s19 }
 0x1da   : > { %p23_p1 = scmp.ge.s32.totalorder %s26_s23, 4   ;;  %s3230_s19 = smov %s2639_s20 }
 0x1db   : > { %s3231_s20 = smov %s2841_s16  ;;  %s3232_s21 = smov %s2647_s22 }
 0x1dc   : > { %s3233_s22 = smov %s3235_s11  ;;  %25 = sbr.rel (!%p23_p1) target bundleno = 9 (0x9), region = 134 }
 0x1e3   :  { %1775 = vsyncpa [#allocation3], 1 }
 0x1e4   :  { %1777 = vsyncpa [#allocation3 + $0x1], 1 }
 0x1e5   :  { %1778 = vsyncpa [#allocation6], 1 }
 0x1e6   :  { %1779 = vsyncpa [#allocation4], 1 }
 0x1e7   :  { %1781 = vsyncpa [#allocation4 + $0x1], 1 }
 0x1e8   :  { %1782 = vsyncpa [#allocation10], 1 }
 0x1e9   :  { %1784 = vsyncpa [#allocation10 + $0x1], 1 }

// kernel: residual_block_forward.15
= control target key start
LH: loop header
LB: loop body
LE: loop exit
PB: predicated region body
PF: predicated region fallthrough
CT: control target
= control target key end

     0   :  { %11 = vsyncpa [#allocation3], 0  ;;  %s676_s0 = inlined_call_operand.hbm [shape: f32[128,128], index: 0, kind: input, shape index: {}]   ;;  %s677_s1 = inlined_call_operand.hbm [shape: f32[1,128], index: 1, kind: input, shape index: {}]   ;;  %s678_s2 = inlined_call_operand.hbm [shape: f32[1,128], index: 2, kind: input, shape index: {}]   ;;  %s679_s3 = inlined_call_operand.hbm [shape: f32[128,128], index: 3, kind: input, shape index: {}]   ;;  %s680_s4 = inlined_call_operand.hbm [shape: f32[1,128], index: 4, kind: input, shape index: {}]   ;;  %s681_s5 = inlined_call_operand.hbm [shape: f32[1,128], index: 5, kind: input, shape index: {}]   ;;  %s682_s6 = inlined_call_operand.hbm [shape: f32[128,128], index: 6, kind: output, shape index: {}]  }
   0x1   :  { %12 = vsyncpa [#allocation6], 0 }
   0x2   :  { %13 = vsyncpa [#allocation9], 0 }
   0x3   :  { %14 = vsyncpa [#allocation12], 0 }
   0x4   :  { %15 = vsyncpa [#allocation4], 0  ;;  %s467_s21 = smov [#allocation5]   ;;  %s303_s25 = scalar_lea.hbm %s677_s1, 16 }
   0x5   :  { %s34_s22 = sshll.u32 %s467_s21, 4  ;;  %p304_p0 = scmp.ne.s32.totalorder %s677_s1, %s303_s25  ;;  %s35_s22 = int_to_ptr.vmem [resolvable:$true] %s34_s22 }
   0x6   :  { %p307_p1 = scmp.lt.u32.totalorder %s303_s25, %s677_s1 }
   0x8   :  { %p309_p2 = pnand %p307_p1, %p304_p0 }
   0xa   :  { %312 = shalt.err (!%p309_p2)
}
   0xb   :  { %s313_s30 = scalar_lea.vmem %s35_s22, 16  ;;  %s317_s7 = scalar_lea.vmem %s35_s22, 32 }
   0xc   :  { %p314_p3 = scmp.ne.s32.totalorder %s35_s22, %s313_s30  ;;  %p318_p4 = scmp.lt.s32.totalorder %s35_s22, %s35_s22 }
   0xd   :  { %p319_p5 = scmp.lt.s32.totalorder %s317_s7, %s313_s30 }
   0xf   :  { %p320_p6 = por %p319_p5, %p318_p4 }
  0x11   :  { %p321_p7 = pnand %p320_p6, %p314_p3 }
  0x13   :  { %324 = shalt.err (!%p321_p7)
}
  0x14   :  { %37 = dma.hbm_to_vmem [thread:$0]  %s677_s1, 16, %s35_s22, [#allocation6]  }
  0x15   :  { %s468_s10 = smov [#allocation8]   ;;  %s469_s12 = smov [#allocation2]  }
  0x16   :  { %s53_s11 = sshll.u32 %s468_s10, 4  ;;  %s21_s13 = sshll.u32 %s469_s12, 4  ;;  %s54_s11 = int_to_ptr.vmem [resolvable:$true] %s53_s11  ;;  %s22_s13 = int_to_ptr.vmem [resolvable:$true] %s21_s13 }
  0x17   :  { %s325_s16 = scalar_lea.hbm %s679_s3, 2048 }
  0x18   :  { %p326_p8 = scmp.ne.s32.totalorder %s679_s3, %s325_s16  ;;  %p329_p9 = scmp.lt.u32.totalorder %s325_s16, %s679_s3 }
  0x1a   :  { %p331_p10 = pnand %p329_p9, %p326_p8 }
  0x1c   :  { %334 = shalt.err (!%p331_p10)
}
  0x1d   :  { %s335_s1 = scalar_lea.vmem %s54_s11, 2048  ;;  %p340_p12 = scmp.lt.s32.totalorder %s54_s11, %s54_s11 }
  0x1e   :  { %p336_p11 = scmp.ne.s32.totalorder %s54_s11, %s335_s1  ;;  %p341_p13 = scmp.lt.s32.totalorder %s335_s1, %s335_s1 }
  0x20   :  { %p342_p0 = por %p341_p13, %p340_p12 }
  0x22   :  { %p343_p1 = pnand %p342_p0, %p336_p11 }
  0x24   :  { %346 = shalt.err (!%p343_p1)
}
  0x25   :  { %s470_s21 = smov 128   ;;  %s471_s22 = smov 8  }
  0x26   :  { %59 = dma.hbm_to_vmem [thread:$0]  %s679_s3, 2048, %s54_s11, [#allocation9], %s470_s21, %s470_s21, %s471_s22  }
  0x27   :  { %s347_s27 = scalar_lea.hbm %s676_s0, 2048 }
  0x28   :  { %p348_p2 = scmp.ne.s32.totalorder %s676_s0, %s347_s27  ;;  %p351_p3 = scmp.lt.u32.totalorder %s347_s27, %s676_s0 }
  0x2a   :  { %p353_p4 = pnand %p351_p3, %p348_p2 }
  0x2c   :  { %356 = shalt.err (!%p353_p4)
}
  0x2d   :  { %s357_s8 = scalar_lea.vmem %s22_s13, 2048  ;;  %p362_p6 = scmp.lt.s32.totalorder %s22_s13, %s22_s13 }
  0x2e   :  { %p358_p5 = scmp.ne.s32.totalorder %s22_s13, %s357_s8  ;;  %p363_p7 = scmp.lt.s32.totalorder %s357_s8, %s357_s8 }
  0x30   :  { %p364_p8 = por %p363_p7, %p362_p6 }
  0x32   :  { %p365_p9 = pnand %p364_p8, %p358_p5 }
  0x34   :  { %368 = shalt.err (!%p365_p9)
}
  0x35   :  { %27 = dma.hbm_to_vmem [thread:$0]  %s676_s0, 2048, %s22_s13, [#allocation3], %s470_s21, %s470_s21, %s471_s22  }
  0x36   :  { %s472_s10 = smov [#allocation7]   ;;  %s473_s12 = smov [#allocation10]  }
  0x37   :  { %s44_s11 = sshll.u32 %s472_s10, 4  ;;  %s66_s14 = sshll.u32 %s473_s12, 4  ;;  %s45_s11 = int_to_ptr.vmem [resolvable:$true] %s44_s11  ;;  %s67_s14 = int_to_ptr.vmem [resolvable:$true] %s66_s14 }
  0x38   :  { %s369_s17 = scalar_lea.hbm %s678_s2, 16 }
  0x39   :  { %p370_p10 = scmp.ne.s32.totalorder %s678_s2, %s369_s17  ;;  %p373_p11 = scmp.lt.u32.totalorder %s369_s17, %s678_s2 }
  0x3b   :  { %p375_p12 = pnand %p373_p11, %p370_p10 }
  0x3d   :  { %378 = shalt.err (!%p375_p12)
}
  0x3e   :  { %s379_s0 = scalar_lea.vmem %s45_s11, 16  ;;  %s383_s13 = scalar_lea.vmem %s45_s11, 32 }
  0x3f   :  { %p380_p13 = scmp.ne.s32.totalorder %s45_s11, %s379_s0  ;;  %p384_p0 = scmp.lt.s32.totalorder %s45_s11, %s45_s11 }
  0x40   :  { %p385_p1 = scmp.lt.s32.totalorder %s383_s13, %s379_s0 }
  0x42   :  { %p386_p2 = por %p385_p1, %p384_p0 }
  0x44   :  { %p387_p3 = pnand %p386_p2, %p380_p13 }
  0x46   :  { %390 = shalt.err (!%p387_p3)
}
  0x47   :  { %47 = dma.hbm_to_vmem [thread:$0]  %s678_s2, 16, %s45_s11, [#allocation6]  }
  0x48   :  { %s391_s27 = scalar_lea.hbm %s680_s4, 16 }
  0x49   :  { %p392_p4 = scmp.ne.s32.totalorder %s680_s4, %s391_s27  ;;  %p395_p5 = scmp.lt.u32.totalorder %s391_s27, %s680_s4 }
  0x4b   :  { %p397_p6 = pnand %p395_p5, %p392_p4 }
  0x4d   :  { %400 = shalt.err (!%p397_p6)
}
  0x4e   :  { %s401_s8 = scalar_lea.vmem %s67_s14, 16  ;;  %s405_s3 = scalar_lea.vmem %s67_s14, 32 }
  0x4f   :  { %p402_p7 = scmp.ne.s32.totalorder %s67_s14, %s401_s8  ;;  %p406_p8 = scmp.lt.s32.totalorder %s67_s14, %s67_s14 }
  0x50   :  { %p407_p9 = scmp.lt.s32.totalorder %s405_s3, %s401_s8 }
  0x52   :  { %p408_p10 = por %p407_p9, %p406_p8 }
  0x54   :  { %p409_p11 = pnand %p408_p10, %p402_p7 }
  0x56   :  { %412 = shalt.err (!%p409_p11)
}
  0x57   :  { %69 = dma.hbm_to_vmem [thread:$0]  %s680_s4, 16, %s67_s14, [#allocation9]  }
  0x58   :  { %s474_s10 = smov [#allocation11]   ;;  %s413_s16 = scalar_lea.hbm %s681_s5, 16 }
  0x59   :  { %s76_s11 = sshll.u32 %s474_s10, 4  ;;  %p414_p12 = scmp.ne.s32.totalorder %s681_s5, %s413_s16  ;;  %s77_s11 = int_to_ptr.vmem [resolvable:$true] %s76_s11 }
  0x5a   :  { %p417_p13 = scmp.lt.u32.totalorder %s413_s16, %s681_s5 }
  0x5c   :  { %p419_p0 = pnand %p417_p13, %p414_p12 }
  0x5e   :  { %422 = shalt.err (!%p419_p0)
}
  0x5f   :  { %s423_s1 = scalar_lea.vmem %s77_s11, 16  ;;  %s427_s4 = scalar_lea.vmem %s77_s11, 32 }
  0x60   :  { %p424_p1 = scmp.ne.s32.totalorder %s77_s11, %s423_s1  ;;  %p428_p2 = scmp.lt.s32.totalorder %s77_s11, %s77_s11 }
  0x61   :  { %p429_p3 = scmp.lt.s32.totalorder %s427_s4, %s423_s1 }
  0x63   :  { %p430_p4 = por %p429_p3, %p428_p2 }
  0x65   :  { %p431_p5 = pnand %p430_p4, %p424_p1 }
  0x67   :  { %434 = shalt.err (!%p431_p5)
}
  0x68   :  { %79 = dma.hbm_to_vmem [thread:$0]  %s681_s5, 16, %s77_s11, [#allocation12]  }
  0x69   :  { %457 = dma.done.wait [#allocation3], 2048  }
  0x6a   :  { %458 = vsyncadd [#allocation3], 4294965248 }
  0x6b   :  { %459 = dma.done.wait [#allocation6], 32  }
  0x6c   :  { %460 = vsyncadd [#allocation6], 4294967264 }
  0x6d   :  { %461 = dma.done.wait [#allocation9], 2064  }
  0x6e   :  { %462 = vsyncadd [#allocation9], 4294965232 }
  0x6f   :  { %463 = dma.done.wait [#allocation12], 16  }
  0x70   :  { %464 = vsyncadd [#allocation12], 4294967280  ;;  %v98_v0 = vld [vmem:[#allocation2] sm:$0xff]  ;;  %v99_v8 = vld [vmem:[#allocation2 + $0x8] sm:$0xff]  ;;  %s475_s5 = smov [#allocation13]  }
  0x71   :  { %v589_v1 = vld [vmem:[#allocation5] ss:$0 sm:$0xff]  ;;  %v591_v2 = vld [vmem:[#allocation7] ss:$0 sm:$0xff]  ;;  %v160_v4 = vld [vmem:[#allocation8] sm:$0xff]  ;;  %s275_s13 = sshll.u32 %s475_s5, 4  ;;  %s276_s13 = int_to_ptr.vmem [resolvable:$true] %s275_s13 }
  0x72   :  { %v121_v3 = vmul.f32 %v589_v1, %v98_v0  ;;  %v594_v5 = vld [vmem:[#allocation10] ss:$0 sm:$0xff]  ;;  %v596_v6 = vld [vmem:[#allocation11] ss:$0 sm:$0xff]  ;;  %v161_v9 = vld [vmem:[#allocation8 + $0x8] sm:$0xff]  ;;  %v122_v12 = vmul.f32 %v589_v1, %v99_v8  ;;  %s435_s23 = scalar_lea.vmem %s276_s13, 2048  ;;  %p440_p7 = scmp.lt.s32.totalorder %s276_s13, %s276_s13 }
  0x73   :  { %v183_v7 = vmul.f32 %v594_v5, %v160_v4  ;;  %v100_v10 = vld [vmem:[#allocation2 + $0x10] sm:$0xff]  ;;  %v184_v13 = vmul.f32 %v594_v5, %v161_v9  ;;  %v101_v16 = vld [vmem:[#allocation2 + $0x18] sm:$0xff]  ;;  %v102_v22 = vld [vmem:[#allocation2 + $0x20] sm:$0xff]  ;;  %p436_p6 = scmp.ne.s32.totalorder %s276_s13, %s435_s23  ;;  %p441_p8 = scmp.lt.s32.totalorder %s435_s23, %s435_s23 }
  0x74   :  { %v144_v11 = vadd.f32 %v591_v2, %v121_v3  ;;  %v123_v14 = vmul.f32 %v589_v1, %v100_v10  ;;  %v162_v15 = vld [vmem:[#allocation8 + $0x10] sm:$0xff]  ;;  %v163_v17 = vld [vmem:[#allocation8 + $0x18] sm:$0xff]  ;;  %v124_v20 = vmul.f32 %v589_v1, %v101_v16  ;;  %v164_v23 = vld [vmem:[#allocation8 + $0x20] sm:$0xff]  ;;  %v145_v25 = vadd.f32 %v591_v2, %v122_v12 }
  0x75   :  { %v206_v18 = vadd.f32 %v596_v6, %v183_v7  ;;  %v185_v19 = vmul.f32 %v594_v5, %v162_v15  ;;  %v186_v21 = vmul.f32 %v594_v5, %v163_v17  ;;  %v103_v24 = vld [vmem:[#allocation2 + $0x28] sm:$0xff]  ;;  %v207_v26 = vadd.f32 %v596_v6, %v184_v13  ;;  %v104_v34 = vld [vmem:[#allocation2 + $0x30] sm:$0xff]  ;;  %v105_v44 = vld [vmem:[#allocation2 + $0x38] sm:$0xff]  ;;  %p442_p9 = por %p441_p8, %p440_p7 }
  0x76   :  { %v146_v27 = vadd.f32 %v591_v2, %v123_v14  ;;  %v125_v28 = vmul.f32 %v589_v1, %v102_v22  ;;  %v165_v29 = vld [vmem:[#allocation8 + $0x28] sm:$0xff]  ;;  %v147_v32 = vadd.f32 %v591_v2, %v124_v20  ;;  %v187_v37 = vmul.f32 %v594_v5, %v164_v23  ;;  %v166_v39 = vld [vmem:[#allocation8 + $0x30] sm:$0xff]  ;;  %v167_v45 = vld [vmem:[#allocation8 + $0x38] sm:$0xff] }
  0x77   :  { %v222_v30 = vadd.f32 %v206_v18, %v144_v11  ;;  %v208_v31 = vadd.f32 %v596_v6, %v185_v19  ;;  %v209_v33 = vadd.f32 %v596_v6, %v186_v21  ;;  %v223_v35 = vadd.f32 %v207_v26, %v145_v25  ;;  %v106_v50 = vld [vmem:[#allocation2 + $0x40] sm:$0xff]  ;;  %v107_v56 = vld [vmem:[#allocation2 + $0x48] sm:$0xff]  ;;  %v108_v4 = vld [vmem:[#allocation2 + $0x50] sm:$0xff]  ;;  %p443_p10 = pnand %p442_p9, %p436_p6 }
  0x78   :  { %v148_v36 = vadd.f32 %v591_v2, %v125_v28  ;;  %v126_v38 = vmul.f32 %v589_v1, %v103_v24  ;;  %v188_v43 = vmul.f32 %v594_v5, %v165_v29  ;;  %v210_v47 = vadd.f32 %v596_v6, %v187_v37  ;;  %v168_v51 = vld [vmem:[#allocation8 + $0x40] sm:$0xff]  ;;  %v169_v3 = vld [vmem:[#allocation8 + $0x48] sm:$0xff]  ;;  %v170_v11 = vld [vmem:[#allocation8 + $0x50] sm:$0xff] }
  0x79   :  { %v238_v40 = vmax.f32 %v222_v30, 0.0  ;;  %v224_v41 = vadd.f32 %v208_v31, %v146_v27  ;;  %v225_v42 = vadd.f32 %v209_v33, %v147_v32  ;;  %v239_v46 = vmax.f32 %v223_v35, 0.0  ;;  %v109_v12 = vld [vmem:[#allocation2 + $0x58] sm:$0xff]  ;;  %v110_v22 = vld [vmem:[#allocation2 + $0x60] sm:$0xff]  ;;  %v111_v28 = vld [vmem:[#allocation2 + $0x68] sm:$0xff] }
  0x7a   :  { %v149_v48 = vadd.f32 %v591_v2, %v126_v38  ;;  %v127_v49 = vmul.f32 %v589_v1, %v104_v34  ;;  %v211_v54 = vadd.f32 %v596_v6, %v188_v43  ;;  %v189_v55 = vmul.f32 %v594_v5, %v166_v39  ;;  %v171_v17 = vld [vmem:[#allocation8 + $0x58] sm:$0xff]  ;;  %v172_v27 = vld [vmem:[#allocation8 + $0x60] sm:$0xff]  ;;  %v173_v33 = vld [vmem:[#allocation8 + $0x68] sm:$0xff] }
  0x7b   :  { %254 = vst [vmem:[#allocation13] sm:$0xff] %v238_v40  ;;  %v240_v52 = vmax.f32 %v224_v41, 0.0  ;;  %v241_v53 = vmax.f32 %v225_v42, 0.0  ;;  %255 = vst [vmem:[#allocation13 + $0x8] sm:$0xff] %v239_v46  ;;  %v226_v57 = vadd.f32 %v210_v47, %v148_v36  ;;  %v128_v59 = vmul.f32 %v589_v1, %v105_v44  ;;  %v112_v34 = vld [vmem:[#allocation2 + $0x70] sm:$0xff] }
  0x7c   :  { %v150_v58 = vadd.f32 %v591_v2, %v127_v49  ;;  %v190_v60 = vmul.f32 %v594_v5, %v167_v45  ;;  %v227_v61 = vadd.f32 %v211_v54, %v149_v48  ;;  %v212_v62 = vadd.f32 %v596_v6, %v189_v55  ;;  %v174_v43 = vld [vmem:[#allocation8 + $0x70] sm:$0xff]  ;;  %v175_v49 = vld [vmem:[#allocation8 + $0x78] sm:$0xff] }
  0x7d   :  { %256 = vst [vmem:[#allocation13 + $0x10] sm:$0xff] %v240_v52  ;;  %257 = vst [vmem:[#allocation13 + $0x18] sm:$0xff] %v241_v53  ;;  %v129_v63 = vmul.f32 %v589_v1, %v106_v50  ;;  %v191_v0 = vmul.f32 %v594_v5, %v168_v51  ;;  %v242_v7 = vmax.f32 %v226_v57, 0.0  ;;  %v151_v8 = vadd.f32 %v591_v2, %v128_v59  ;;  %v113_v48 = vld [vmem:[#allocation2 + $0x78] sm:$0xff] }
  0x7e   :  { %v213_v9 = vadd.f32 %v596_v6, %v190_v60  ;;  %v130_v10 = vmul.f32 %v589_v1, %v107_v56  ;;  %v243_v13 = vmax.f32 %v227_v61, 0.0  ;;  %v228_v14 = vadd.f32 %v212_v62, %v150_v58 }
  0x7f   :  { %v152_v15 = vadd.f32 %v591_v2, %v129_v63  ;;  %v214_v16 = vadd.f32 %v596_v6, %v191_v0  ;;  %258 = vst [vmem:[#allocation13 + $0x20] sm:$0xff] %v242_v7  ;;  %v192_v20 = vmul.f32 %v594_v5, %v169_v3  ;;  %v131_v21 = vmul.f32 %v589_v1, %v108_v4 }
  0x80   :  { %v229_v18 = vadd.f32 %v213_v9, %v151_v8  ;;  %v153_v19 = vadd.f32 %v591_v2, %v130_v10  ;;  %259 = vst [vmem:[#allocation13 + $0x28] sm:$0xff] %v243_v13  ;;  %v244_v23 = vmax.f32 %v228_v14, 0.0  ;;  %v193_v25 = vmul.f32 %v594_v5, %v170_v11 }
  0x81   :  { %v230_v24 = vadd.f32 %v214_v16, %v152_v15  ;;  %v132_v26 = vmul.f32 %v589_v1, %v109_v12  ;;  %v215_v30 = vadd.f32 %v596_v6, %v192_v20  ;;  %v154_v31 = vadd.f32 %v591_v2, %v131_v21 }
  0x82   :  { %v245_v29 = vmax.f32 %v229_v18, 0.0  ;;  %v194_v32 = vmul.f32 %v594_v5, %v171_v17  ;;  %260 = vst [vmem:[#allocation13 + $0x30] sm:$0xff] %v244_v23  ;;  %v216_v36 = vadd.f32 %v596_v6, %v193_v25  ;;  %v133_v38 = vmul.f32 %v589_v1, %v110_v22 }
  0x83   :  { %v246_v35 = vmax.f32 %v230_v24, 0.0  ;;  %v155_v37 = vadd.f32 %v591_v2, %v132_v26  ;;  %v231_v39 = vadd.f32 %v215_v30, %v153_v19  ;;  %v195_v41 = vmul.f32 %v594_v5, %v172_v27 }
  0x84   :  { %261 = vst [vmem:[#allocation13 + $0x38] sm:$0xff] %v245_v29  ;;  %v217_v40 = vadd.f32 %v596_v6, %v194_v32  ;;  %v134_v42 = vmul.f32 %v589_v1, %v111_v28  ;;  %v232_v44 = vadd.f32 %v216_v36, %v154_v31  ;;  %v156_v45 = vadd.f32 %v591_v2, %v133_v38 }
  0x85   :  { %262 = vst [vmem:[#allocation13 + $0x40] sm:$0xff] %v246_v35  ;;  %v196_v46 = vmul.f32 %v594_v5, %v173_v33  ;;  %v135_v47 = vmul.f32 %v589_v1, %v112_v34  ;;  %v247_v50 = vmax.f32 %v231_v39, 0.0  ;;  %v218_v52 = vadd.f32 %v596_v6, %v195_v41 }
  0x86   :  { %v233_v51 = vadd.f32 %v217_v40, %v155_v37  ;;  %v157_v53 = vadd.f32 %v591_v2, %v134_v42  ;;  %v248_v54 = vmax.f32 %v232_v44, 0.0  ;;  %v197_v57 = vmul.f32 %v594_v5, %v174_v43 }
  0x87   :  { %v219_v55 = vadd.f32 %v596_v6, %v196_v46  ;;  %v158_v56 = vadd.f32 %v591_v2, %v135_v47  ;;  %263 = vst [vmem:[#allocation13 + $0x48] sm:$0xff] %v247_v50  ;;  %v234_v59 = vadd.f32 %v218_v52, %v156_v45  ;;  %v136_v60 = vmul.f32 %v589_v1, %v113_v48 }
  0x88   :  { %v249_v58 = vmax.f32 %v233_v51, 0.0  ;;  %v198_v61 = vmul.f32 %v594_v5, %v175_v49  ;;  %264 = vst [vmem:[#allocation13 + $0x50] sm:$0xff] %v248_v54  ;;  %v220_v63 = vadd.f32 %v596_v6, %v197_v57 }
  0x89   :  { %v235_v62 = vadd.f32 %v219_v55, %v157_v53  ;;  %v250_v0 = vmax.f32 %v234_v59, 0.0  ;;  %v159_v3 = vadd.f32 %v591_v2, %v136_v60 }
  0x8a   :  { %265 = vst [vmem:[#allocation13 + $0x58] sm:$0xff] %v249_v58  ;;  %v221_v4 = vadd.f32 %v596_v6, %v198_v61  ;;  %v236_v8 = vadd.f32 %v220_v63, %v158_v56 }
  0x8b   :  { %v251_v7 = vmax.f32 %v235_v62, 0.0  ;;  %266 = vst [vmem:[#allocation13 + $0x60] sm:$0xff] %v250_v0 }
  0x8c   :  { %v237_v9 = vadd.f32 %v221_v4, %v159_v3  ;;  %v252_v1 = vmax.f32 %v236_v8, 0.0 }
  0x8d   :  { %267 = vst [vmem:[#allocation13 + $0x68] sm:$0xff] %v251_v7 }
  0x8e   :  { %v253_v10 = vmax.f32 %v237_v9, 0.0  ;;  %268 = vst [vmem:[#allocation13 + $0x70] sm:$0xff] %v252_v1 }
  0x90   :  { %269 = vst [vmem:[#allocation13 + $0x78] sm:$0xff] %v253_v10 }
  0x91   :  { %446 = shalt.err (!%p443_p10)
}
  0x92   :  { %s447_s26 = scalar_lea.hbm %s682_s6, 2048 }
  0x93   :  { %p448_p11 = scmp.ne.s32.totalorder %s682_s6, %s447_s26  ;;  %p451_p12 = scmp.lt.u32.totalorder %s447_s26, %s682_s6 }
  0x95   :  { %p453_p13 = pnand %p451_p12, %p448_p11 }
  0x97   :  { %456 = shalt.err (!%p453_p13)
}
  0x98   :  { %281 = dma.vmem_to_hbm [thread:$0]  %s276_s13, 2048, %s682_s6, [#allocation4], %s470_s21, %s470_s21, %s471_s22  }
  0x99   :  { %465 = dma.done.wait [#allocation4], 2048  }
  0x9a   :  { %466 = vsyncadd [#allocation4], 4294965248 }
  0x9b   :  { %285 = vsyncpa [#allocation3], 1 }
  0x9c   :  { %286 = vsyncpa [#allocation6], 1 }
  0x9d   :  { %287 = vsyncpa [#allocation9], 1 }
  0x9e   :  { %288 = vsyncpa [#allocation12], 1 }
  0x9f   :  { %289 = vsyncpa [#allocation4], 1 }

// kernel: residual_block_forward.11
= control target key start
LH: loop header
LB: loop body
LE: loop exit
PB: predicated region body
PF: predicated region fallthrough
CT: control target
= control target key end

     0   :  { %11 = vsyncpa [#allocation3], 0  ;;  %s3733_s0 = inlined_call_operand.hbm [shape: f32[2,1,10,10,128], index: 0, kind: input, shape index: {}]   ;;  %s3734_s1 = inlined_call_operand.hbm [shape: f32[9,128,128], index: 1, kind: input, shape index: {}]   ;;  %s3735_s2 = inlined_call_operand.hbm [shape: f32[1,128], index: 2, kind: input, shape index: {}]   ;;  %s3736_s3 = inlined_call_operand.hbm [shape: f32[2,64,128], index: 3, kind: output, shape index: {0}]   ;;  %s3737_s4 = inlined_call_operand.hbm [shape: f32[2,1,128], index: 4, kind: output, shape index: {1}]   ;;  %s3738_s5 = inlined_call_operand.hbm [shape: f32[2,1,128], index: 5, kind: output, shape index: {2}]  }
   0x1   :  { %13 = vsyncpa [#allocation3 + $0x1], 0 }
   0x2   :  { %14 = vsyncpa [#allocation6], 0 }
   0x3   :  { %15 = vsyncpa [#allocation4], 0 }
   0x4   :  { %17 = vsyncpa [#allocation4 + $0x1], 0 }
   0x5   :  { %18 = vsyncpa [#allocation10], 0 }
   0x6   :  { %20 = vsyncpa [#allocation10 + $0x1], 0  ;;  %s3236_s18 = smov 0   ;;  %s3238_s19 = smov 0  }
   0x7   :  { %s3240_s20 = smov 0   ;;  %s3242_s21 = smov 0  }
   0x8   :  { %s3244_s22 = smov 0   ;;  %s3246_s23 = smov 0  }
   0x9 LB: > { %s3267_s24 = sadd.s32 4294967295, %s3193_s23   ;;  %s3740_s25 = sadd.s32 4294967294, %s3193_s23   ;;  %s3193_s23 = sphi %s3246_s23, %s26_s23   ;;  %s3189_s22 = sphi %s3244_s22, %s3765_s22   ;;  %s3185_s21 = sphi %s3242_s21, %s3764_s21   ;;  %s3181_s20 = sphi %s3240_s20, %s3763_s20   ;;  %s3177_s19 = sphi %s3238_s19, %s3762_s19   ;;  %s3173_s18 = sphi %s3236_s18, %s3761_s18  }
   0xa   : > { %p60_p0 = scmp.ne.s32.totalorder %s3177_s19, %s3173_s18  ;;  %p3739_p1 = scmp.eq.s32.totalorder %s3267_s24, 0 }
   0xb   : > { %p134_p3 = scmp.eq.s32.totalorder %s3740_s25, 1  ;;  %p1814_p5 = scmp.ge.s32.totalorder %s3193_s23, 1 }
   0xc   : > { %p3278_p4 = por %p3739_p1, %p60_p0  ;;  %p193_p7 = scmp.lt.s32.totalorder %s3193_s23, 3 }
   0xd   : > { %p3283_p6 = por %p134_p3, %p60_p0  ;;  %s3195_s29 = smov [#allocation5]  }
   0xe   : > { %s3745_s26 = scalar_select %p3278_p4, 1, 0 }
   0xf   : > { %s3746_s27 = scalar_select %p3283_p6, 1, 0 }
  0x10   : > { %p3288_p8 = pnand %p1814_p5, %p193_p7  ;;  %s205_s30 = sshll.u32 %s3195_s29, 4  ;;  %s3292_s30 = int_to_ptr.vmem [resolvable:$true] %s205_s30 }
  0x11   : > { %s3196_s7 = smov [#allocation7]   ;;  %s2961_s11 = scalar_lea.hbm %s3734_s1, 18432 }
  0x12   : > { %p2879_p9 = pneg %p3288_p8  ;;  %s219_s8 = sshll.u32 %s3196_s7, 4  ;;  %s3303_s8 = int_to_ptr.vmem [resolvable:$true] %s219_s8 }
  0x13   : > { %p2962_p12 = scmp.ne.s32.totalorder %s3734_s1, %s2961_s11  ;;  %p2968_p5 = scmp.lt.u32.totalorder %s2961_s11, %s3734_s1 }
  0x14   : > { %p3299_p11 = pnand %p2879_p9, %p3739_p1 }
  0x16   : > { %p2963_p13 = pneg %p3299_p11 }
  0x18   : > { %p2964_p0 = pnand %p2963_p13, %p2962_p12 }
  0x1a   : > { %p2965_p3 = pneg %p2964_p0 }
  0x1c   : > { %p2970_p7 = pnand %p2968_p5, %p2965_p3 }
  0x1e   : > { %2973 = shalt.err (!%p2970_p7)
}
  0x1f   : > { %s2974_s16 = scalar_lea.vmem %s3292_s30, 18432  ;;  %p2982_p2 = scmp.lt.s32.totalorder %s3292_s30, %s3292_s30 }
  0x20   : > { %p2975_p9 = scmp.ne.s32.totalorder %s3292_s30, %s2974_s16  ;;  %p2983_p12 = scmp.lt.s32.totalorder %s2974_s16, %s2974_s16 }
  0x22   : > { %p2977_p10 = pnand %p2975_p9, %p2963_p13  ;;  %p2984_p0 = por %p2983_p12, %p2982_p2 }
  0x24   : > { %p2978_p1 = pneg %p2977_p10 }
  0x26   : > { %p2985_p6 = pnand %p2984_p0, %p2978_p1 }
  0x28   : > { %2988 = shalt.err (!%p2985_p6)
}
  0x29   : > { %s3741_s17 = smov 128   ;;  %s3742_s29 = smov 8  }
  0x2a   : > { %2882 = dma.hbm_to_vmem [thread:$0]  (!%p3299_p11), %s3734_s1, 18432, %s3292_s30, [#allocation6], %s3741_s17, %s3741_s17, %s3742_s29  }
  0x2b   : > { %s2989_s12 = scalar_lea.hbm %s3735_s2, 16 }
  0x2c   : > { %p2990_p1 = scmp.ne.s32.totalorder %s3735_s2, %s2989_s12  ;;  %p2996_p10 = scmp.lt.u32.totalorder %s2989_s12, %s3735_s2 }
  0x2e   : > { %p2992_p2 = pnand %p2990_p1, %p2963_p13 }
  0x30   : > { %p2993_p6 = pneg %p2992_p2 }
  0x32   : > { %p2998_p3 = pnand %p2996_p10, %p2993_p6 }
  0x34   : > { %3001 = shalt.err (!%p2998_p3)
}
  0x35   : > { %s3002_s30 = scalar_lea.vmem %s3303_s8, 16  ;;  %s3009_s7 = scalar_lea.vmem %s3303_s8, 32 }
  0x36   : > { %p3003_p5 = scmp.ne.s32.totalorder %s3303_s8, %s3002_s30  ;;  %p3010_p12 = scmp.lt.s32.totalorder %s3303_s8, %s3303_s8 }
  0x37   : > { %p3011_p0 = scmp.lt.s32.totalorder %s3009_s7, %s3002_s30 }
  0x38   : > { %p3005_p7 = pnand %p3003_p5, %p2963_p13 }
  0x39   : > { %p3012_p1 = por %p3011_p0, %p3010_p12 }
  0x3a   : > { %p3006_p9 = pneg %p3005_p7 }
  0x3c   : > { %p3013_p2 = pnand %p3012_p1, %p3006_p9 }
  0x3e   : > { %3016 = shalt.err (!%p3013_p2)
}
  0x3f   : > { %2885 = dma.hbm_to_vmem [thread:$0]  (!%p3299_p11), %s3735_s2, 16, %s3303_s8, [#allocation6]  }
  0x40   : > { %s38_s11 = sadd.s32 1, %s3189_s22  ;;  %s47_s12 = sadd.s32 1, %s3181_s20 }
  0x41   : > { %p40_p13 = scmp.ge.s32.totalorder %s38_s11, 2  ;;  %p54_p6 = scmp.ne.s32.totalorder %s3181_s20, %s3177_s19 }
  0x42   : > { %p55_p10 = scmp.eq.s32.totalorder %s3193_s23, 0  ;;  %p2902_p3 = scmp.lt.s32.totalorder %s3193_s23, 2 }
  0x43   : > { %s3767_s11 = smov (%p40_p13, %s38_s11), 0  ;;  %p3749_p7 = scmp.eq.s32.totalorder %s3267_s24, 1 }
  0x44   : > { %p56_p5 = por %p55_p10, %p54_p6  ;;  %s42_s13 = ssub.s32 %s3189_s22, %s3767_s11 }
  0x45   : > { %p3371_p9 = por %p3749_p7, %p54_p6  ;;  %s230_s14 = sand.u32 1, %s3181_s20  }
  0x46   : > { %p45_p12 = scmp.eq.s32.totalorder %s42_s13, 0  ;;  %s2860_s8 = smul.u32 160, %s230_s14 }
  0x47   : > { %s3750_s6 = scalar_select %p3371_p9, 1, 0 }
  0x48   : > { %p3378_p11 = pnand %p2902_p3, %p56_p5  ;;  %s2861_s30 = smul.u32 2560, %s3189_s22 }
  0x49   : > { %s3383_s16 = scalar_select %p45_p12, %s3181_s20, %s47_s12  }
  0x4a   : > { %s234_s7 = scalar_lea.vmem [#allocation2], %s2860_s8  ;;  %s3389_s17 = scalar_lea.hbm %s3733_s0, %s2861_s30 }
  0x4b   : > { %s243_s9 = sshll.u32 %s234_s7, 4  ;;  %s3393_s13 = scalar_lea.sflag [#allocation3], %s230_s14  ;;  %s3391_s9 = int_to_ptr.vmem [resolvable:$true] %s243_s9 }
  0x4c   : > { %s3017_s29 = scalar_lea.hbm %s3389_s17, 2560  ;;  %p3019_p1 = pneg %p3378_p11 }
  0x4d   : > { %p3018_p0 = scmp.ne.s32.totalorder %s3389_s17, %s3017_s29  ;;  %s3022_s8 = scalar_lea.hbm %s3733_s0, 5120 }
  0x4e   : > { %p3023_p6 = scmp.lt.u32.totalorder %s3389_s17, %s3733_s0  ;;  %p3024_p10 = scmp.lt.u32.totalorder %s3022_s8, %s3017_s29 }
  0x4f   : > { %p3020_p2 = pnand %p3019_p1, %p3018_p0  ;;  %p3026_p5 = scmp.lt.u32.totalorder %s3017_s29, %s3389_s17 }
  0x50   : > { %p3025_p3 = por %p3024_p10, %p3023_p6 }
  0x51   : > { %p3021_p13 = pneg %p3020_p2 }
  0x52   : > { %p3027_p7 = por %p3026_p5, %p3025_p3 }
  0x54   : > { %p3028_p12 = pnand %p3027_p7, %p3021_p13 }
  0x56   : > { %3031 = shalt.err (!%p3028_p12)
}
  0x57   : > { %s3032_s14 = scalar_lea.vmem %s3391_s9, 2560  ;;  %s3199_s10 = smov [#allocation2]  }
  0x58   : > { %p3033_p0 = scmp.ne.s32.totalorder %s3391_s9, %s3032_s14  ;;  %s3037_s12 = sshll.u32 %s3199_s10, 4  ;;  %s3038_s12 = int_to_ptr.vmem [resolvable:$false] %s3037_s12 }
  0x59   : > { %s3039_s25 = scalar_lea.vmem %s3038_s12, 5120  ;;  %p3040_p4 = scmp.lt.s32.totalorder %s3391_s9, %s3038_s12 }
  0x5a   : > { %p3035_p2 = pnand %p3033_p0, %p3019_p1  ;;  %p3041_p6 = scmp.lt.s32.totalorder %s3039_s25, %s3032_s14 }
  0x5c   : > { %p3036_p9 = pneg %p3035_p2  ;;  %p3042_p10 = por %p3041_p6, %p3040_p4 }
  0x5e   : > { %p3043_p3 = pnand %p3042_p10, %p3036_p9 }
  0x60   : > { %3046 = shalt.err (!%p3043_p3)
}
  0x61   : > { %s3752_s29 = smov 8   ;;  %s3753_s8 = smov 128  }
  0x62   : > { %2889 = dma.hbm_to_vmem [thread:$0]  (!%p3378_p11), %s3389_s17, 2560, %s3391_s9, %s3393_s13, %s3753_s8, %s3753_s8, %s3752_s29  }
  0x63   : > { %255 = sbr.rel (%p3288_p8) target bundleno = 566 (0x236), region = 32  ;;  %s3427_s30 = sand.u32 (!%p3288_p8), 1, %s3177_s19  }
  0x64   : > { %s2862_s7 = smul.u32 (!%p3288_p8), 160, %s3427_s30  ;;  %s258_s14 = scalar_lea.sflag (!%p3288_p8), [#allocation3], %s3427_s30 }
  0x65   : > { %p3754_p4 = scmp.ne.s32.totalorder (!%p3288_p8), %s3745_s26, 0 }
  0x66   : > { %s3431_s10 = scalar_lea.vmem (!%p3288_p8), [#allocation2], %s2862_s7 }
  0x6a   : > { %3156 = dma.done.wait (%p3754_p4), %s258_s14, 2560  }
  0x6b   : > { %3158 = vsyncadd (%p3754_p4), %s258_s14, 4294964736  ;;  %p3755_p9 = scmp.eq.s32.totalorder %s3267_s24, 0 }
  0x6d   : > { %3160 = dma.done.wait (%p3755_p9), [#allocation6], 18448   ;;  %p3756_p8 = pmov %p3755_p9 }
  0x6e   : > { %v345_v0 = vld [vmem:[#allocation5 + $0x80] sm:$0xff]  ;;  %v346_v1 = vld [vmem:[#allocation5 + $0x88] sm:$0xff]  ;;  %v347_v5 = vld [vmem:[#allocation5 + $0x90] sm:$0xff]  ;;  %s3582_s26 = scalar_lea.vmem [#allocation9], %s3427_s30  ;;  %s3586_s28 = scalar_lea.vmem [#allocation11], %s3427_s30 }
  0x6f   : > { %3162 = vsyncadd (%p3756_p8), [#allocation6], 4294948848  ;;  %v857_v2 = vld [vmem:[#allocation5 + $0x200] sm:$0xff]  ;;  %v2492_v3 = vpack.c.bf16 %v346_v1, %v345_v0  ;;  %v858_v4 = vld [vmem:[#allocation5 + $0x208] sm:$0xff]  ;;  %s1822_s17 = sshll.u32 %s3427_s30, 6  ;;  %s1879_s9 = sshll.u32 %s3185_s21, 10 }
  0x70   : > { %v348_v6 = vld [vmem:[#allocation5 + $0x98] sm:$0xff]  ;;  %v2620_v7 = vpack.c.bf16 %v858_v4, %v857_v2  ;;  %v859_v9 = vld [vmem:[#allocation5 + $0x210] sm:$0xff]  ;;  %v349_v11 = vld [vmem:[#allocation5 + $0xa0] sm:$0xff]  ;;  %s291_s15 = scalar_lea.vmem [#allocation8], %s1822_s17  ;;  %s3603_s29 = scalar_lea.hbm %s3736_s3, %s1879_s9 }
  0x71   : > { %v2496_v8 = vpack.c.bf16 %v348_v6, %v347_v5  ;;  %v860_v10 = vld [vmem:[#allocation5 + $0x218] sm:$0xff]  ;;  %2493 = vmatprep.subr.bf16.mxu1 %v2492_v3  ;;  %v350_v13 = vld [vmem:[#allocation5 + $0xa8] sm:$0xff]  ;;  %v861_v14 = vld [vmem:[#allocation5 + $0x220] sm:$0xff]  ;;  %s1627_s13 = sshll.u32 %s291_s15, 4  ;;  %s1604_s8 = scalar_lea.sflag [#allocation4], %s3427_s30  ;;  %s3605_s13 = int_to_ptr.vmem [resolvable:$true] %s1627_s13 }
  0x72   : > { %v2624_v12 = vpack.c.bf16 %v860_v10, %v859_v9  ;;  %v862_v15 = vld [vmem:[#allocation5 + $0x228] sm:$0xff]  ;;  %2621 = vmatprep.subr.bf16.mxu0 %v2620_v7  ;;  %2495 = vmatpush3.bf16.msra.mxu1 %v2492_v3  ;;  %v2500_v16 = vpack.c.bf16 %v350_v13, %v349_v11  ;;  %v351_v18 = vld [vmem:[#allocation5 + $0xb0] sm:$0xff]  ;;  %v352_v19 = vld [vmem:[#allocation5 + $0xb8] sm:$0xff]  ;;  %s3047_s7 = scalar_lea.vmem %s3605_s13, 1024  ;;  %p3757_p1 = scmp.ne.s32.totalorder %s3750_s6, 0 }
  0x73   : > { %2623 = vmatpush3.bf16.msra.mxu0 %v2620_v7  ;;  %2497 = vmatprep.subr.bf16.mxu1 %v2496_v8  ;;  %v2628_v17 = vpack.c.bf16 %v862_v15, %v861_v14  ;;  %v863_v20 = vld [vmem:[#allocation5 + $0x230] sm:$0xff]  ;;  %v864_v21 = vld [vmem:[#allocation5 + $0x238] sm:$0xff]  ;;  %v2504_v22 = vpack.c.bf16 %v352_v19, %v351_v18  ;;  %v353_v24 = vld [vmem:[#allocation5 + $0xc0] sm:$0xff]  ;;  %p3048_p11 = scmp.ne.s32.totalorder %s3605_s13, %s3047_s7  ;;  %s3201_s14 = smov [#allocation8]  }
  0x74   : > { %2625 = vmatprep.subr.bf16.mxu0 %v2624_v12  ;;  %v2632_v23 = vpack.c.bf16 %v864_v21, %v863_v20  ;;  %v354_v25 = vld [vmem:[#allocation5 + $0xc8] sm:$0xff]  ;;  %v865_v27 = vld [vmem:[#allocation5 + $0x240] sm:$0xff]  ;;  %v1831_v29 = vld [vmem:[%s3431_s10 + $0x11] sm:$0xff] }
  0x75   : > { %v336_v26 = vld [vmem:[%s3431_s10 + $0x1] sm:$0xff]  ;;  %2304 = vmatprep.mubr.f32.mxu0 %v1831_v29  ;;  %v2508_v30 = vpack.c.bf16 %v354_v25, %v353_v24  ;;  %v355_v32 = vld [vmem:[#allocation5 + $0xd0] sm:$0xff]  ;;  %v356_v33 = vld [vmem:[#allocation5 + $0xd8] sm:$0xff]  ;;  %p3049_p13 = pnand %p3048_p11, %p3757_p1 }
  0x76   : > { %2499 = vmatpush3.bf16.msra.mxu1 %v2496_v8  ;;  %v866_v28 = vld [vmem:[#allocation5 + $0x248] sm:$0xff]  ;;  %2128 = vmatprep.mubr.f32.mxu1 %v336_v26  ;;  %v867_v34 = vld [vmem:[#allocation5 + $0x250] sm:$0xff]  ;;  %v868_v35 = vld [vmem:[#allocation5 + $0x258] sm:$0xff]  ;;  %v2512_v36 = vpack.c.bf16 %v356_v33, %v355_v32 }
  0x77   : > { %2627 = vmatpush3.bf16.msra.mxu0 %v2624_v12  ;;  %2501 = vmatprep.subr.bf16.mxu1 %v2500_v16  ;;  %v2636_v31 = vpack.c.bf16 %v866_v28, %v865_v27  ;;  %v2640_v37 = vpack.c.bf16 %v868_v35, %v867_v34  ;;  %v357_v38 = vld [vmem:[#allocation5 + $0xe0] sm:$0xff]  ;;  %v358_v39 = vld [vmem:[#allocation5 + $0xe8] sm:$0xff]  ;;  %v359_v44 = vld [vmem:[#allocation5 + $0xf0] sm:$0xff]  ;;  %p3050_p5 = pneg %p3049_p13 }
  0x78   : > { %2629 = vmatprep.subr.bf16.mxu0 %v2628_v17  ;;  %v869_v40 = vld [vmem:[#allocation5 + $0x260] sm:$0xff]  ;;  %v870_v41 = vld [vmem:[#allocation5 + $0x268] sm:$0xff]  ;;  %v2516_v42 = vpack.c.bf16 %v358_v39, %v357_v38  ;;  %v360_v45 = vld [vmem:[#allocation5 + $0xf8] sm:$0xff] }
  0x79   : > { %v2644_v43 = vpack.c.bf16 %v870_v41, %v869_v40  ;;  %v871_v46 = vld [vmem:[#allocation5 + $0x270] sm:$0xff]  ;;  %v872_v47 = vld [vmem:[#allocation5 + $0x278] sm:$0xff]  ;;  %v2520_v48 = vpack.c.bf16 %v360_v45, %v359_v44  ;;  %v320_v50 = vld [vmem:[#allocation5] sm:$0xff] }
  0x7a   : > { %2503 = vmatpush3.bf16.msra.mxu1 %v2500_v16  ;;  %v2648_v49 = vpack.c.bf16 %v872_v47, %v871_v46  ;;  %v321_v51 = vld [vmem:[#allocation5 + $0x8] sm:$0xff]  ;;  %v995_v52 = vld [vmem:[#allocation5 + $0x280] sm:$0xff]  ;;  %v322_v56 = vld [vmem:[#allocation5 + $0x10] sm:$0xff] }
  0x7b   : > { %2631 = vmatpush3.bf16.msra.mxu0 %v2628_v17  ;;  %2505 = vmatprep.subr.bf16.mxu1 %v2504_v22  ;;  %v996_v53 = vld [vmem:[#allocation5 + $0x288] sm:$0xff]  ;;  %v2524_v54 = vpack.c.bf16 %v321_v51, %v320_v50  ;;  %v323_v57 = vld [vmem:[#allocation5 + $0x18] sm:$0xff]  ;;  %v997_v58 = vld [vmem:[#allocation5 + $0x290] sm:$0xff] }
  0x7c   : > { %2633 = vmatprep.subr.bf16.mxu0 %v2632_v23  ;;  %v2652_v55 = vpack.c.bf16 %v996_v53, %v995_v52  ;;  %v998_v59 = vld [vmem:[#allocation5 + $0x298] sm:$0xff]  ;;  %v3444_v60 = vld [vmem:[%s3431_s10 + $0x21] sm:$0xff]  ;;  %v2528_v61 = vpack.c.bf16 %v323_v57, %v322_v56  ;;  %v326_v7 = vld [vmem:[#allocation5 + $0x30] sm:$0xff] }
  0x7d   : > { %v2656_v62 = vpack.c.bf16 %v998_v59, %v997_v58  ;;  %v324_v63 = vld [vmem:[#allocation5 + $0x20] sm:$0xff]  ;;  %v325_v0 = vld [vmem:[#allocation5 + $0x28] sm:$0xff]  ;;  %v3448_v3 = vld [vmem:[%s3431_s10 + $0x31] sm:$0xff] }
  0x7e   : > { %2507 = vmatpush3.bf16.msra.mxu1 %v2504_v22  ;;  %v999_v1 = vld [vmem:[#allocation5 + $0x2a0] sm:$0xff]  ;;  %v1000_v2 = vld [vmem:[#allocation5 + $0x2a8] sm:$0xff]  ;;  %v2532_v4 = vpack.c.bf16 %v325_v0, %v324_v63  ;;  %v327_v8 = vld [vmem:[#allocation5 + $0x38] sm:$0xff] }
  0x7f   : > { %2635 = vmatpush3.bf16.msra.mxu0 %v2632_v23  ;;  %2509 = vmatprep.subr.bf16.mxu1 %v2508_v30  ;;  %v3451_v5 = vld [vmem:[%s3431_s10 + $0x41] sm:$0xff]  ;;  %v2660_v6 = vpack.c.bf16 %v1000_v2, %v999_v1  ;;  %v1001_v9 = vld [vmem:[#allocation5 + $0x2b0] sm:$0xff]  ;;  %v1002_v10 = vld [vmem:[#allocation5 + $0x2b8] sm:$0xff]  ;;  %v2536_v12 = vpack.c.bf16 %v327_v8, %v326_v7 }
  0x80   : > { %2637 = vmatprep.subr.bf16.mxu0 %v2636_v31  ;;  %v3458_v11 = vld [vmem:[%s3431_s10 + $0x51] sm:$0xff]  ;;  %v3461_v13 = vld [vmem:[%s3431_s10 + $0x61] sm:$0xff]  ;;  %v2664_v14 = vpack.c.bf16 %v1002_v10, %v1001_v9 }
  0x81   : > { %v328_v15 = vld [vmem:[#allocation5 + $0x40] sm:$0xff]  ;;  %v329_v16 = vld [vmem:[#allocation5 + $0x48] sm:$0xff]  ;;  %v3468_v19 = vld [vmem:[%s3431_s10 + $0x71] sm:$0xff] }
  0x82   : > { %2511 = vmatpush3.bf16.msra.mxu1 %v2508_v30  ;;  %v1003_v17 = vld [vmem:[#allocation5 + $0x2c0] sm:$0xff]  ;;  %v1004_v18 = vld [vmem:[#allocation5 + $0x2c8] sm:$0xff]  ;;  %v2540_v20 = vpack.c.bf16 %v329_v16, %v328_v15  ;;  %v330_v23 = vld [vmem:[#allocation5 + $0x50] sm:$0xff] }
  0x83   : > { %2639 = vmatpush3.bf16.msra.mxu0 %v2636_v31  ;;  %2513 = vmatprep.subr.bf16.mxu1 %v2512_v36  ;;  %v3471_v21 = vld [vmem:[%s3431_s10 + $0x81] sm:$0xff]  ;;  %v2668_v22 = vpack.c.bf16 %v1004_v18, %v1003_v17  ;;  %v331_v24 = vld [vmem:[#allocation5 + $0x58] sm:$0xff]  ;;  %v1005_v25 = vld [vmem:[#allocation5 + $0x2d0] sm:$0xff] }
  0x84   : > { %2641 = vmatprep.subr.bf16.mxu0 %v2640_v37  ;;  %v1006_v26 = vld [vmem:[#allocation5 + $0x2d8] sm:$0xff]  ;;  %v312_v27 = vld [vmem:[%s3431_s10] sm:$0xff]  ;;  %v333_v32 = vld [vmem:[#allocation5 + $0x68] sm:$0xff] }
  0x85   : > { %v3479_v28 = vld [vmem:[%s3431_s10 + $0x12] sm:$0xff]  ;;  %v2672_v30 = vpack.c.bf16 %v1006_v26, %v1005_v25  ;;  %v332_v31 = vld [vmem:[#allocation5 + $0x60] sm:$0xff]  ;;  %v1008_v34 = vld [vmem:[#allocation5 + $0x2e8] sm:$0xff] }
  0x86   : > { %2515 = vmatpush3.bf16.msra.mxu1 %v2512_v36  ;;  %v1007_v33 = vld [vmem:[#allocation5 + $0x2e0] sm:$0xff]  ;;  %v2548_v35 = vpack.c.bf16 %v333_v32, %v332_v31  ;;  %v335_v38 = vld [vmem:[#allocation5 + $0x78] sm:$0xff]  ;;  %v1009_v39 = vld [vmem:[#allocation5 + $0x2f0] sm:$0xff] }
  0x87   : > { %2643 = vmatpush3.bf16.msra.mxu0 %v2640_v37  ;;  %2517 = vmatprep.subr.bf16.mxu1 %v2516_v42  ;;  %v2676_v36 = vpack.c.bf16 %v1008_v34, %v1007_v33  ;;  %v334_v37 = vld [vmem:[#allocation5 + $0x70] sm:$0xff]  ;;  %v1010_v40 = vld [vmem:[#allocation5 + $0x2f8] sm:$0xff]  ;;  %v581_v44 = vld [vmem:[#allocation5 + $0x108] sm:$0xff] }
  0x88   : > { %2645 = vmatprep.subr.bf16.mxu0 %v2644_v43  ;;  %v2552_v41 = vpack.c.bf16 %v335_v38, %v334_v37  ;;  %v1134_v45 = vld [vmem:[#allocation5 + $0x300] sm:$0xff]  ;;  %v1135_v46 = vld [vmem:[#allocation5 + $0x308] sm:$0xff]  ;;  %v583_v50 = vld [vmem:[#allocation5 + $0x118] sm:$0xff] }
  0x89   : > { %v1136_v51 = vld [vmem:[#allocation5 + $0x310] sm:$0xff]  ;;  %v1137_v52 = vld [vmem:[#allocation5 + $0x318] sm:$0xff]  ;;  %v584_v57 = vld [vmem:[#allocation5 + $0x120] sm:$0xff] }
  0x8a   : > { %2519 = vmatpush3.bf16.msra.mxu1 %v2516_v42  ;;  %v2680_v42 = vpack.c.bf16 %v1010_v40, %v1009_v39  ;;  %v3483_v53 = vld [vmem:[%s3431_s10 + $0x10] sm:$0xff]  ;;  %v2688_v56 = vpack.c.bf16 %v1137_v52, %v1136_v51  ;;  %v585_v58 = vld [vmem:[#allocation5 + $0x128] sm:$0xff]  ;;  %v1138_v59 = vld [vmem:[#allocation5 + $0x320] sm:$0xff] }
  0x8b   : > { %2647 = vmatpush3.bf16.msra.mxu0 %v2644_v43  ;;  %2521 = vmatprep.subr.bf16.mxu1 %v2520_v48  ;;  %v580_v43 = vld [vmem:[#allocation5 + $0x100] sm:$0xff]  ;;  %v3494_v63 = vld [vmem:[%s3431_s10 + $0x32] sm:$0xff]  ;;  %v2564_v1 = vpack.c.bf16 %v585_v58, %v584_v57  ;;  %v593_v39 = vld [vmem:[#allocation5 + $0x168] sm:$0xff] }
  0x8c   : > { %2649 = vmatprep.subr.bf16.mxu0 %v2648_v49  ;;  %v2556_v47 = vpack.c.bf16 %v581_v44, %v580_v43  ;;  %v3497_v0 = vld [vmem:[%s3431_s10 + $0x30] sm:$0xff]  ;;  %v3500_v2 = vld [vmem:[%s3431_s10 + $0x42] sm:$0xff]  ;;  %v587_v7 = vld [vmem:[#allocation5 + $0x138] sm:$0xff] }
  0x8d   : > { %v1140_v8 = vld [vmem:[#allocation5 + $0x330] sm:$0xff]  ;;  %v1141_v9 = vld [vmem:[#allocation5 + $0x338] sm:$0xff]  ;;  %v3506_v10 = vld [vmem:[%s3431_s10 + $0x40] sm:$0xff] }
  0x8e   : > { %2523 = vmatpush3.bf16.msra.mxu1 %v2520_v48  ;;  %v2684_v48 = vpack.c.bf16 %v1135_v46, %v1134_v45  ;;  %v3516_v16 = vld [vmem:[%s3431_s10 + $0x62] sm:$0xff]  ;;  %v2696_v17 = vpack.c.bf16 %v1141_v9, %v1140_v8  ;;  %v3526_v25 = vld [vmem:[%s3431_s10 + $0x72] sm:$0xff] }
  0x8f   : > { %2651 = vmatpush3.bf16.msra.mxu0 %v2648_v49  ;;  %2525 = vmatprep.subr.bf16.mxu1 %v2524_v54  ;;  %v582_v49 = vld [vmem:[#allocation5 + $0x110] sm:$0xff]  ;;  %v588_v18 = vld [vmem:[#allocation5 + $0x140] sm:$0xff]  ;;  %v591_v32 = vld [vmem:[#allocation5 + $0x158] sm:$0xff] }
  0x90   : > { %2653 = vmatprep.subr.bf16.mxu0 %v2652_v55  ;;  %v3529_v26 = vld [vmem:[%s3431_s10 + $0x70] sm:$0xff]  ;;  %v1145_v34 = vld [vmem:[#allocation5 + $0x358] sm:$0xff]  ;;  %v592_v38 = vld [vmem:[#allocation5 + $0x160] sm:$0xff] }
  0x91   : > { %2129 = vmatmul.mubr.f32.vlgmr.msra.gmra.mrb[0].mxu1 %v1831_v29  ;;  %v2544_v29 = vpack.c.bf16 %v331_v24, %v330_v23  ;;  %v1143_v23 = vld [vmem:[#allocation5 + $0x348] sm:$0xff]  ;;  %v3522_v24 = vld [vmem:[%s3431_s10 + $0x60] sm:$0xff]  ;;  %v590_v31 = vld [vmem:[#allocation5 + $0x150] sm:$0xff] }
  0x92   : > { %2527 = vmatpush3.bf16.msra.mxu1 %v2524_v54  ;;  %2305 = vmatmul.mubr.f32.vlgmr.msra.gmra.mrb[0].mxu0 %v3444_v60  ;;  %v3486_v54 = vld [vmem:[%s3431_s10 + $0x22] sm:$0xff]  ;;  %v1144_v33 = vld [vmem:[#allocation5 + $0x350] sm:$0xff]  ;;  %v595_v45 = vld [vmem:[#allocation5 + $0x178] sm:$0xff] }
  0x93   : > { %2655 = vmatpush3.bf16.msra.mxu0 %v2652_v55  ;;  %2529 = vmatprep.subr.bf16.mxu1 %v2528_v61  ;;  %v2560_v55 = vpack.c.bf16 %v583_v50, %v582_v49  ;;  %v2704_v37 = vpack.c.bf16 %v1145_v34, %v1144_v33  ;;  %v1146_v40 = vld [vmem:[#allocation5 + $0x360] sm:$0xff]  ;;  %v594_v44 = vld [vmem:[#allocation5 + $0x170] sm:$0xff]  ;;  %v720_v51 = vld [vmem:[#allocation5 + $0x188] sm:$0xff] }
  0x94   : > { %2657 = vmatprep.subr.bf16.mxu0 %v2656_v62  ;;  %2131 = vmatprep.mubr.f32.mxu1 %v3444_v60  ;;  %v1148_v46 = vld [vmem:[#allocation5 + $0x370] sm:$0xff]  ;;  %v719_v50 = vld [vmem:[#allocation5 + $0x180] sm:$0xff]  ;;  %v724_v8 = vld [vmem:[#allocation5 + $0x1a8] sm:$0xff] }
  0x95   : > { %2307 = vmatprep.mubr.f32.mxu0 %v3448_v3  ;;  %2132 = vmatmul.mubr.f32.gmra.mrb[2].mxu1 %v3448_v3  ;;  %v1272_v52 = vld [vmem:[#allocation5 + $0x380] sm:$0xff]  ;;  %v721_v58 = vld [vmem:[#allocation5 + $0x190] sm:$0xff]  ;;  %v1281_v34 = vld [vmem:[#allocation5 + $0x3c8] sm:$0xff] }
  0x96   : > { %2531 = vmatpush3.bf16.msra.mxu1 %v2528_v61  ;;  %2308 = vmatmul.mubr.f32.gmra.mrb[2].mxu0 %v3451_v5  ;;  %v1139_v61 = vld [vmem:[#allocation5 + $0x328] sm:$0xff]  ;;  %v1276_v9 = vld [vmem:[#allocation5 + $0x3a0] sm:$0xff] }
  0x97   : > { %2659 = vmatpush3.bf16.msra.mxu0 %v2656_v62  ;;  %2533 = vmatprep.subr.bf16.mxu1 %v2532_v4  ;;  %v3490_v62 = vld [vmem:[%s3431_s10 + $0x20] sm:$0xff] }
  0x98   : > { %2661 = vmatprep.subr.bf16.mxu0 %v2660_v6  ;;  %2134 = vmatprep.mubr.f32.mxu1 %v3451_v5  ;;  %v1280_v33 = vld [vmem:[#allocation5 + $0x3c0] sm:$0xff] }
  0x99   : > { %2310 = vmatprep.mubr.f32.mxu0 %v3458_v11  ;;  %2135 = vmatmul.mubr.f32.gmra.mrb[4].mxu1 %v3458_v11 }
  0x9a   : > { %2535 = vmatpush3.bf16.msra.mxu1 %v2532_v4  ;;  %2311 = vmatmul.mubr.f32.gmra.mrb[4].mxu0 %v3461_v13  ;;  %v2692_v4 = vpack.c.bf16 %v1139_v61, %v1138_v59  ;;  %v722_v59 = vld [vmem:[#allocation5 + $0x198] sm:$0xff]  ;;  %v1274_v61 = vld [vmem:[#allocation5 + $0x390] sm:$0xff] }
  0x9b   : > { %2663 = vmatpush3.bf16.msra.mxu0 %v2660_v6  ;;  %2537 = vmatprep.subr.bf16.mxu1 %v2536_v12  ;;  %v586_v6 = vld [vmem:[#allocation5 + $0x130] sm:$0xff] }
  0x9c   : > { %2665 = vmatprep.subr.bf16.mxu0 %v2664_v14  ;;  %2137 = vmatprep.mubr.f32.mxu1 %v3461_v13  ;;  %v2568_v15 = vpack.c.bf16 %v587_v7, %v586_v6  ;;  %v723_v7 = vld [vmem:[#allocation5 + $0x1a0] sm:$0xff] }
  0x9d   : > { %2313 = vmatprep.mubr.f32.mxu0 %v3468_v19  ;;  %2138 = vmatmul.mubr.f32.gmra.mrb[6].mxu1 %v3468_v19 }
  0x9e   : > { %2539 = vmatpush3.bf16.msra.mxu1 %v2536_v12  ;;  %2314 = vmatmul.mubr.f32.gmra.mrb[6].mxu0 %v3471_v21  ;;  %v3510_v12 = vld [vmem:[%s3431_s10 + $0x52] sm:$0xff] }
  0x9f   : > { %2667 = vmatpush3.bf16.msra.mxu0 %v2664_v14  ;;  %2541 = vmatprep.subr.bf16.mxu1 %v2540_v20  ;;  %v3513_v14 = vld [vmem:[%s3431_s10 + $0x50] sm:$0xff] }
  0xa0   : > { %2669 = vmatprep.subr.bf16.mxu0 %v2668_v22  ;;  %2172 = vmatprep.mubr.f32.mxu1 %v312_v27 }
  0xa1   : > { %2348 = vmatprep.mubr.f32.mxu0 %v3479_v28 }
  0xa2   : > { %2543 = vmatpush3.bf16.msra.mxu1 %v2540_v20  ;;  %v589_v20 = vld [vmem:[#allocation5 + $0x148] sm:$0xff] }
  0xa3   : > { %2671 = vmatpush3.bf16.msra.mxu0 %v2668_v22  ;;  %2545 = vmatprep.subr.bf16.mxu1 %v2544_v29  ;;  %v1142_v22 = vld [vmem:[#allocation5 + $0x340] sm:$0xff]  ;;  %v2572_v27 = vpack.c.bf16 %v589_v20, %v588_v18  ;;  %v725_v20 = vld [vmem:[#allocation5 + $0x1b0] sm:$0xff] }
  0xa4   : > { %2673 = vmatprep.subr.bf16.mxu0 %v2672_v30 }
  0xa6   : > { %2547 = vmatpush3.bf16.msra.mxu1 %v2544_v29  ;;  %v3532_v29 = vld [vmem:[%s3431_s10 + $0x82] sm:$0xff] }
  0xa7   : > { %2675 = vmatpush3.bf16.msra.mxu0 %v2672_v30  ;;  %2549 = vmatprep.subr.bf16.mxu1 %v2548_v35  ;;  %v2700_v30 = vpack.c.bf16 %v1143_v23, %v1142_v22  ;;  %v726_v22 = vld [vmem:[#allocation5 + $0x1b8] sm:$0xff]  ;;  %v1278_v23 = vld [vmem:[#allocation5 + $0x3b0] sm:$0xff] }
  0xa8   : > { %2677 = vmatprep.subr.bf16.mxu0 %v2676_v36 }
  0xaa   : > { %2551 = vmatpush3.bf16.msra.mxu1 %v2548_v35  ;;  %v571_v35 = vld [vmem:[%s3431_s10 + $0x2] sm:$0xff] }
  0xab   : > { %2679 = vmatpush3.bf16.msra.mxu0 %v2676_v36  ;;  %2553 = vmatprep.subr.bf16.mxu1 %v2552_v41  ;;  %v2576_v36 = vpack.c.bf16 %v591_v32, %v590_v31  ;;  %v727_v31 = vld [vmem:[#allocation5 + $0x1c0] sm:$0xff]  ;;  %v728_v32 = vld [vmem:[#allocation5 + $0x1c8] sm:$0xff] }
  0xac   : > { %2681 = vmatprep.subr.bf16.mxu0 %v2680_v42 }
  0xae   : > { %2555 = vmatpush3.bf16.msra.mxu1 %v2552_v41  ;;  %v1147_v41 = vld [vmem:[#allocation5 + $0x368] sm:$0xff] }
  0xaf   : > { %2683 = vmatpush3.bf16.msra.mxu0 %v2680_v42  ;;  %2557 = vmatprep.subr.bf16.mxu1 %v2556_v47  ;;  %v2580_v42 = vpack.c.bf16 %v593_v39, %v592_v38  ;;  %v2708_v43 = vpack.c.bf16 %v1147_v41, %v1146_v40  ;;  %v2732_v38 = vpack.c.bf16 %v1281_v34, %v1280_v33  ;;  %v729_v39 = vld [vmem:[#allocation5 + $0x1d0] sm:$0xff]  ;;  %v730_v40 = vld [vmem:[#allocation5 + $0x1d8] sm:$0xff] }
  0xb0   : > { %2685 = vmatprep.subr.bf16.mxu0 %v2684_v48  ;;  %v1282_v41 = vld [vmem:[#allocation5 + $0x3d0] sm:$0xff] }
  0xb1   : > { %2173 = vmatmul.mubr.f32.vlgmr.msra.gmra.mrb[0].mxu1 %v3483_v53 }
  0xb2   : > { %2559 = vmatpush3.bf16.msra.mxu1 %v2556_v47  ;;  %2349 = vmatmul.mubr.f32.vlgmr.msra.gmra.mrb[0].mxu0 %v3486_v54  ;;  %v1149_v47 = vld [vmem:[#allocation5 + $0x378] sm:$0xff] }
  0xb3   : > { %2687 = vmatpush3.bf16.msra.mxu0 %v2684_v48  ;;  %2561 = vmatprep.subr.bf16.mxu1 %v2560_v55  ;;  %v2584_v48 = vpack.c.bf16 %v595_v45, %v594_v44  ;;  %v2712_v49 = vpack.c.bf16 %v1149_v47, %v1148_v46  ;;  %v731_v45 = vld [vmem:[#allocation5 + $0x1e0] sm:$0xff]  ;;  %v732_v46 = vld [vmem:[#allocation5 + $0x1e8] sm:$0xff] }
  0xb4   : > { %2689 = vmatprep.subr.bf16.mxu0 %v2688_v56  ;;  %2175 = vmatprep.mubr.f32.mxu1 %v3490_v62  ;;  %v1284_v47 = vld [vmem:[#allocation5 + $0x3e0] sm:$0xff] }
  0xb5   : > { %2351 = vmatprep.mubr.f32.mxu0 %v3494_v63  ;;  %2176 = vmatmul.mubr.f32.gmra.mrb[2].mxu1 %v3497_v0 }
  0xb6   : > { %2563 = vmatpush3.bf16.msra.mxu1 %v2560_v55  ;;  %2352 = vmatmul.mubr.f32.gmra.mrb[2].mxu0 %v3500_v2  ;;  %v1273_v55 = vld [vmem:[#allocation5 + $0x388] sm:$0xff] }
  0xb7   : > { %2691 = vmatpush3.bf16.msra.mxu0 %v2688_v56  ;;  %2565 = vmatprep.subr.bf16.mxu1 %v2564_v1  ;;  %v2588_v56 = vpack.c.bf16 %v720_v51, %v719_v50  ;;  %v2716_v57 = vpack.c.bf16 %v1273_v55, %v1272_v52  ;;  %v733_v51 = vld [vmem:[#allocation5 + $0x1f0] sm:$0xff]  ;;  %v734_v52 = vld [vmem:[#allocation5 + $0x1f8] sm:$0xff] }
  0xb8   : > { %2693 = vmatprep.subr.bf16.mxu0 %v2692_v4  ;;  %2178 = vmatprep.mubr.f32.mxu1 %v3506_v10  ;;  %v1286_v55 = vld [vmem:[#allocation5 + $0x3f0] sm:$0xff] }
  0xb9   : > { %2354 = vmatprep.mubr.f32.mxu0 %v3510_v12  ;;  %2179 = vmatmul.mubr.f32.gmra.mrb[4].mxu1 %v3513_v14 }
  0xba   : > { %2567 = vmatpush3.bf16.msra.mxu1 %v2564_v1  ;;  %2355 = vmatmul.mubr.f32.gmra.mrb[4].mxu0 %v3516_v16  ;;  %v1275_v1 = vld [vmem:[#allocation5 + $0x398] sm:$0xff] }
  0xbb   : > { %2695 = vmatpush3.bf16.msra.mxu0 %v2692_v4  ;;  %2569 = vmatprep.subr.bf16.mxu1 %v2568_v15  ;;  %v2592_v4 = vpack.c.bf16 %v722_v59, %v721_v58  ;;  %v2720_v6 = vpack.c.bf16 %v1275_v1, %v1274_v61  ;;  %v1410_v58 = vld [vmem:[#allocation5 + $0x400] sm:$0xff]  ;;  %v1411_v59 = vld [vmem:[#allocation5 + $0x408] sm:$0xff]  ;;  %v1412_v61 = vld [vmem:[#allocation5 + $0x410] sm:$0xff] }
  0xbc   : > { %2697 = vmatprep.subr.bf16.mxu0 %v2696_v17  ;;  %2181 = vmatprep.mubr.f32.mxu1 %v3522_v24  ;;  %v1413_v1 = vld [vmem:[#allocation5 + $0x418] sm:$0xff] }
  0xbd   : > { %2357 = vmatprep.mubr.f32.mxu0 %v3526_v25  ;;  %2182 = vmatmul.mubr.f32.gmra.mrb[6].mxu1 %v3529_v26 }
  0xbe   : > { %2571 = vmatpush3.bf16.msra.mxu1 %v2568_v15  ;;  %2358 = vmatmul.mubr.f32.gmra.mrb[6].mxu0 %v3532_v29  ;;  %v1277_v15 = vld [vmem:[#allocation5 + $0x3a8] sm:$0xff] }
  0xbf   : > { %2699 = vmatpush3.bf16.msra.mxu0 %v2696_v17  ;;  %2573 = vmatprep.subr.bf16.mxu1 %v2572_v27  ;;  %v2596_v17 = vpack.c.bf16 %v724_v8, %v723_v7  ;;  %v2724_v18 = vpack.c.bf16 %v1277_v15, %v1276_v9  ;;  %v1415_v7 = vld [vmem:[#allocation5 + $0x428] sm:$0xff]  ;;  %v1416_v9 = vld [vmem:[#allocation5 + $0x430] sm:$0xff]  ;;  %v1417_v15 = vld [vmem:[#allocation5 + $0x438] sm:$0xff] }
  0xc0   : > { %2701 = vmatprep.subr.bf16.mxu0 %v2700_v30  ;;  %2216 = vmatprep.mubr.f32.mxu1 %v571_v35  ;;  %v3551_v35 = vld [vmem:[%s3431_s10 + $0x80] sm:$0xff] }
  0xc1   : > { %2392 = vmatprep.mubr.f32.mxu0 %v3490_v62 }
  0xc2   : > { %2575 = vmatpush3.bf16.msra.mxu1 %v2572_v27  ;;  %v1279_v27 = vld [vmem:[#allocation5 + $0x3b8] sm:$0xff] }
  0xc3   : > { %2703 = vmatpush3.bf16.msra.mxu0 %v2700_v30  ;;  %2577 = vmatprep.subr.bf16.mxu1 %v2576_v36  ;;  %v2728_v30 = vpack.c.bf16 %v1279_v27, %v1278_v23 }
  0xc4   : > { %2705 = vmatprep.subr.bf16.mxu0 %v2704_v37 }
  0xc6   : > { %2579 = vmatpush3.bf16.msra.mxu1 %v2576_v36  ;;  %v2604_v36 = vpack.c.bf16 %v728_v32, %v727_v31 }
  0xc7   : > { %2707 = vmatpush3.bf16.msra.mxu0 %v2704_v37  ;;  %2581 = vmatprep.subr.bf16.mxu1 %v2580_v42  ;;  %v1854_v37 = vld [vmem:[%s3431_s10 + $0x90] sm:$0xff] }
  0xc8   : > { %2709 = vmatprep.subr.bf16.mxu0 %v2708_v43 }
  0xca   : > { %2583 = vmatpush3.bf16.msra.mxu1 %v2580_v42  ;;  %v1283_v42 = vld [vmem:[#allocation5 + $0x3d8] sm:$0xff] }
  0xcb   : > { %2711 = vmatpush3.bf16.msra.mxu0 %v2708_v43  ;;  %2585 = vmatprep.subr.bf16.mxu1 %v2584_v48  ;;  %v2608_v43 = vpack.c.bf16 %v730_v40, %v729_v39  ;;  %v2736_v44 = vpack.c.bf16 %v1283_v42, %v1282_v41 }
  0xcc   : > { %2713 = vmatprep.subr.bf16.mxu0 %v2712_v49 }
  0xce   : > { %2587 = vmatpush3.bf16.msra.mxu1 %v2584_v48  ;;  %v1285_v48 = vld [vmem:[#allocation5 + $0x3e8] sm:$0xff] }
  0xcf   : > { %2715 = vmatpush3.bf16.msra.mxu0 %v2712_v49  ;;  %2589 = vmatprep.subr.bf16.mxu1 %v2588_v56  ;;  %v2612_v49 = vpack.c.bf16 %v732_v46, %v731_v45  ;;  %v2740_v50 = vpack.c.bf16 %v1285_v48, %v1284_v47 }
  0xd0   : > { %2717 = vmatprep.subr.bf16.mxu0 %v2716_v57 }
  0xd1   : > { %2217 = vmatmul.mubr.f32.vlgmr.msra.gmra.mrb[0].mxu1 %v3479_v28  ;;  %v2600_v28 = vpack.c.bf16 %v726_v22, %v725_v20 }
  0xd2   : > { %2591 = vmatpush3.bf16.msra.mxu1 %v2588_v56  ;;  %2393 = vmatmul.mubr.f32.vlgmr.msra.gmra.mrb[0].mxu0 %v3497_v0  ;;  %v1287_v56 = vld [vmem:[#allocation5 + $0x3f8] sm:$0xff] }
  0xd3   : > { %2719 = vmatpush3.bf16.msra.mxu0 %v2716_v57  ;;  %2593 = vmatprep.subr.bf16.mxu1 %v2592_v4  ;;  %v2616_v57 = vpack.c.bf16 %v734_v52, %v733_v51 }
  0xd4   : > { %2721 = vmatprep.subr.bf16.mxu0 %v2720_v6  ;;  %2219 = vmatprep.mubr.f32.mxu1 %v3486_v54 }
  0xd5   : > { %2395 = vmatprep.mubr.f32.mxu0 %v3506_v10  ;;  %2220 = vmatmul.mubr.f32.gmra.mrb[2].mxu1 %v3494_v63 }
  0xd6   : > { %2595 = vmatpush3.bf16.msra.mxu1 %v2592_v4  ;;  %2396 = vmatmul.mubr.f32.gmra.mrb[2].mxu0 %v3513_v14  ;;  %v2752_v4 = vpack.c.bf16 %v1413_v1, %v1412_v61 }
  0xd7   : > { %2723 = vmatpush3.bf16.msra.mxu0 %v2720_v6  ;;  %2597 = vmatprep.subr.bf16.mxu1 %v2596_v17  ;;  %v1414_v6 = vld [vmem:[#allocation5 + $0x420] sm:$0xff] }
  0xd8   : > { %2725 = vmatprep.subr.bf16.mxu0 %v2724_v18  ;;  %2222 = vmatprep.mubr.f32.mxu1 %v3500_v2  ;;  %v2756_v8 = vpack.c.bf16 %v1415_v7, %v1414_v6 }
  0xd9   : > { %2398 = vmatprep.mubr.f32.mxu0 %v3522_v24  ;;  %2223 = vmatmul.mubr.f32.gmra.mrb[4].mxu1 %v3510_v12 }
  0xda   : > { %2599 = vmatpush3.bf16.msra.mxu1 %v2596_v17  ;;  %2399 = vmatmul.mubr.f32.gmra.mrb[4].mxu0 %v3529_v26  ;;  %v1425_v17 = vld [vmem:[#allocation5 + $0x478] sm:$0xff] }
  0xdb   : > { %2727 = vmatpush3.bf16.msra.mxu0 %v2724_v18  ;;  %2601 = vmatprep.subr.bf16.mxu1 %v2600_v28 }
  0xdc   : > { %2729 = vmatprep.subr.bf16.mxu0 %v2728_v30  ;;  %2225 = vmatprep.mubr.f32.mxu1 %v3516_v16 }
  0xdd   : > { %2401 = vmatprep.mubr.f32.mxu0 %v3551_v35  ;;  %2226 = vmatmul.mubr.f32.gmra.mrb[6].mxu1 %v3526_v25 }
  0xde   : > { %2603 = vmatpush3.bf16.msra.mxu1 %v2600_v28  ;;  %2402 = vmatmul.mubr.f32.gmra.mrb[6].mxu0 %v1854_v37 }
  0xdf   : > { %2731 = vmatpush3.bf16.msra.mxu0 %v2728_v30  ;;  %2605 = vmatprep.subr.bf16.mxu1 %v2604_v36 }
  0xe0   : > { %2733 = vmatprep.subr.bf16.mxu0 %v2732_v38  ;;  %2260 = vmatprep.mubr.f32.mxu1 %v3483_v53  ;;  %v2744_v53 = vpack.c.bf16 %v1287_v56, %v1286_v55 }
  0xe1   : > { %2436 = vmatprep.mubr.f32.mxu0 %v3444_v60  ;;  %v2748_v60 = vpack.c.bf16 %v1411_v59, %v1410_v58 }
  0xe2   : > { %2607 = vmatpush3.bf16.msra.mxu1 %v2604_v36  ;;  %v1871_v36 = vld [vmem:[#allocation7] ss:$0 sm:$0xff] }
  0xe3   : > { %2735 = vmatpush3.bf16.msra.mxu0 %v2732_v38  ;;  %2609 = vmatprep.subr.bf16.mxu1 %v2608_v43 }
  0xe4   : > { %2737 = vmatprep.subr.bf16.mxu0 %v2736_v44 }
  0xe6   : > { %2611 = vmatpush3.bf16.msra.mxu1 %v2608_v43 }
  0xe7   : > { %2739 = vmatpush3.bf16.msra.mxu0 %v2736_v44  ;;  %2613 = vmatprep.subr.bf16.mxu1 %v2612_v49 }
  0xe8   : > { %2741 = vmatprep.subr.bf16.mxu0 %v2740_v50 }
  0xea   : > { %2615 = vmatpush3.bf16.msra.mxu1 %v2612_v49 }
  0xeb   : > { %2743 = vmatpush3.bf16.msra.mxu0 %v2740_v50  ;;  %2617 = vmatprep.subr.bf16.mxu1 %v2616_v57 }
  0xec   : > { %2745 = vmatprep.subr.bf16.mxu0 %v2744_v53 }
  0xee   : > { %2619 = vmatpush3.bf16.msra.mxu1 %v2616_v57 }
  0xef   : > { %2747 = vmatpush3.bf16.msra.mxu0 %v2744_v53  ;;  %2780 = vmatprep.subr.bf16.mxu1 %v2748_v60 }
  0xf0   : > { %2749 = vmatprep.subr.bf16.mxu0 %v2748_v60 }
  0xf1   : > { %2261 = vmatmul.mubr.f32.vlgmr.msra.gmra.mrb[0].mxu1 %v3490_v62  ;;  %v1418_v62 = vld [vmem:[#allocation5 + $0x440] sm:$0xff] }
  0xf2   : > { %2437 = vmatmul.mubr.f32.vlgmr.msra.gmra.mrb[0].mxu0 %v3448_v3  ;;  %2788 = vmatpush3.bf16.msra.mxu1 %v2748_v60  ;;  %v2760_v3 = vpack.c.bf16 %v1417_v15, %v1416_v9 }
  0xf3   : > { %2751 = vmatpush3.bf16.msra.mxu0 %v2748_v60  ;;  %2263 = vmatprep.mubr.f32.mxu1 %v3497_v0 }
  0xf4   : > { %2439 = vmatprep.mubr.f32.mxu0 %v3451_v5  ;;  %2753 = vmatprep.subr.bf16.mxu0 %v2752_v4  ;;  %v1419_v5 = vld [vmem:[#allocation5 + $0x448] sm:$0xff] }
  0xf5   : > { %2264 = vmatmul.mubr.f32.gmra.mrb[2].mxu1 %v3506_v10  ;;  %2781 = vmatprep.subr.bf16.mxu1 %v2752_v4  ;;  %v2764_v0 = vpack.c.bf16 %v1419_v5, %v1418_v62  ;;  %v1420_v10 = vld [vmem:[#allocation5 + $0x450] sm:$0xff] }
  0xf6   : > { %2440 = vmatmul.mubr.f32.gmra.mrb[2].mxu0 %v3458_v11  ;;  %2789 = vmatpush3.bf16.msra.mxu1 %v2752_v4  ;;  %v1862_v11 = vld [vmem:[%s3431_s10 + $0x91] sm:$0xff] }
  0xf7   : > { %2755 = vmatpush3.bf16.msra.mxu0 %v2752_v4  ;;  %2266 = vmatprep.mubr.f32.mxu1 %v3513_v14 }
  0xf8   : > { %2442 = vmatprep.mubr.f32.mxu0 %v3461_v13  ;;  %2757 = vmatprep.subr.bf16.mxu0 %v2756_v8  ;;  %v1421_v13 = vld [vmem:[#allocation5 + $0x458] sm:$0xff] }
  0xf9   : > { %2267 = vmatmul.mubr.f32.gmra.mrb[4].mxu1 %v3522_v24  ;;  %2782 = vmatprep.subr.bf16.mxu1 %v2756_v8  ;;  %v2768_v14 = vpack.c.bf16 %v1421_v13, %v1420_v10  ;;  %v1423_v24 = vld [vmem:[#allocation5 + $0x468] sm:$0xff] }
  0xfa   : > { %2443 = vmatmul.mubr.f32.gmra.mrb[4].mxu0 %v3468_v19  ;;  %2790 = vmatpush3.bf16.msra.mxu1 %v2756_v8  ;;  %v1422_v19 = vld [vmem:[#allocation5 + $0x460] sm:$0xff] }
  0xfb   : > { %2759 = vmatpush3.bf16.msra.mxu0 %v2756_v8  ;;  %2269 = vmatprep.mubr.f32.mxu1 %v3529_v26  ;;  %v1424_v26 = vld [vmem:[#allocation5 + $0x470] sm:$0xff] }
  0xfc   : > { %2445 = vmatprep.mubr.f32.mxu0 %v3471_v21  ;;  %2761 = vmatprep.subr.bf16.mxu0 %v2760_v3  ;;  %v2772_v21 = vpack.c.bf16 %v1423_v24, %v1422_v19  ;;  %v2776_v18 = vpack.c.bf16 %v1425_v17, %v1424_v26 }
  0xfd   : > { %2270 = vmatmul.mubr.f32.gmra.mrb[6].mxu1 %v3551_v35  ;;  %2783 = vmatprep.subr.bf16.mxu1 %v2760_v3 }
  0xfe   : > { %2446 = vmatmul.mubr.f32.gmra.mrb[6].mxu0 %v1862_v11  ;;  %2791 = vmatpush3.bf16.msra.mxu1 %v2760_v3 }
  0xff   : > { %2763 = vmatpush3.bf16.msra.mxu0 %v2760_v3  ;;  %2784 = vmatprep.subr.bf16.mxu1 %v2764_v0 }
 0x100   : > { %2765 = vmatprep.subr.bf16.mxu0 %v2764_v0  ;;  %2480 = vmatprep.mubr.f32.mxu0 %v3486_v54  ;;  %v1870_v54 = vld [vmem:[%s3431_s10 + $0x92] sm:$0xff]  ;;  %s3051_s10 = sshll.u32 %s3201_s14, 4  ;;  %s3052_s10 = int_to_ptr.vmem [resolvable:$false] %s3051_s10 }
 0x101   : > { %2486 = vmatprep.mubr.f32.mxu1 %v3516_v16  ;;  %v3200_v16 = vmov 0.0   ;;  %s3053_s17 = scalar_lea.vmem %s3052_s10, 2048  ;;  %p3054_p7 = scmp.lt.s32.totalorder %s3605_s13, %s3052_s10 }
 0x102   : > { %2792 = vmatpush3.bf16.msra.mxu1 %v2764_v0  ;;  %310 = vst [vmem:[%s3582_s26] sm:$0x1] %v3200_v16  ;;  %311 = vst [vmem:[%s3586_s28] sm:$0x1] %v3200_v16  ;;  %p3055_p12 = scmp.lt.s32.totalorder %s3053_s17, %s3047_s7 }
 0x103   : > { %2767 = vmatpush3.bf16.msra.mxu0 %v2764_v0  ;;  %2785 = vmatprep.subr.bf16.mxu1 %v2768_v14 }
 0x104   : > { %2769 = vmatprep.subr.bf16.mxu0 %v2768_v14  ;;  %p3056_p0 = por %p3055_p12, %p3054_p7 }
 0x106   : > { %2793 = vmatpush3.bf16.msra.mxu1 %v2768_v14  ;;  %p3057_p2 = pnand %p3056_p0, %p3050_p5 }
 0x107   : > { %2771 = vmatpush3.bf16.msra.mxu0 %v2768_v14  ;;  %2786 = vmatprep.subr.bf16.mxu1 %v2772_v21 }
 0x108   : > { %2773 = vmatprep.subr.bf16.mxu0 %v2772_v21 }
 0x10a   : > { %2794 = vmatpush3.bf16.msra.mxu1 %v2772_v21 }
 0x10b   : > { %2775 = vmatpush3.bf16.msra.mxu0 %v2772_v21  ;;  %2787 = vmatprep.subr.bf16.mxu1 %v2776_v18 }
 0x10c   : > { %2777 = vmatprep.subr.bf16.mxu0 %v2776_v18 }
 0x10e   : > { %2795 = vmatpush3.bf16.msra.mxu1 %v2776_v18 }
 0x10f   : > { %2779 = vmatpush3.bf16.msra.mxu0 %v2776_v18 }
 0x111   : > { %2487 = vmatmul.mubr.f32.vlgmr.msra.gmra.mrb[8].mxu1 %v3526_v25 }
 0x112   : > { %2481 = vmatmul.mubr.f32.vlgmr.msra.gmra.mrb[0].mxu0 %v3494_v63  ;;  %2489 = vmatprep.mubr.f32.mxu1 %v3532_v29 }
 0x113   : > { %2483 = vmatprep.mubr.f32.mxu0 %v3500_v2 }
 0x115   : > { %2490 = vmatmul.mubr.f32.gmra.mrb[10].mxu1 %v1870_v54 }
 0x116   : > { %2484 = vmatmul.mubr.f32.gmra.mrb[2].mxu0 %v3510_v12 }
 0x1c4   : > { %v2262_v25 = vpop.f32.mrb[0].mxu1 }
 0x1c5   : > { %v801_v63 = vpop.f32.mrb[1].mxu1 }
 0x1c8   : > { %v2265_v20 = vpop.f32.mrb[2].mxu1 }
 0x1c9   : > { %v811_v29 = vpop.f32.mrb[3].mxu1 }
 0x1cc   : > { %v2268_v22 = vpop.f32.mrb[4].mxu1 }
 0x1cd   : > { %v2444_v23 = vpop.f32.mrb[4].mxu0  ;;  %v821_v2 = vpop.f32.mrb[5].mxu1 }
 0x1ce   : > { %v2800_v27 = vadd.f32 %v2444_v23, %v2268_v22  ;;  %v1374_v28 = vpop.f32.mrb[5].mxu0 }
 0x1cf   : > { %v2802_v12 = vadd.f32 %v1374_v28, %v821_v2 }
 0x1d0   : > { %v2271_v30 = vpop.f32.mrb[6].mxu1 }
 0x1d1   : > { %v2447_v31 = vpop.f32.mrb[6].mxu0  ;;  %v831_v32 = vpop.f32.mrb[7].mxu1 }
 0x1d2   : > { %v2804_v33 = vadd.f32 %v2447_v31, %v2271_v30  ;;  %v1384_v34 = vpop.f32.mrb[7].mxu0 }
 0x1d3   : > { %v2806_v35 = vadd.f32 %v1384_v34, %v831_v32 }
 0x1e4   : > { %v2488_v37 = vpop.f32.mrb[8].mxu1 }
 0x1e5   : > { %v2482_v38 = vpop.f32.mrb[0].mxu0  ;;  %v3590_v39 = vadd.f32 %v2800_v27, %v2488_v37  ;;  %v1512_v40 = vpop.f32.mrb[9].mxu1 }
 0x1e6   : > { %v2796_v41 = vadd.f32 %v2482_v38, %v2262_v25  ;;  %v1492_v42 = vpop.f32.mrb[1].mxu0  ;;  %v3592_v43 = vadd.f32 %v2802_v12, %v1512_v40 }
 0x1e7   : > { %v1550_v44 = vadd.f32 %v3590_v39, %v1871_v36  ;;  %v2797_v45 = vadd.f32 %v1492_v42, %v801_v63 }
 0x1e8   : > { %v1546_v46 = vadd.f32 %v2796_v41, %v1871_v36  ;;  %v1576_v47 = vmul.f32 %v2796_v41, %v2796_v41  ;;  %v1549_v48 = vadd.f32 %v3592_v43, %v1871_v36  ;;  %v2491_v49 = vpop.f32.mrb[10].mxu1 }
 0x1e9   : > { %1558 = vst [vmem:[%s291_s15 + $0x28] sm:$0xff] %v1550_v44  ;;  %v1545_v50 = vadd.f32 %v2797_v45, %v1871_v36  ;;  %v1561_v51 = vadd.f32 %v2797_v45, %v2796_v41  ;;  %v1575_v52 = vmul.f32 %v2797_v45, %v2797_v45  ;;  %v2485_v55 = vpop.f32.mrb[2].mxu0  ;;  %v3596_v56 = vadd.f32 %v2804_v33, %v2491_v49  ;;  %v1522_v57 = vpop.f32.mrb[11].mxu1 }
 0x1ea   : > { %1554 = vst [vmem:[%s291_s15 + $0x8] sm:$0xff] %v1546_v46  ;;  %1557 = vst [vmem:[%s291_s15 + $0x20] sm:$0xff] %v1549_v48  ;;  %v2798_v53 = vadd.f32 %v2485_v55, %v2265_v20  ;;  %v1502_v58 = vpop.f32.mrb[3].mxu0  ;;  %v2807_v59 = vadd.f32 %v2806_v35, %v1522_v57 }
 0x1eb   : > { %1553 = vst [vmem:[%s291_s15] sm:$0xff] %v1545_v50  ;;  %v1583_v60 = vadd.f32 %v1576_v47, %v1575_v52  ;;  %v1552_v61 = vadd.f32 %v3596_v56, %v1871_v36  ;;  %v2799_v1 = vadd.f32 %v1502_v58, %v811_v29 }
 0x1ec   : > { %v1548_v4 = vadd.f32 %v2798_v53, %v1871_v36  ;;  %v1551_v6 = vadd.f32 %v2807_v59, %v1871_v36  ;;  %v1578_v15 = vmul.f32 %v2798_v53, %v2798_v53 }
 0x1ed   : > { %1560 = vst [vmem:[%s291_s15 + $0x38] sm:$0xff] %v1552_v61  ;;  %v1547_v7 = vadd.f32 %v2799_v1, %v1871_v36  ;;  %v1562_v8 = vadd.f32 %v2799_v1, %v1561_v51  ;;  %v1577_v9 = vmul.f32 %v2799_v1, %v2799_v1 }
 0x1ee   : > { %1556 = vst [vmem:[%s291_s15 + $0x18] sm:$0xff] %v1548_v4  ;;  %1559 = vst [vmem:[%s291_s15 + $0x30] sm:$0xff] %v1551_v6 }
 0x1ef   : > { %1555 = vst [vmem:[%s291_s15 + $0x10] sm:$0xff] %v1547_v7  ;;  %v1563_v3 = vadd.f32 %v2798_v53, %v1562_v8  ;;  %v1584_v62 = vadd.f32 %v1583_v60, %v1577_v9 }
 0x1f0   : > { %3060 = shalt.err (!%p3057_p2)
}
 0x1f1   : > { %s3061_s15 = scalar_lea.hbm %s3603_s29, 1024  ;;  %s3065_s25 = scalar_lea.hbm %s3736_s3, 2048 }
 0x1f2   : > { %p3062_p6 = scmp.ne.s32.totalorder %s3603_s29, %s3061_s15  ;;  %p3066_p4 = scmp.lt.u32.totalorder %s3603_s29, %s3736_s3 }
 0x1f3   : > { %p3067_p9 = scmp.lt.u32.totalorder %s3065_s25, %s3061_s15  ;;  %p3069_p11 = scmp.lt.u32.totalorder %s3061_s15, %s3603_s29 }
 0x1f4   : > { %p3063_p10 = pnand %p3062_p6, %p3757_p1 }
 0x1f5   : > { %p3068_p8 = por %p3067_p9, %p3066_p4 }
 0x1f6   : > { %p3064_p3 = pneg %p3063_p10 }
 0x1f7   : > { %p3070_p13 = por %p3069_p11, %p3068_p8 }
 0x1f9   : > { %p3071_p5 = pnand %p3070_p13, %p3064_p3 }
 0x1fb   : > { %3074 = shalt.err (!%p3071_p5)
}
 0x1fc   : > { %s3202_s7 = smov 128   ;;  %s3203_s17 = smov 8   ;;  %v1579_v5 = vmul.f32 %v3592_v43, %v3592_v43  ;;  %v1585_v11 = vadd.f32 %v1584_v62, %v1578_v15  ;;  %v1564_v0 = vadd.f32 %v3592_v43, %v1563_v3  ;;  %v1580_v10 = vmul.f32 %v3590_v39, %v3590_v39  ;;  %v1597_v28 = vld [vmem:[%s3582_s26] sm:$0x1] }
 0x1fd   : > { %2873 = dma.vmem_to_hbm [thread:$0]  (%p3757_p1), %s3605_s13, 1024, %s3603_s29, %s1604_s8, %s3202_s7, %s3202_s7, %s3203_s17   ;;  %v1581_v24 = vmul.f32 %v2807_v59, %v2807_v59  ;;  %v1582_v26 = vmul.f32 %v3596_v56, %v3596_v56 }
 0x1fe   : > { %v1565_v13 = vadd.f32 %v3590_v39, %v1564_v0  ;;  %v1586_v14 = vadd.f32 %v1585_v11, %v1579_v5  ;;  %s1608_s30 = sand.u32 1, %s3267_s24   ;;  %s1875_s13 = sshll.u32 %s3185_s21, 4  ;;  %v1600_v31 = vld [vmem:[%s3586_s28] sm:$0x1] }
 0x1ff   : > { %s1643_s29 = sshll.u32 %s3582_s26, 4  ;;  %s1656_s8 = sshll.u32 %s3586_s28, 4  ;;  %s3651_s29 = int_to_ptr.vmem [resolvable:$true] %s1643_s29  ;;  %s3659_s8 = int_to_ptr.vmem [resolvable:$true] %s1656_s8 }
 0x200   : > { %v1566_v19 = vadd.f32 %v2807_v59, %v1565_v13  ;;  %v1587_v21 = vadd.f32 %v1586_v14, %v1580_v10  ;;  %s3649_s12 = scalar_lea.hbm %s3737_s4, %s1875_s13  ;;  %s3657_s25 = scalar_lea.hbm %s3738_s5, %s1875_s13 }
 0x201   : > { %s3661_s14 = scalar_lea.sflag [#allocation10], %s1608_s30  ;;  %s3075_s10 = scalar_lea.vmem %s3651_s29, 16 }
 0x202   : > { %v1567_v17 = vadd.f32 %v3596_v56, %v1566_v19  ;;  %v1588_v18 = vadd.f32 %v1587_v21, %v1581_v24  ;;  %p3076_p7 = scmp.ne.s32.totalorder %s3651_s29, %s3075_s10  ;;  %s3204_s7 = smov [#allocation9]  }
 0x203   : > { %s3079_s17 = sshll.u32 %s3204_s7, 4  ;;  %s3080_s17 = int_to_ptr.vmem [resolvable:$false] %s3079_s17 }
 0x204   : > { %v1568_v54 = vrot.slane %v1567_v17, 4  ;;  %v1589_v16 = vadd.f32 %v1588_v18, %v1582_v26  ;;  %p3077_p12 = pnand %p3076_p7, %p3757_p1  ;;  %s3081_s15 = scalar_lea.vmem %s3080_s17, 32 }
 0x205   : > { %p3082_p2 = scmp.lt.s32.totalorder %s3651_s29, %s3080_s17  ;;  %p3083_p6 = scmp.lt.s32.totalorder %s3081_s15, %s3075_s10 }
 0x206   : > { %v1569_v25 = vadd.f32 %v1568_v54, %v1567_v17  ;;  %v1590_v63 = vrot.slane %v1589_v16, 4  ;;  %p3078_p0 = pneg %p3077_p12 }
 0x207   : > { %p3084_p10 = por %p3083_p6, %p3082_p2 }
 0x208   : > { %v1570_v20 = vrot.slane %v1569_v25, 2  ;;  %v1591_v29 = vadd.f32 %v1590_v63, %v1589_v16 }
 0x209   : > { %p3085_p3 = pnand %p3084_p10, %p3078_p0 }
 0x20a   : > { %v1571_v22 = vadd.f32 %v1570_v20, %v1569_v25  ;;  %v1592_v23 = vrot.slane %v1591_v29, 2 }
 0x20c   : > { %v1572_v2 = vrot.slane %v1571_v22, 1  ;;  %v1593_v27 = vadd.f32 %v1592_v23, %v1591_v29 }
 0x20e   : > { %v1573_v12 = vadd.f32 %v1572_v2, %v1571_v22  ;;  %v1594_v30 = vrot.slane %v1593_v27, 1 }
 0x210   : > { %v1595_v32 = vadd.f32 %v1594_v30, %v1593_v27  ;;  %v1598_v33 = vadd.f32 %v1597_v28, %v1573_v12 }
 0x212   : > { %1599 = vst [vmem:[%s3582_s26] sm:$0x1] %v1598_v33  ;;  %v1601_v34 = vadd.f32 %v1600_v31, %v1595_v32 }
 0x213   : > { %3088 = shalt.err (!%p3085_p3)
}
 0x214   : > { %s3089_s26 = scalar_lea.hbm %s3649_s12, 16  ;;  %s3093_s9 = scalar_lea.hbm %s3737_s4, 32 }
 0x215   : > { %p3090_p4 = scmp.ne.s32.totalorder %s3649_s12, %s3089_s26  ;;  %p3094_p11 = scmp.lt.u32.totalorder %s3649_s12, %s3737_s4 }
 0x216   : > { %p3095_p13 = scmp.lt.u32.totalorder %s3093_s9, %s3089_s26  ;;  %p3097_p7 = scmp.lt.u32.totalorder %s3089_s26, %s3649_s12 }
 0x217   : > { %p3091_p9 = pnand %p3090_p4, %p3757_p1 }
 0x218   : > { %p3096_p5 = por %p3095_p13, %p3094_p11 }
 0x219   : > { %p3092_p8 = pneg %p3091_p9 }
 0x21a   : > { %p3098_p12 = por %p3097_p7, %p3096_p5 }
 0x21c   : > { %p3099_p0 = pnand %p3098_p12, %p3092_p8 }
 0x21e   : > { %3102 = shalt.err (!%p3099_p0)
}
 0x21f   : > { %2874 = dma.vmem_to_hbm [thread:$0]  (%p3757_p1), %s3651_s29, 16, %s3649_s12, %s3661_s14   ;;  %1602 = vst [vmem:[%s3586_s28] sm:$0x1] %v1601_v34 }
 0x220   : > { %s3103_s10 = scalar_lea.vmem %s3659_s8, 16  ;;  %s3205_s7 = smov [#allocation11]  }
 0x221   : > { %p3104_p2 = scmp.ne.s32.totalorder %s3659_s8, %s3103_s10  ;;  %s3107_s17 = sshll.u32 %s3205_s7, 4  ;;  %s3108_s17 = int_to_ptr.vmem [resolvable:$false] %s3107_s17 }
 0x222   : > { %s3109_s15 = scalar_lea.vmem %s3108_s17, 32  ;;  %p3110_p3 = scmp.lt.s32.totalorder %s3659_s8, %s3108_s17 }
 0x223   : > { %p3105_p6 = pnand %p3104_p2, %p3757_p1  ;;  %p3111_p4 = scmp.lt.s32.totalorder %s3109_s15, %s3103_s10 }
 0x225   : > { %p3106_p10 = pneg %p3105_p6  ;;  %p3112_p9 = por %p3111_p4, %p3110_p3 }
 0x227   : > { %p3113_p8 = pnand %p3112_p9, %p3106_p10 }
 0x229   : > { %3116 = shalt.err (!%p3113_p8)
}
 0x22a   : > { %s3117_s28 = scalar_lea.hbm %s3657_s25, 16  ;;  %s3121_s26 = scalar_lea.hbm %s3738_s5, 32 }
 0x22b   : > { %p3118_p11 = scmp.ne.s32.totalorder %s3657_s25, %s3117_s28  ;;  %p3122_p7 = scmp.lt.u32.totalorder %s3657_s25, %s3738_s5 }
 0x22c   : > { %p3123_p12 = scmp.lt.u32.totalorder %s3121_s26, %s3117_s28  ;;  %p3125_p2 = scmp.lt.u32.totalorder %s3117_s28, %s3657_s25 }
 0x22d   : > { %p3119_p13 = pnand %p3118_p11, %p3757_p1 }
 0x22e   : > { %p3124_p0 = por %p3123_p12, %p3122_p7 }
 0x22f   : > { %p3120_p5 = pneg %p3119_p13 }
 0x230   : > { %p3126_p6 = por %p3125_p2, %p3124_p0 }
 0x232   : > { %p3127_p10 = pnand %p3126_p6, %p3120_p5 }
 0x234   : > { %3130 = shalt.err (!%p3127_p10)
}
 0x235   : > { %2875 = dma.vmem_to_hbm [thread:$0]  (%p3757_p1), %s3659_s8, 16, %s3657_s25, %s3661_s14  }
 0x236 PF: > { %s1668_s9 = sand.u32 1, %s3173_s18   ;;  %p3758_p3 = scmp.ne.s32.totalorder %s3746_s27, 0 }
 0x237   : > { %p3759_p4 = scmp.ge.s32.totalorder %s3193_s23, 2  ;;  %s1669_s21 = scalar_lea.sflag [#allocation4], %s1668_s9 }
 0x239   : > { %p2891_p9 = pnand %p3759_p4, %p3758_p3 }
 0x23b   : > { %3164 = dma.done.wait (!%p2891_p9), %s1669_s21, 1024  }
 0x23c   : > { %3166 = vsyncadd (!%p2891_p9), %s1669_s21, 4294966272  ;;  %s3760_s24 = sadd.s32 4294967294, %s3193_s23  }
 0x23d   : > { %s1677_s10 = sand.u32 1, %s3760_s24  }
 0x23e   : > { %s1678_s7 = scalar_lea.sflag [#allocation10], %s1677_s10 }
 0x23f   : > { %3168 = dma.done.wait (!%p2891_p9), %s1678_s7, 32  }
 0x240   : > { %3170 = vsyncadd (!%p2891_p9), %s1678_s7, 4294967264  ;;  %s26_s23 = sadd.s32 1, %s3193_s23   ;;  %s3761_s18 = smov %s3177_s19 }
 0x241   : > { %p23_p1 = scmp.ge.s32.totalorder %s26_s23, 4   ;;  %s3762_s19 = smov %s3181_s20 }
 0x242   : > { %s3763_s20 = smov %s3383_s16  ;;  %s3764_s21 = smov %s3189_s22 }
 0x243   : > { %s3765_s22 = smov %s3767_s11  ;;  %25 = sbr.rel (!%p23_p1) target bundleno = 9 (0x9), region = 131 }
 0x24a   :  { %1690 = vsyncpa [#allocation3], 1 }
 0x24b   :  { %1692 = vsyncpa [#allocation3 + $0x1], 1 }
 0x24c   :  { %1693 = vsyncpa [#allocation6], 1 }
 0x24d   :  { %1694 = vsyncpa [#allocation4], 1 }
 0x24e   :  { %1696 = vsyncpa [#allocation4 + $0x1], 1 }
 0x24f   :  { %1697 = vsyncpa [#allocation10], 1 }
 0x250   :  { %1699 = vsyncpa [#allocation10 + $0x1], 1 }

</bundles_post_ra>
